<compile_context>
chip_gen: v7x
topology: tpu7x:2x2x1
jax: 0.10.0
libtpu: 0.0.40
codegen_flags: <defaults>
</compile_context>

<pallas_src>
import functools

import jax
import jax.numpy as jnp
from jax.experimental import pallas as pl
from jax.experimental.pallas import tpu as pltpu

_EPS = 1e-5  # InstanceNorm2d default eps


# ----------------------------------------------------------------------------
# In-kernel helpers
# ----------------------------------------------------------------------------
def _reflect_pad_into(pad_ref, h):
    """Write ReflectionPad2d(1) of h: (H, W, C) into pad_ref: (H+2, W+2, C)."""
    H, W = h.shape[0], h.shape[1]
    dt = pad_ref.dtype
    pad_ref[1:H + 1, 1:W + 1, :] = h.astype(dt)                 # interior
    pad_ref[0:1, 1:W + 1, :] = h[1:2].astype(dt)                # top    (reflect row 1)
    pad_ref[H + 1:H + 2, 1:W + 1, :] = h[H - 2:H - 1].astype(dt)  # bottom (reflect row H-2)
    # columns (including corners) reflect from the already-written padded buffer
    pad_ref[:, 0:1, :] = pad_ref[:, 2:3, :]                     # left   = padded col 2
    pad_ref[:, W + 1:W + 2, :] = pad_ref[:, W - 1:W, :]         # right  = padded col W-1


def _conv3x3_from_pad(pad_ref, w_taps, b_row, H, W, C):
    """3x3 conv as 9 shifted MXU matmuls from the VMEM-resident padded activation.

    pad_ref: (H+2, W+2, C) f32 scratch, w_taps: (9, C, C) bf16, b_row: (1, C) f32.
    Returns (H*W, C) f32.
    """
    acc = jnp.zeros((H * W, C), jnp.float32)
    t = 0
    for dh in range(3):
        for dw in range(3):
            tap = pad_ref[dh:dh + H, dw:dw + W, :].reshape(H * W, C)
            acc = acc + jnp.dot(tap.astype(jnp.bfloat16), w_taps[t],
                                preferred_element_type=jnp.float32)
            t += 1
    return acc + b_row


def _instance_norm(h2d):
    """InstanceNorm2d(affine=False): per-channel normalization over H*W. h2d: (HW, C) f32."""
    mean = jnp.mean(h2d, axis=0, keepdims=True)
    centered = h2d - mean
    var = jnp.mean(centered * centered, axis=0, keepdims=True)  # biased var, like PyTorch
    return centered * jax.lax.rsqrt(var + _EPS)


# ----------------------------------------------------------------------------
# Fused ResBlock kernel (one grid step == one image, fully VMEM resident)
# ----------------------------------------------------------------------------
def _resblock_kernel(x_ref, w1_ref, b1_ref, w2_ref, b2_ref, o_ref, pad_ref):
    _, H, W, C = x_ref.shape
    x = x_ref[0]            # (H, W, C) f32
    w1 = w1_ref[...]        # (9, C, C) bf16
    w2 = w2_ref[...]        # (9, C, C) bf16
    b1 = b1_ref[...]        # (1, C) f32
    b2 = b2_ref[...]        # (1, C) f32

    # --- ReflectionPad2d(1) -> Conv2d(3x3, bias) -> InstanceNorm2d -> ReLU ---
    _reflect_pad_into(pad_ref, x)
    h = _conv3x3_from_pad(pad_ref, w1, b1, H, W, C)
    h = jnp.maximum(_instance_norm(h), 0.0)
    # (use_dropout=False -> no Dropout layer)

    # --- ReflectionPad2d(1) -> Conv2d(3x3, bias) -> InstanceNorm2d ---
    _reflect_pad_into(pad_ref, h.reshape(H, W, C))
    h = _conv3x3_from_pad(pad_ref, w2, b2, H, W, C)
    h = _instance_norm(h)

    # --- residual add + final ReLU, fused into the epilogue ---
    y = jnp.maximum(x.reshape(H * W, C) + h, 0.0)
    o_ref[0] = y.reshape(H, W, C).astype(o_ref.dtype)


# ----------------------------------------------------------------------------
# Wrapper (PyTorch-style NCHW in/out)
# ----------------------------------------------------------------------------
def _prep_weight(w):
    # (Cout, Cin, 3, 3) torch layout -> (9, Cin, Cout) bf16, tap order (kh, kw) row-major.
    cout, cin = w.shape[0], w.shape[1]
    return jnp.transpose(w, (2, 3, 1, 0)).reshape(9, cin, cout).astype(jnp.bfloat16)


def resblock_forward(params, x_nchw):
    x = jnp.transpose(x_nchw, (0, 2, 3, 1)).astype(jnp.float32)   # NCHW -> NHWC
    N, H, W, C = x.shape

    w1 = _prep_weight(params['w1'])
    w2 = _prep_weight(params['w2'])
    b1 = params['b1'].reshape(1, C).astype(jnp.float32)
    b2 = params['b2'].reshape(1, C).astype(jnp.float32)

    out = pl.pallas_call(
        _resblock_kernel,
        out_shape=jax.ShapeDtypeStruct((N, H, W, C), jnp.float32),
        grid=(N,),
        in_specs=[
            pl.BlockSpec((1, H, W, C), lambda n: (n, 0, 0, 0)),   # x (one image per step)
            pl.BlockSpec((9, C, C), lambda n: (0, 0, 0)),         # w1 (VMEM resident)
            pl.BlockSpec((1, C), lambda n: (0, 0)),               # b1
            pl.BlockSpec((9, C, C), lambda n: (0, 0, 0)),         # w2 (VMEM resident)
            pl.BlockSpec((1, C), lambda n: (0, 0)),               # b2
        ],
        out_specs=pl.BlockSpec((1, H, W, C), lambda n: (n, 0, 0, 0)),
        scratch_shapes=[pltpu.VMEM((H + 2, W + 2, C), jnp.float32)],  # padded activation
        compiler_params=pltpu.CompilerParams(
            dimension_semantics=("parallel",),
            vmem_limit_bytes=32 * 1024 * 1024,
        ),
    )(x, w1, b1, w2, b2)

    return jnp.transpose(out, (0, 3, 1, 2))   # NHWC -> NCHW


# ----------------------------------------------------------------------------
# Pure-JAX reference (f32) for a correctness check
# ----------------------------------------------------------------------------
def _resblock_reference(params, x_nchw):
    x = jnp.transpose(x_nchw, (0, 2, 3, 1)).astype(jnp.float32)

    def conv3x3(h, w, b):
        n, hh, ww, c = h.shape
        cout = w.shape[0]
        hp = jnp.pad(h, ((0, 0), (1, 1), (1, 1), (0, 0)), mode='reflect')
        wt = jnp.transpose(w, (2, 3, 1, 0))  # (3, 3, Cin, Cout)
        out = jnp.zeros((n, hh, ww, cout), jnp.float32)
        for dh in range(3):
            for dw in range(3):
                out = out + jnp.einsum('nhwc,cd->nhwd',
                                       hp[:, dh:dh + hh, dw:dw + ww, :], wt[dh, dw],
                                       precision=jax.lax.Precision.HIGHEST)
        return out + b.reshape(1, 1, 1, cout)

    def inorm(h):
        mean = jnp.mean(h, axis=(1, 2), keepdims=True)
        var = jnp.mean((h - mean) ** 2, axis=(1, 2), keepdims=True)
        return (h - mean) * jax.lax.rsqrt(var + _EPS)

    h = jnp.maximum(inorm(conv3x3(x, params['w1'], params['b1'])), 0.0)
    h = inorm(conv3x3(h, params['w2'], params['b2']))
    y = jnp.maximum(x + h, 0.0)
    return jnp.transpose(y, (0, 3, 1, 2))


# ----------------------------------------------------------------------------
# Parameters
# ----------------------------------------------------------------------------
def init_params(key, dim):
    k1, k2, k3, k4 = jax.random.split(key, 4)
    return {
        'w1': jax.random.normal(k1, (dim, dim, 3, 3), jnp.float32) * 0.05,
        'b1': jax.random.normal(k2, (dim,), jnp.float32) * 0.05,
        'w2': jax.random.normal(k3, (dim, dim, 3, 3), jnp.float32) * 0.05,
        'b2': jax.random.normal(k4, (dim,), jnp.float32) * 0.05,
    }


if __name__ == "__main__":
    key = jax.random.PRNGKey(0)
    pkey, xkey = jax.random.split(key)

    N, dim, H, W = 2, 64, 16, 16
    params = init_params(pkey, dim)
    x = jax.random.normal(xkey, (N, dim, H, W), jnp.float32)

    fwd = jax.jit(functools.partial(resblock_forward, params))
    y = fwd(x)
    jax.block_until_ready(y)

    assert y.shape == (N, dim, H, W), y.shape
    assert bool(jnp.all(jnp.isfinite(y)))
    assert bool(jnp.all(y >= 0.0))  # final ReLU

    y_ref = _resblock_reference(params, x)
    err = float(jnp.max(jnp.abs(y - y_ref)))
    assert err < 1e-1, f"max abs error vs reference too large: {err}"

    print("KERNEL_OK")
</pallas_src>

<mosaic_0001>
module attributes {stable_mosaic.version = 11 : i64} {
  func.func @_resblock_kernel(%arg0: i32, %arg1: memref<1x16x16x64xf32, #tpu.memory_space<vmem>>, %arg2: memref<9x64x64xbf16, #tpu.memory_space<vmem>>, %arg3: memref<1x64xf32, #tpu.memory_space<vmem>>, %arg4: memref<9x64x64xbf16, #tpu.memory_space<vmem>>, %arg5: memref<1x64xf32, #tpu.memory_space<vmem>>, %arg6: memref<1x16x16x64xf32, #tpu.memory_space<vmem>>, %arg7: memref<18x18x64xf32, #tpu.memory_space<vmem>>) attributes {dimension_semantics = [#tpu.dimension_semantics<parallel>], iteration_bounds = array<i64: 2>, scalar_prefetch = 0 : i64, scratch_operands = 1 : i64, tpu.core_type = #tpu.core_type<tc>, window_params = [{transform_indices = @transform_0, window_bounds = array<i64: 1, 16, 16, 64>}, {pipeline_mode = #tpu.pipeline_mode<synchronous>, transform_indices = @transform_1, window_bounds = array<i64: 9, 64, 64>}, {pipeline_mode = #tpu.pipeline_mode<synchronous>, transform_indices = @transform_2, window_bounds = array<i64: 1, 64>}, {pipeline_mode = #tpu.pipeline_mode<synchronous>, transform_indices = @transform_3, window_bounds = array<i64: 9, 64, 64>}, {pipeline_mode = #tpu.pipeline_mode<synchronous>, transform_indices = @transform_4, window_bounds = array<i64: 1, 64>}, {transform_indices = @transform_5, window_bounds = array<i64: 1, 16, 16, 64>}]} {
    %c0 = arith.constant 0 : index
    %c0_0 = arith.constant 0 : index
    %c0_1 = arith.constant 0 : index
    %c0_2 = arith.constant 0 : index
    %0 = vector.load %arg1[%c0, %c0_0, %c0_1, %c0_2] : memref<1x16x16x64xf32, #tpu.memory_space<vmem>>, vector<1x16x16x64xf32>
    %1 = vector.shape_cast %0 : vector<1x16x16x64xf32> to vector<16x16x64xf32>
    %c0_3 = arith.constant 0 : index
    %c0_4 = arith.constant 0 : index
    %c0_5 = arith.constant 0 : index
    %2 = vector.load %arg2[%c0_3, %c0_4, %c0_5] : memref<9x64x64xbf16, #tpu.memory_space<vmem>>, vector<9x64x64xbf16>
    %c0_6 = arith.constant 0 : index
    %c0_7 = arith.constant 0 : index
    %c0_8 = arith.constant 0 : index
    %3 = vector.load %arg4[%c0_6, %c0_7, %c0_8] : memref<9x64x64xbf16, #tpu.memory_space<vmem>>, vector<9x64x64xbf16>
    %c0_9 = arith.constant 0 : index
    %c0_10 = arith.constant 0 : index
    %4 = vector.load %arg3[%c0_9, %c0_10] : memref<1x64xf32, #tpu.memory_space<vmem>>, vector<1x64xf32>
    %c0_11 = arith.constant 0 : index
    %c0_12 = arith.constant 0 : index
    %5 = vector.load %arg5[%c0_11, %c0_12] : memref<1x64xf32, #tpu.memory_space<vmem>>, vector<1x64xf32>
    %c1 = arith.constant 1 : index
    %c1_13 = arith.constant 1 : index
    %c0_14 = arith.constant 0 : index
    %6 = vector.load %arg7[%c1, %c1_13, %c0_14] : memref<18x18x64xf32, #tpu.memory_space<vmem>>, vector<16x16x64xf32>
    tpu.vector_store %arg7[%c1, %c1_13, %c0_14], %1 {strides = array<i32>} : memref<18x18x64xf32, #tpu.memory_space<vmem>>, vector<16x16x64xf32>,
    %7 = vector.extract_strided_slice %1 {offsets = [1, 0, 0], sizes = [1, 16, 64], strides = [1, 1, 1]} : vector<16x16x64xf32> to vector<1x16x64xf32>
    %c0_15 = arith.constant 0 : index
    %c1_16 = arith.constant 1 : index
    %c0_17 = arith.constant 0 : index
    %8 = vector.load %arg7[%c0_15, %c1_16, %c0_17] : memref<18x18x64xf32, #tpu.memory_space<vmem>>, vector<1x16x64xf32>
    tpu.vector_store %arg7[%c0_15, %c1_16, %c0_17], %7 {strides = array<i32>} : memref<18x18x64xf32, #tpu.memory_space<vmem>>, vector<1x16x64xf32>,
    %9 = vector.extract_strided_slice %1 {offsets = [14, 0, 0], sizes = [1, 16, 64], strides = [1, 1, 1]} : vector<16x16x64xf32> to vector<1x16x64xf32>
    %c17 = arith.constant 17 : index
    %c1_18 = arith.constant 1 : index
    %c0_19 = arith.constant 0 : index
    %10 = vector.load %arg7[%c17, %c1_18, %c0_19] : memref<18x18x64xf32, #tpu.memory_space<vmem>>, vector<1x16x64xf32>
    tpu.vector_store %arg7[%c17, %c1_18, %c0_19], %9 {strides = array<i32>} : memref<18x18x64xf32, #tpu.memory_space<vmem>>, vector<1x16x64xf32>,
    %c0_20 = arith.constant 0 : index
    %c2 = arith.constant 2 : index
    %c0_21 = arith.constant 0 : index
    %11 = vector.load %arg7[%c0_20, %c2, %c0_21] : memref<18x18x64xf32, #tpu.memory_space<vmem>>, vector<18x1x64xf32>
    %c0_22 = arith.constant 0 : index
    %c0_23 = arith.constant 0 : index
    %c0_24 = arith.constant 0 : index
    %12 = vector.load %arg7[%c0_22, %c0_23, %c0_24] : memref<18x18x64xf32, #tpu.memory_space<vmem>>, vector<18x1x64xf32>
    tpu.vector_store %arg7[%c0_22, %c0_23, %c0_24], %11 {strides = array<i32>} : memref<18x18x64xf32, #tpu.memory_space<vmem>>, vector<18x1x64xf32>,
    %c0_25 = arith.constant 0 : index
    %c15 = arith.constant 15 : index
    %c0_26 = arith.constant 0 : index
    %13 = vector.load %arg7[%c0_25, %c15, %c0_26] : memref<18x18x64xf32, #tpu.memory_space<vmem>>, vector<18x1x64xf32>
    %c0_27 = arith.constant 0 : index
    %c17_28 = arith.constant 17 : index
    %c0_29 = arith.constant 0 : index
    %14 = vector.load %arg7[%c0_27, %c17_28, %c0_29] : memref<18x18x64xf32, #tpu.memory_space<vmem>>, vector<18x1x64xf32>
    tpu.vector_store %arg7[%c0_27, %c17_28, %c0_29], %13 {strides = array<i32>} : memref<18x18x64xf32, #tpu.memory_space<vmem>>, vector<18x1x64xf32>,
    %cst = arith.constant 0.000000e+00 : f32
    %15 = vector.broadcast %cst : f32 to vector<256x64xf32>
    %c0_30 = arith.constant 0 : index
    %c0_31 = arith.constant 0 : index
    %c0_32 = arith.constant 0 : index
    %16 = vector.load %arg7[%c0_30, %c0_31, %c0_32] : memref<18x18x64xf32, #tpu.memory_space<vmem>>, vector<16x16x64xf32>
    %17 = vector.shape_cast %16 : vector<16x16x64xf32> to vector<256x64xf32>
    %18 = arith.truncf %17 : vector<256x64xf32> to vector<256x64xbf16>
    %19 = vector.extract_strided_slice %2 {offsets = [0, 0, 0], sizes = [1, 64, 64], strides = [1, 1, 1]} : vector<9x64x64xbf16> to vector<1x64x64xbf16>
    %20 = vector.shape_cast %19 : vector<1x64x64xbf16> to vector<64x64xbf16>
    %cst_33 = arith.constant dense<0.000000e+00> : vector<256x64xf32>
    %21 = tpu.matmul %18, %20, %cst_33 {dimension_numbers = #tpu.dot_dimension_numbers<[1], [0], [0], [1], [0, 0, 1, 1], [], []>} : vector<256x64xbf16>, vector<64x64xbf16>, vector<256x64xf32> -> vector<256x64xf32>
    %22 = arith.addf %15, %21 : vector<256x64xf32>
    %c0_34 = arith.constant 0 : index
    %c1_35 = arith.constant 1 : index
    %c0_36 = arith.constant 0 : index
    %23 = vector.load %arg7[%c0_34, %c1_35, %c0_36] : memref<18x18x64xf32, #tpu.memory_space<vmem>>, vector<16x16x64xf32>
    %24 = vector.shape_cast %23 : vector<16x16x64xf32> to vector<256x64xf32>
    %25 = arith.truncf %24 : vector<256x64xf32> to vector<256x64xbf16>
    %26 = vector.extract_strided_slice %2 {offsets = [1, 0, 0], sizes = [1, 64, 64], strides = [1, 1, 1]} : vector<9x64x64xbf16> to vector<1x64x64xbf16>
    %27 = vector.shape_cast %26 : vector<1x64x64xbf16> to vector<64x64xbf16>
    %cst_37 = arith.constant dense<0.000000e+00> : vector<256x64xf32>
    %28 = tpu.matmul %25, %27, %cst_37 {dimension_numbers = #tpu.dot_dimension_numbers<[1], [0], [0], [1], [0, 0, 1, 1], [], []>} : vector<256x64xbf16>, vector<64x64xbf16>, vector<256x64xf32> -> vector<256x64xf32>
    %29 = arith.addf %22, %28 : vector<256x64xf32>
    %c0_38 = arith.constant 0 : index
    %c2_39 = arith.constant 2 : index
    %c0_40 = arith.constant 0 : index
    %30 = vector.load %arg7[%c0_38, %c2_39, %c0_40] : memref<18x18x64xf32, #tpu.memory_space<vmem>>, vector<16x16x64xf32>
    %31 = vector.shape_cast %30 : vector<16x16x64xf32> to vector<256x64xf32>
    %32 = arith.truncf %31 : vector<256x64xf32> to vector<256x64xbf16>
    %33 = vector.extract_strided_slice %2 {offsets = [2, 0, 0], sizes = [1, 64, 64], strides = [1, 1, 1]} : vector<9x64x64xbf16> to vector<1x64x64xbf16>
    %34 = vector.shape_cast %33 : vector<1x64x64xbf16> to vector<64x64xbf16>
    %cst_41 = arith.constant dense<0.000000e+00> : vector<256x64xf32>
    %35 = tpu.matmul %32, %34, %cst_41 {dimension_numbers = #tpu.dot_dimension_numbers<[1], [0], [0], [1], [0, 0, 1, 1], [], []>} : vector<256x64xbf16>, vector<64x64xbf16>, vector<256x64xf32> -> vector<256x64xf32>
    %36 = arith.addf %29, %35 : vector<256x64xf32>
    %c1_42 = arith.constant 1 : index
    %c0_43 = arith.constant 0 : index
    %c0_44 = arith.constant 0 : index
    %37 = vector.load %arg7[%c1_42, %c0_43, %c0_44] : memref<18x18x64xf32, #tpu.memory_space<vmem>>, vector<16x16x64xf32>
    %38 = vector.shape_cast %37 : vector<16x16x64xf32> to vector<256x64xf32>
    %39 = arith.truncf %38 : vector<256x64xf32> to vector<256x64xbf16>
    %40 = vector.extract_strided_slice %2 {offsets = [3, 0, 0], sizes = [1, 64, 64], strides = [1, 1, 1]} : vector<9x64x64xbf16> to vector<1x64x64xbf16>
    %41 = vector.shape_cast %40 : vector<1x64x64xbf16> to vector<64x64xbf16>
    %cst_45 = arith.constant dense<0.000000e+00> : vector<256x64xf32>
    %42 = tpu.matmul %39, %41, %cst_45 {dimension_numbers = #tpu.dot_dimension_numbers<[1], [0], [0], [1], [0, 0, 1, 1], [], []>} : vector<256x64xbf16>, vector<64x64xbf16>, vector<256x64xf32> -> vector<256x64xf32>
    %43 = arith.addf %36, %42 : vector<256x64xf32>
    %c1_46 = arith.constant 1 : index
    %c1_47 = arith.constant 1 : index
    %c0_48 = arith.constant 0 : index
    %44 = vector.load %arg7[%c1_46, %c1_47, %c0_48] : memref<18x18x64xf32, #tpu.memory_space<vmem>>, vector<16x16x64xf32>
    %45 = vector.shape_cast %44 : vector<16x16x64xf32> to vector<256x64xf32>
    %46 = arith.truncf %45 : vector<256x64xf32> to vector<256x64xbf16>
    %47 = vector.extract_strided_slice %2 {offsets = [4, 0, 0], sizes = [1, 64, 64], strides = [1, 1, 1]} : vector<9x64x64xbf16> to vector<1x64x64xbf16>
    %48 = vector.shape_cast %47 : vector<1x64x64xbf16> to vector<64x64xbf16>
    %cst_49 = arith.constant dense<0.000000e+00> : vector<256x64xf32>
    %49 = tpu.matmul %46, %48, %cst_49 {dimension_numbers = #tpu.dot_dimension_numbers<[1], [0], [0], [1], [0, 0, 1, 1], [], []>} : vector<256x64xbf16>, vector<64x64xbf16>, vector<256x64xf32> -> vector<256x64xf32>
    %50 = arith.addf %43, %49 : vector<256x64xf32>
    %c1_50 = arith.constant 1 : index
    %c2_51 = arith.constant 2 : index
    %c0_52 = arith.constant 0 : index
    %51 = vector.load %arg7[%c1_50, %c2_51, %c0_52] : memref<18x18x64xf32, #tpu.memory_space<vmem>>, vector<16x16x64xf32>
    %52 = vector.shape_cast %51 : vector<16x16x64xf32> to vector<256x64xf32>
    %53 = arith.truncf %52 : vector<256x64xf32> to vector<256x64xbf16>
    %54 = vector.extract_strided_slice %2 {offsets = [5, 0, 0], sizes = [1, 64, 64], strides = [1, 1, 1]} : vector<9x64x64xbf16> to vector<1x64x64xbf16>
    %55 = vector.shape_cast %54 : vector<1x64x64xbf16> to vector<64x64xbf16>
    %cst_53 = arith.constant dense<0.000000e+00> : vector<256x64xf32>
    %56 = tpu.matmul %53, %55, %cst_53 {dimension_numbers = #tpu.dot_dimension_numbers<[1], [0], [0], [1], [0, 0, 1, 1], [], []>} : vector<256x64xbf16>, vector<64x64xbf16>, vector<256x64xf32> -> vector<256x64xf32>
    %57 = arith.addf %50, %56 : vector<256x64xf32>
    %c2_54 = arith.constant 2 : index
    %c0_55 = arith.constant 0 : index
    %c0_56 = arith.constant 0 : index
    %58 = vector.load %arg7[%c2_54, %c0_55, %c0_56] : memref<18x18x64xf32, #tpu.memory_space<vmem>>, vector<16x16x64xf32>
    %59 = vector.shape_cast %58 : vector<16x16x64xf32> to vector<256x64xf32>
    %60 = arith.truncf %59 : vector<256x64xf32> to vector<256x64xbf16>
    %61 = vector.extract_strided_slice %2 {offsets = [6, 0, 0], sizes = [1, 64, 64], strides = [1, 1, 1]} : vector<9x64x64xbf16> to vector<1x64x64xbf16>
    %62 = vector.shape_cast %61 : vector<1x64x64xbf16> to vector<64x64xbf16>
    %cst_57 = arith.constant dense<0.000000e+00> : vector<256x64xf32>
    %63 = tpu.matmul %60, %62, %cst_57 {dimension_numbers = #tpu.dot_dimension_numbers<[1], [0], [0], [1], [0, 0, 1, 1], [], []>} : vector<256x64xbf16>, vector<64x64xbf16>, vector<256x64xf32> -> vector<256x64xf32>
    %64 = arith.addf %57, %63 : vector<256x64xf32>
    %c2_58 = arith.constant 2 : index
    %c1_59 = arith.constant 1 : index
    %c0_60 = arith.constant 0 : index
    %65 = vector.load %arg7[%c2_58, %c1_59, %c0_60] : memref<18x18x64xf32, #tpu.memory_space<vmem>>, vector<16x16x64xf32>
    %66 = vector.shape_cast %65 : vector<16x16x64xf32> to vector<256x64xf32>
    %67 = arith.truncf %66 : vector<256x64xf32> to vector<256x64xbf16>
    %68 = vector.extract_strided_slice %2 {offsets = [7, 0, 0], sizes = [1, 64, 64], strides = [1, 1, 1]} : vector<9x64x64xbf16> to vector<1x64x64xbf16>
    %69 = vector.shape_cast %68 : vector<1x64x64xbf16> to vector<64x64xbf16>
    %cst_61 = arith.constant dense<0.000000e+00> : vector<256x64xf32>
    %70 = tpu.matmul %67, %69, %cst_61 {dimension_numbers = #tpu.dot_dimension_numbers<[1], [0], [0], [1], [0, 0, 1, 1], [], []>} : vector<256x64xbf16>, vector<64x64xbf16>, vector<256x64xf32> -> vector<256x64xf32>
    %71 = arith.addf %64, %70 : vector<256x64xf32>
    %c2_62 = arith.constant 2 : index
    %c2_63 = arith.constant 2 : index
    %c0_64 = arith.constant 0 : index
    %72 = vector.load %arg7[%c2_62, %c2_63, %c0_64] : memref<18x18x64xf32, #tpu.memory_space<vmem>>, vector<16x16x64xf32>
    %73 = vector.shape_cast %72 : vector<16x16x64xf32> to vector<256x64xf32>
    %74 = arith.truncf %73 : vector<256x64xf32> to vector<256x64xbf16>
    %75 = vector.extract_strided_slice %2 {offsets = [8, 0, 0], sizes = [1, 64, 64], strides = [1, 1, 1]} : vector<9x64x64xbf16> to vector<1x64x64xbf16>
    %76 = vector.shape_cast %75 : vector<1x64x64xbf16> to vector<64x64xbf16>
    %cst_65 = arith.constant dense<0.000000e+00> : vector<256x64xf32>
    %77 = tpu.matmul %74, %76, %cst_65 {dimension_numbers = #tpu.dot_dimension_numbers<[1], [0], [0], [1], [0, 0, 1, 1], [], []>} : vector<256x64xbf16>, vector<64x64xbf16>, vector<256x64xf32> -> vector<256x64xf32>
    %78 = arith.addf %71, %77 : vector<256x64xf32>
    %79 = vector.broadcast %4 : vector<1x64xf32> to vector<256x64xf32>
    %80 = arith.addf %78, %79 : vector<256x64xf32>
    %cst_66 = arith.constant dense<0.000000e+00> : vector<64xf32>
    %81 = vector.multi_reduction <add>, %80, %cst_66 [0] : vector<256x64xf32> to vector<64xf32>
    %82 = vector.shape_cast %81 : vector<64xf32> to vector<1x64xf32>
    %cst_67 = arith.constant 2.560000e+02 : f32
    %83 = vector.broadcast %cst_67 : f32 to vector<1x64xf32>
    %84 = arith.divf %82, %83 : vector<1x64xf32>
    %85 = vector.broadcast %84 : vector<1x64xf32> to vector<256x64xf32>
    %86 = arith.subf %80, %85 : vector<256x64xf32>
    %87 = arith.mulf %86, %86 : vector<256x64xf32>
    %cst_68 = arith.constant dense<0.000000e+00> : vector<64xf32>
    %88 = vector.multi_reduction <add>, %87, %cst_68 [0] : vector<256x64xf32> to vector<64xf32>
    %89 = vector.shape_cast %88 : vector<64xf32> to vector<1x64xf32>
    %cst_69 = arith.constant 2.560000e+02 : f32
    %90 = vector.broadcast %cst_69 : f32 to vector<1x64xf32>
    %91 = arith.divf %89, %90 : vector<1x64xf32>
    %cst_70 = arith.constant 9.99999974E-6 : f32
    %92 = vector.broadcast %cst_70 : f32 to vector<1x64xf32>
    %93 = arith.addf %91, %92 : vector<1x64xf32>
    %94 = math.rsqrt %93 : vector<1x64xf32>
    %95 = vector.broadcast %94 : vector<1x64xf32> to vector<256x64xf32>
    %96 = arith.mulf %86, %95 : vector<256x64xf32>
    %cst_71 = arith.constant 0.000000e+00 : f32
    %97 = vector.broadcast %cst_71 : f32 to vector<256x64xf32>
    %98 = arith.maximumf %96, %97 : vector<256x64xf32>
    %99 = vector.shape_cast %98 : vector<256x64xf32> to vector<16x16x64xf32>
    %c1_72 = arith.constant 1 : index
    %c1_73 = arith.constant 1 : index
    %c0_74 = arith.constant 0 : index
    %100 = vector.load %arg7[%c1_72, %c1_73, %c0_74] : memref<18x18x64xf32, #tpu.memory_space<vmem>>, vector<16x16x64xf32>
    tpu.vector_store %arg7[%c1_72, %c1_73, %c0_74], %99 {strides = array<i32>} : memref<18x18x64xf32, #tpu.memory_space<vmem>>, vector<16x16x64xf32>,
    %101 = vector.extract_strided_slice %99 {offsets = [1, 0, 0], sizes = [1, 16, 64], strides = [1, 1, 1]} : vector<16x16x64xf32> to vector<1x16x64xf32>
    %c0_75 = arith.constant 0 : index
    %c1_76 = arith.constant 1 : index
    %c0_77 = arith.constant 0 : index
    %102 = vector.load %arg7[%c0_75, %c1_76, %c0_77] : memref<18x18x64xf32, #tpu.memory_space<vmem>>, vector<1x16x64xf32>
    tpu.vector_store %arg7[%c0_75, %c1_76, %c0_77], %101 {strides = array<i32>} : memref<18x18x64xf32, #tpu.memory_space<vmem>>, vector<1x16x64xf32>,
    %103 = vector.extract_strided_slice %99 {offsets = [14, 0, 0], sizes = [1, 16, 64], strides = [1, 1, 1]} : vector<16x16x64xf32> to vector<1x16x64xf32>
    %c17_78 = arith.constant 17 : index
    %c1_79 = arith.constant 1 : index
    %c0_80 = arith.constant 0 : index
    %104 = vector.load %arg7[%c17_78, %c1_79, %c0_80] : memref<18x18x64xf32, #tpu.memory_space<vmem>>, vector<1x16x64xf32>
    tpu.vector_store %arg7[%c17_78, %c1_79, %c0_80], %103 {strides = array<i32>} : memref<18x18x64xf32, #tpu.memory_space<vmem>>, vector<1x16x64xf32>,
    %c0_81 = arith.constant 0 : index
    %c2_82 = arith.constant 2 : index
    %c0_83 = arith.constant 0 : index
    %105 = vector.load %arg7[%c0_81, %c2_82, %c0_83] : memref<18x18x64xf32, #tpu.memory_space<vmem>>, vector<18x1x64xf32>
    %c0_84 = arith.constant 0 : index
    %c0_85 = arith.constant 0 : index
    %c0_86 = arith.constant 0 : index
    %106 = vector.load %arg7[%c0_84, %c0_85, %c0_86] : memref<18x18x64xf32, #tpu.memory_space<vmem>>, vector<18x1x64xf32>
    tpu.vector_store %arg7[%c0_84, %c0_85, %c0_86], %105 {strides = array<i32>} : memref<18x18x64xf32, #tpu.memory_space<vmem>>, vector<18x1x64xf32>,
    %c0_87 = arith.constant 0 : index
    %c15_88 = arith.constant 15 : index
    %c0_89 = arith.constant 0 : index
    %107 = vector.load %arg7[%c0_87, %c15_88, %c0_89] : memref<18x18x64xf32, #tpu.memory_space<vmem>>, vector<18x1x64xf32>
    %c0_90 = arith.constant 0 : index
    %c17_91 = arith.constant 17 : index
    %c0_92 = arith.constant 0 : index
    %108 = vector.load %arg7[%c0_90, %c17_91, %c0_92] : memref<18x18x64xf32, #tpu.memory_space<vmem>>, vector<18x1x64xf32>
    tpu.vector_store %arg7[%c0_90, %c17_91, %c0_92], %107 {strides = array<i32>} : memref<18x18x64xf32, #tpu.memory_space<vmem>>, vector<18x1x64xf32>,
    %cst_93 = arith.constant 0.000000e+00 : f32
    %109 = vector.broadcast %cst_93 : f32 to vector<256x64xf32>
    %c0_94 = arith.constant 0 : index
    %c0_95 = arith.constant 0 : index
    %c0_96 = arith.constant 0 : index
    %110 = vector.load %arg7[%c0_94, %c0_95, %c0_96] : memref<18x18x64xf32, #tpu.memory_space<vmem>>, vector<16x16x64xf32>
    %111 = vector.shape_cast %110 : vector<16x16x64xf32> to vector<256x64xf32>
    %112 = arith.truncf %111 : vector<256x64xf32> to vector<256x64xbf16>
    %113 = vector.extract_strided_slice %3 {offsets = [0, 0, 0], sizes = [1, 64, 64], strides = [1, 1, 1]} : vector<9x64x64xbf16> to vector<1x64x64xbf16>
    %114 = vector.shape_cast %113 : vector<1x64x64xbf16> to vector<64x64xbf16>
    %cst_97 = arith.constant dense<0.000000e+00> : vector<256x64xf32>
    %115 = tpu.matmul %112, %114, %cst_97 {dimension_numbers = #tpu.dot_dimension_numbers<[1], [0], [0], [1], [0, 0, 1, 1], [], []>} : vector<256x64xbf16>, vector<64x64xbf16>, vector<256x64xf32> -> vector<256x64xf32>
    %116 = arith.addf %109, %115 : vector<256x64xf32>
    %c0_98 = arith.constant 0 : index
    %c1_99 = arith.constant 1 : index
    %c0_100 = arith.constant 0 : index
    %117 = vector.load %arg7[%c0_98, %c1_99, %c0_100] : memref<18x18x64xf32, #tpu.memory_space<vmem>>, vector<16x16x64xf32>
    %118 = vector.shape_cast %117 : vector<16x16x64xf32> to vector<256x64xf32>
    %119 = arith.truncf %118 : vector<256x64xf32> to vector<256x64xbf16>
    %120 = vector.extract_strided_slice %3 {offsets = [1, 0, 0], sizes = [1, 64, 64], strides = [1, 1, 1]} : vector<9x64x64xbf16> to vector<1x64x64xbf16>
    %121 = vector.shape_cast %120 : vector<1x64x64xbf16> to vector<64x64xbf16>
    %cst_101 = arith.constant dense<0.000000e+00> : vector<256x64xf32>
    %122 = tpu.matmul %119, %121, %cst_101 {dimension_numbers = #tpu.dot_dimension_numbers<[1], [0], [0], [1], [0, 0, 1, 1], [], []>} : vector<256x64xbf16>, vector<64x64xbf16>, vector<256x64xf32> -> vector<256x64xf32>
    %123 = arith.addf %116, %122 : vector<256x64xf32>
    %c0_102 = arith.constant 0 : index
    %c2_103 = arith.constant 2 : index
    %c0_104 = arith.constant 0 : index
    %124 = vector.load %arg7[%c0_102, %c2_103, %c0_104] : memref<18x18x64xf32, #tpu.memory_space<vmem>>, vector<16x16x64xf32>
    %125 = vector.shape_cast %124 : vector<16x16x64xf32> to vector<256x64xf32>
    %126 = arith.truncf %125 : vector<256x64xf32> to vector<256x64xbf16>
    %127 = vector.extract_strided_slice %3 {offsets = [2, 0, 0], sizes = [1, 64, 64], strides = [1, 1, 1]} : vector<9x64x64xbf16> to vector<1x64x64xbf16>
    %128 = vector.shape_cast %127 : vector<1x64x64xbf16> to vector<64x64xbf16>
    %cst_105 = arith.constant dense<0.000000e+00> : vector<256x64xf32>
    %129 = tpu.matmul %126, %128, %cst_105 {dimension_numbers = #tpu.dot_dimension_numbers<[1], [0], [0], [1], [0, 0, 1, 1], [], []>} : vector<256x64xbf16>, vector<64x64xbf16>, vector<256x64xf32> -> vector<256x64xf32>
    %130 = arith.addf %123, %129 : vector<256x64xf32>
    %c1_106 = arith.constant 1 : index
    %c0_107 = arith.constant 0 : index
    %c0_108 = arith.constant 0 : index
    %131 = vector.load %arg7[%c1_106, %c0_107, %c0_108] : memref<18x18x64xf32, #tpu.memory_space<vmem>>, vector<16x16x64xf32>
    %132 = vector.shape_cast %131 : vector<16x16x64xf32> to vector<256x64xf32>
    %133 = arith.truncf %132 : vector<256x64xf32> to vector<256x64xbf16>
    %134 = vector.extract_strided_slice %3 {offsets = [3, 0, 0], sizes = [1, 64, 64], strides = [1, 1, 1]} : vector<9x64x64xbf16> to vector<1x64x64xbf16>
    %135 = vector.shape_cast %134 : vector<1x64x64xbf16> to vector<64x64xbf16>
    %cst_109 = arith.constant dense<0.000000e+00> : vector<256x64xf32>
    %136 = tpu.matmul %133, %135, %cst_109 {dimension_numbers = #tpu.dot_dimension_numbers<[1], [0], [0], [1], [0, 0, 1, 1], [], []>} : vector<256x64xbf16>, vector<64x64xbf16>, vector<256x64xf32> -> vector<256x64xf32>
    %137 = arith.addf %130, %136 : vector<256x64xf32>
    %c1_110 = arith.constant 1 : index
    %c1_111 = arith.constant 1 : index
    %c0_112 = arith.constant 0 : index
    %138 = vector.load %arg7[%c1_110, %c1_111, %c0_112] : memref<18x18x64xf32, #tpu.memory_space<vmem>>, vector<16x16x64xf32>
    %139 = vector.shape_cast %138 : vector<16x16x64xf32> to vector<256x64xf32>
    %140 = arith.truncf %139 : vector<256x64xf32> to vector<256x64xbf16>
    %141 = vector.extract_strided_slice %3 {offsets = [4, 0, 0], sizes = [1, 64, 64], strides = [1, 1, 1]} : vector<9x64x64xbf16> to vector<1x64x64xbf16>
    %142 = vector.shape_cast %141 : vector<1x64x64xbf16> to vector<64x64xbf16>
    %cst_113 = arith.constant dense<0.000000e+00> : vector<256x64xf32>
    %143 = tpu.matmul %140, %142, %cst_113 {dimension_numbers = #tpu.dot_dimension_numbers<[1], [0], [0], [1], [0, 0, 1, 1], [], []>} : vector<256x64xbf16>, vector<64x64xbf16>, vector<256x64xf32> -> vector<256x64xf32>
    %144 = arith.addf %137, %143 : vector<256x64xf32>
    %c1_114 = arith.constant 1 : index
    %c2_115 = arith.constant 2 : index
    %c0_116 = arith.constant 0 : index
    %145 = vector.load %arg7[%c1_114, %c2_115, %c0_116] : memref<18x18x64xf32, #tpu.memory_space<vmem>>, vector<16x16x64xf32>
    %146 = vector.shape_cast %145 : vector<16x16x64xf32> to vector<256x64xf32>
    %147 = arith.truncf %146 : vector<256x64xf32> to vector<256x64xbf16>
    %148 = vector.extract_strided_slice %3 {offsets = [5, 0, 0], sizes = [1, 64, 64], strides = [1, 1, 1]} : vector<9x64x64xbf16> to vector<1x64x64xbf16>
    %149 = vector.shape_cast %148 : vector<1x64x64xbf16> to vector<64x64xbf16>
    %cst_117 = arith.constant dense<0.000000e+00> : vector<256x64xf32>
    %150 = tpu.matmul %147, %149, %cst_117 {dimension_numbers = #tpu.dot_dimension_numbers<[1], [0], [0], [1], [0, 0, 1, 1], [], []>} : vector<256x64xbf16>, vector<64x64xbf16>, vector<256x64xf32> -> vector<256x64xf32>
    %151 = arith.addf %144, %150 : vector<256x64xf32>
    %c2_118 = arith.constant 2 : index
    %c0_119 = arith.constant 0 : index
    %c0_120 = arith.constant 0 : index
    %152 = vector.load %arg7[%c2_118, %c0_119, %c0_120] : memref<18x18x64xf32, #tpu.memory_space<vmem>>, vector<16x16x64xf32>
    %153 = vector.shape_cast %152 : vector<16x16x64xf32> to vector<256x64xf32>
    %154 = arith.truncf %153 : vector<256x64xf32> to vector<256x64xbf16>
    %155 = vector.extract_strided_slice %3 {offsets = [6, 0, 0], sizes = [1, 64, 64], strides = [1, 1, 1]} : vector<9x64x64xbf16> to vector<1x64x64xbf16>
    %156 = vector.shape_cast %155 : vector<1x64x64xbf16> to vector<64x64xbf16>
    %cst_121 = arith.constant dense<0.000000e+00> : vector<256x64xf32>
    %157 = tpu.matmul %154, %156, %cst_121 {dimension_numbers = #tpu.dot_dimension_numbers<[1], [0], [0], [1], [0, 0, 1, 1], [], []>} : vector<256x64xbf16>, vector<64x64xbf16>, vector<256x64xf32> -> vector<256x64xf32>
    %158 = arith.addf %151, %157 : vector<256x64xf32>
    %c2_122 = arith.constant 2 : index
    %c1_123 = arith.constant 1 : index
    %c0_124 = arith.constant 0 : index
    %159 = vector.load %arg7[%c2_122, %c1_123, %c0_124] : memref<18x18x64xf32, #tpu.memory_space<vmem>>, vector<16x16x64xf32>
    %160 = vector.shape_cast %159 : vector<16x16x64xf32> to vector<256x64xf32>
    %161 = arith.truncf %160 : vector<256x64xf32> to vector<256x64xbf16>
    %162 = vector.extract_strided_slice %3 {offsets = [7, 0, 0], sizes = [1, 64, 64], strides = [1, 1, 1]} : vector<9x64x64xbf16> to vector<1x64x64xbf16>
    %163 = vector.shape_cast %162 : vector<1x64x64xbf16> to vector<64x64xbf16>
    %cst_125 = arith.constant dense<0.000000e+00> : vector<256x64xf32>
    %164 = tpu.matmul %161, %163, %cst_125 {dimension_numbers = #tpu.dot_dimension_numbers<[1], [0], [0], [1], [0, 0, 1, 1], [], []>} : vector<256x64xbf16>, vector<64x64xbf16>, vector<256x64xf32> -> vector<256x64xf32>
    %165 = arith.addf %158, %164 : vector<256x64xf32>
    %c2_126 = arith.constant 2 : index
    %c2_127 = arith.constant 2 : index
    %c0_128 = arith.constant 0 : index
    %166 = vector.load %arg7[%c2_126, %c2_127, %c0_128] : memref<18x18x64xf32, #tpu.memory_space<vmem>>, vector<16x16x64xf32>
    %167 = vector.shape_cast %166 : vector<16x16x64xf32> to vector<256x64xf32>
    %168 = arith.truncf %167 : vector<256x64xf32> to vector<256x64xbf16>
    %169 = vector.extract_strided_slice %3 {offsets = [8, 0, 0], sizes = [1, 64, 64], strides = [1, 1, 1]} : vector<9x64x64xbf16> to vector<1x64x64xbf16>
    %170 = vector.shape_cast %169 : vector<1x64x64xbf16> to vector<64x64xbf16>
    %cst_129 = arith.constant dense<0.000000e+00> : vector<256x64xf32>
    %171 = tpu.matmul %168, %170, %cst_129 {dimension_numbers = #tpu.dot_dimension_numbers<[1], [0], [0], [1], [0, 0, 1, 1], [], []>} : vector<256x64xbf16>, vector<64x64xbf16>, vector<256x64xf32> -> vector<256x64xf32>
    %172 = arith.addf %165, %171 : vector<256x64xf32>
    %173 = vector.broadcast %5 : vector<1x64xf32> to vector<256x64xf32>
    %174 = arith.addf %172, %173 : vector<256x64xf32>
    %cst_130 = arith.constant dense<0.000000e+00> : vector<64xf32>
    %175 = vector.multi_reduction <add>, %174, %cst_130 [0] : vector<256x64xf32> to vector<64xf32>
    %176 = vector.shape_cast %175 : vector<64xf32> to vector<1x64xf32>
    %cst_131 = arith.constant 2.560000e+02 : f32
    %177 = vector.broadcast %cst_131 : f32 to vector<1x64xf32>
    %178 = arith.divf %176, %177 : vector<1x64xf32>
    %179 = vector.broadcast %178 : vector<1x64xf32> to vector<256x64xf32>
    %180 = arith.subf %174, %179 : vector<256x64xf32>
    %181 = arith.mulf %180, %180 : vector<256x64xf32>
    %cst_132 = arith.constant dense<0.000000e+00> : vector<64xf32>
    %182 = vector.multi_reduction <add>, %181, %cst_132 [0] : vector<256x64xf32> to vector<64xf32>
    %183 = vector.shape_cast %182 : vector<64xf32> to vector<1x64xf32>
    %cst_133 = arith.constant 2.560000e+02 : f32
    %184 = vector.broadcast %cst_133 : f32 to vector<1x64xf32>
    %185 = arith.divf %183, %184 : vector<1x64xf32>
    %cst_134 = arith.constant 9.99999974E-6 : f32
    %186 = vector.broadcast %cst_134 : f32 to vector<1x64xf32>
    %187 = arith.addf %185, %186 : vector<1x64xf32>
    %188 = math.rsqrt %187 : vector<1x64xf32>
    %189 = vector.broadcast %188 : vector<1x64xf32> to vector<256x64xf32>
    %190 = arith.mulf %180, %189 : vector<256x64xf32>
    %191 = vector.shape_cast %1 : vector<16x16x64xf32> to vector<256x64xf32>
    %192 = arith.addf %191, %190 : vector<256x64xf32>
    %cst_135 = arith.constant 0.000000e+00 : f32
    %193 = vector.broadcast %cst_135 : f32 to vector<256x64xf32>
    %194 = arith.maximumf %192, %193 : vector<256x64xf32>
    %195 = vector.shape_cast %194 : vector<256x64xf32> to vector<16x16x64xf32>
    %c0_136 = arith.constant 0 : index
    %c0_137 = arith.constant 0 : index
    %c0_138 = arith.constant 0 : index
    %c0_139 = arith.constant 0 : index
    %196 = vector.load %arg6[%c0_136, %c0_137, %c0_138, %c0_139] : memref<1x16x16x64xf32, #tpu.memory_space<vmem>>, vector<1x16x16x64xf32>
    %197 = vector.shape_cast %196 : vector<1x16x16x64xf32> to vector<16x16x64xf32>
    %198 = vector.shape_cast %195 : vector<16x16x64xf32> to vector<1x16x16x64xf32>
    tpu.vector_store %arg6[%c0_136, %c0_137, %c0_138, %c0_139], %198 {strides = array<i32>} : memref<1x16x16x64xf32, #tpu.memory_space<vmem>>, vector<1x16x16x64xf32>,
    return
  }
  func.func @transform_0(%arg0: i32) -> (i32, i32, i32, i32) {
    %c0_i32 = arith.constant 0 : i32
    %c0_i32_0 = arith.constant 0 : i32
    %c0_i32_1 = arith.constant 0 : i32
    %c0_i32_2 = arith.constant 0 : i32
    return %arg0, %c0_i32, %c0_i32_0, %c0_i32_1 : i32, i32, i32, i32
  }
  func.func @transform_1(%arg0: i32) -> (i32, i32, i32) {
    %c0_i32 = arith.constant 0 : i32
    %c0_i32_0 = arith.constant 0 : i32
    %c0_i32_1 = arith.constant 0 : i32
    %c0_i32_2 = arith.constant 0 : i32
    return %c0_i32, %c0_i32_0, %c0_i32_1 : i32, i32, i32
  }
  func.func @transform_2(%arg0: i32) -> (i32, i32) {
    %c0_i32 = arith.constant 0 : i32
    %c0_i32_0 = arith.constant 0 : i32
    %c0_i32_1 = arith.constant 0 : i32
    return %c0_i32, %c0_i32_0 : i32, i32
  }
  func.func @transform_3(%arg0: i32) -> (i32, i32, i32) {
    %c0_i32 = arith.constant 0 : i32
    %c0_i32_0 = arith.constant 0 : i32
    %c0_i32_1 = arith.constant 0 : i32
    %c0_i32_2 = arith.constant 0 : i32
    return %c0_i32, %c0_i32_0, %c0_i32_1 : i32, i32, i32
  }
  func.func @transform_4(%arg0: i32) -> (i32, i32) {
    %c0_i32 = arith.constant 0 : i32
    %c0_i32_0 = arith.constant 0 : i32
    %c0_i32_1 = arith.constant 0 : i32
    return %c0_i32, %c0_i32_0 : i32, i32
  }
  func.func @transform_5(%arg0: i32) -> (i32, i32, i32, i32) {
    %c0_i32 = arith.constant 0 : i32
    %c0_i32_0 = arith.constant 0 : i32
    %c0_i32_1 = arith.constant 0 : i32
    %c0_i32_2 = arith.constant 0 : i32
    return %arg0, %c0_i32, %c0_i32_0, %c0_i32_1 : i32, i32, i32, i32
  }
}

</mosaic_0001>

<bundles_post_ra>
// kernel: resblock_forward.1
= control target key start
LH: loop header
LB: loop body
LE: loop exit
PB: predicated region body
PF: predicated region fallthrough
CT: control target
= control target key end

     0   :  { %10 = vsyncpa [#allocation4], 0  ;;  %s11430_s0 = inlined_call_operand.hbm [shape: f32[2,16,16,64], index: 0, kind: input, shape index: {}]   ;;  %s11431_s1 = inlined_call_operand.hbm [shape: bf16[9,64,64], index: 1, kind: input, shape index: {}]   ;;  %s11432_s2 = inlined_call_operand.vmem [shape: f32[1,64], index: 2, kind: input, shape index: {}]   ;;  %s11433_s3 = inlined_call_operand.hbm [shape: bf16[9,64,64], index: 3, kind: input, shape index: {}]   ;;  %s11434_s4 = inlined_call_operand.vmem [shape: f32[1,64], index: 4, kind: input, shape index: {}]   ;;  %s11435_s5 = inlined_call_operand.hbm [shape: f32[2,16,16,64], index: 5, kind: output, shape index: {}]  }
   0x1   :  { %12 = vsyncpa [#allocation4 + $0x1], 0 }
   0x2   :  { %13 = vsyncpa [#allocation7], 0 }
   0x3   :  { %14 = vsyncpa [#allocation5], 0 }
   0x4   :  { %16 = vsyncpa [#allocation5 + $0x1], 0  ;;  %s9286_s18 = smov 0   ;;  %s9288_s19 = smov 0  }
   0x5   :  { %s9290_s20 = smov 0   ;;  %s9292_s21 = smov 0  }
   0x6 LB: > { %s9307_s22 = sadd.s32 4294967295, %s9244_s21   ;;  %s6965_s23 = sadd.s32 4294967294, %s9244_s21   ;;  %s9244_s21 = sphi %s9292_s21, %s11518_s21   ;;  %s9240_s20 = sphi %s9290_s20, %s11517_s20   ;;  %s9236_s19 = sphi %s9288_s19, %s11516_s19   ;;  %s9232_s18 = sphi %s9286_s18, %s11515_s18  }
   0x7   : > { %p42_p0 = scmp.ne.s32.totalorder %s9236_s19, %s9232_s18  ;;  %p11436_p1 = scmp.eq.s32.totalorder %s9307_s22, 0 }
   0x8   : > { %p156_p3 = scmp.eq.s32.totalorder %s6965_s23, 1  ;;  %p6966_p5 = scmp.ge.s32.totalorder %s9244_s21, 1 }
   0x9   : > { %p9316_p4 = por %p11436_p1, %p42_p0  ;;  %p163_p7 = scmp.lt.s32.totalorder %s9244_s21, 3 }
   0xa   : > { %p9321_p6 = por %p156_p3, %p42_p0  ;;  %s9246_s27 = smov [#allocation6]  }
   0xb   : > { %s11460_s24 = scalar_select %p9316_p4, 1, 0 }
   0xc   : > { %s11461_s25 = scalar_select %p9321_p6, 1, 0 }
   0xd   : > { %p9326_p8 = pnand %p6966_p5, %p163_p7  ;;  %s175_s28 = sshll.u32 %s9246_s27, 4  ;;  %s9330_s28 = int_to_ptr.vmem [resolvable:$true] %s175_s28 }
   0xe   : > { %s9247_s30 = smov [#allocation8]   ;;  %s9088_s9 = scalar_lea.hbm %s11431_s1, 4608 }
   0xf   : > { %p8951_p9 = pneg %p9326_p8  ;;  %s191_s6 = sshll.u32 %s9247_s30, 4  ;;  %s9341_s6 = int_to_ptr.vmem [resolvable:$true] %s191_s6 }
  0x10   : > { %p9089_p12 = scmp.ne.s32.totalorder %s11431_s1, %s9088_s9  ;;  %p9095_p5 = scmp.lt.u32.totalorder %s9088_s9, %s11431_s1 }
  0x11   : > { %p9337_p11 = pnand %p8951_p9, %p11436_p1 }
  0x13   : > { %p9090_p13 = pneg %p9337_p11 }
  0x15   : > { %p9091_p0 = pnand %p9090_p13, %p9089_p12 }
  0x17   : > { %p9092_p3 = pneg %p9091_p0 }
  0x19   : > { %p9097_p7 = pnand %p9095_p5, %p9092_p3 }
  0x1b   : > { %9100 = shalt.err (!%p9097_p7)
}
  0x1c   : > { %s9101_s14 = scalar_lea.vmem %s9330_s28, 4608  ;;  %p9109_p2 = scmp.lt.s32.totalorder %s9330_s28, %s9330_s28 }
  0x1d   : > { %p9102_p9 = scmp.ne.s32.totalorder %s9330_s28, %s9101_s14  ;;  %p9110_p12 = scmp.lt.s32.totalorder %s9101_s14, %s9101_s14 }
  0x1f   : > { %p9104_p10 = pnand %p9102_p9, %p9090_p13  ;;  %p9111_p0 = por %p9110_p12, %p9109_p2 }
  0x21   : > { %p9105_p1 = pneg %p9104_p10 }
  0x23   : > { %p9112_p6 = pnand %p9111_p0, %p9105_p1 }
  0x25   : > { %9115 = shalt.err (!%p9112_p6)
}
  0x26   : > { %s9248_s15 = smov 64   ;;  %s9249_s16 = smov 4  }
  0x27   : > { %8954 = dma.hbm_to_vmem [thread:$0]  (!%p9337_p11), %s11431_s1, 4608, %s9330_s28, [#allocation7], %s9248_s15, %s9248_s15, %s9249_s16  }
  0x28   : > { %s9116_s7 = scalar_lea.hbm %s11433_s3, 4608 }
  0x29   : > { %p9117_p2 = scmp.ne.s32.totalorder %s11433_s3, %s9116_s7  ;;  %p9123_p10 = scmp.lt.u32.totalorder %s9116_s7, %s11433_s3 }
  0x2b   : > { %p9119_p1 = pnand %p9117_p2, %p9090_p13 }
  0x2d   : > { %p9120_p6 = pneg %p9119_p1 }
  0x2f   : > { %p9125_p3 = pnand %p9123_p10, %p9120_p6 }
  0x31   : > { %9128 = shalt.err (!%p9125_p3)
}
  0x32   : > { %s9129_s28 = scalar_lea.vmem %s9341_s6, 4608  ;;  %p9137_p12 = scmp.lt.s32.totalorder %s9341_s6, %s9341_s6 }
  0x33   : > { %p9130_p5 = scmp.ne.s32.totalorder %s9341_s6, %s9129_s28  ;;  %p9138_p0 = scmp.lt.s32.totalorder %s9129_s28, %s9129_s28 }
  0x35   : > { %p9132_p7 = pnand %p9130_p5, %p9090_p13  ;;  %p9139_p2 = por %p9138_p0, %p9137_p12 }
  0x37   : > { %p9133_p9 = pneg %p9132_p7 }
  0x39   : > { %p9140_p1 = pnand %p9139_p2, %p9133_p9 }
  0x3b   : > { %9143 = shalt.err (!%p9140_p1)
}
  0x3c   : > { %8957 = dma.hbm_to_vmem [thread:$0]  (!%p9337_p11), %s11433_s3, 4608, %s9341_s6, [#allocation7], %s9248_s15, %s9248_s15, %s9249_s16  }
  0x3d   : > { %s9396_s14 = sadd.s32 1, %s9244_s21   ;;  %s29_s29 = sadd.s32 1, %s9240_s20 }
  0x3e   : > { %s26_s17 = ssub.s32 %s9244_s21, %s9396_s14  ;;  %p36_p13 = scmp.ne.s32.totalorder %s9240_s20, %s9236_s19 }
  0x3f   : > { %p27_p6 = scmp.eq.s32.totalorder %s26_s17, 0  ;;  %p37_p10 = scmp.eq.s32.totalorder %s9244_s21, 0 }
  0x40   : > { %p11464_p3 = scmp.eq.s32.totalorder %s9307_s22, 1  ;;  %p8968_p7 = scmp.lt.s32.totalorder %s9244_s21, 2 }
  0x41   : > { %s9412_s27 = scalar_select %p27_p6, %s9240_s20, %s29_s29  }
  0x42   : > { %p9406_p5 = por %p11464_p3, %p36_p13  ;;  %p38_p9 = por %p37_p10, %p36_p13 }
  0x43   : > { %s208_s30 = sand.u32 1, %s9240_s20   ;;  %s7345_s6 = sshll.u32 %s9244_s21, 12 }
  0x44   : > { %s11465_s23 = scalar_select %p9406_p5, 1, 0 }
  0x45   : > { %s6970_s7 = sshll.u32 %s208_s30, 8  ;;  %s9419_s8 = scalar_lea.hbm %s11430_s0, %s7345_s6 }
  0x46   : > { %s212_s9 = scalar_lea.vmem [#allocation3], %s6970_s7  ;;  %p9423_p11 = pnand %p8968_p7, %p38_p9 }
  0x47   : > { %s219_s10 = sshll.u32 %s212_s9, 4  ;;  %s9427_s28 = scalar_lea.sflag [#allocation4], %s208_s30  ;;  %s9421_s10 = int_to_ptr.vmem [resolvable:$true] %s219_s10 }
  0x48   : > { %s9144_s12 = scalar_lea.hbm %s9419_s8, 4096  ;;  %p9146_p0 = pneg %p9423_p11 }
  0x49   : > { %p9145_p12 = scmp.ne.s32.totalorder %s9419_s8, %s9144_s12  ;;  %s9149_s17 = scalar_lea.hbm %s11430_s0, 8192 }
  0x4a   : > { %p9150_p13 = scmp.lt.u32.totalorder %s9419_s8, %s11430_s0  ;;  %p9151_p6 = scmp.lt.u32.totalorder %s9149_s17, %s9144_s12 }
  0x4b   : > { %p9147_p2 = pnand %p9146_p0, %p9145_p12  ;;  %p9153_p3 = scmp.lt.u32.totalorder %s9144_s12, %s9419_s8 }
  0x4c   : > { %p9152_p10 = por %p9151_p6, %p9150_p13 }
  0x4d   : > { %p9148_p1 = pneg %p9147_p2 }
  0x4e   : > { %p9154_p7 = por %p9153_p3, %p9152_p10 }
  0x50   : > { %p9155_p9 = pnand %p9154_p7, %p9148_p1 }
  0x52   : > { %9158 = shalt.err (!%p9155_p9)
}
  0x53   : > { %s9159_s30 = scalar_lea.vmem %s9421_s10, 4096  ;;  %s9250_s15 = smov [#allocation3]  }
  0x54   : > { %p9160_p12 = scmp.ne.s32.totalorder %s9421_s10, %s9159_s30  ;;  %s9164_s16 = sshll.u32 %s9250_s15, 4  ;;  %s9165_s16 = int_to_ptr.vmem [resolvable:$false] %s9164_s16 }
  0x55   : > { %s9166_s9 = scalar_lea.vmem %s9165_s16, 8192  ;;  %p9167_p4 = scmp.lt.s32.totalorder %s9421_s10, %s9165_s16 }
  0x56   : > { %p9162_p2 = pnand %p9160_p12, %p9146_p0  ;;  %p9168_p13 = scmp.lt.s32.totalorder %s9166_s9, %s9159_s30 }
  0x58   : > { %p9163_p5 = pneg %p9162_p2  ;;  %p9169_p6 = por %p9168_p13, %p9167_p4 }
  0x5a   : > { %p9170_p10 = pnand %p9169_p6, %p9163_p5 }
  0x5c   : > { %9173 = shalt.err (!%p9170_p10)
}
  0x5d   : > { %s9251_s12 = smov 128   ;;  %s9252_s13 = smov 8  }
  0x5e   : > { %8961 = dma.hbm_to_vmem [thread:$0]  (!%p9423_p11), %s9419_s8, 4096, %s9421_s10, %s9427_s28, %s9251_s12, %s9251_s12, %s9252_s13  }
  0x5f   : > { %231 = sbr.rel (%p9326_p8) target bundleno = 2009 (0x7d9), region = 40 }
  0x66   : > { %s9458_s29 = sand.u32 1, %s9236_s19   ;;  %p11467_p4 = scmp.ne.s32.totalorder %s11460_s24, 0 }
  0x67   : > { %s6974_s17 = sshll.u32 %s9458_s29, 8  ;;  %s234_s7 = scalar_lea.sflag [#allocation4], %s9458_s29 }
  0x68   : > { %s9464_s6 = scalar_lea.vmem [#allocation3], %s6974_s17 }
  0x69   : > { %9219 = dma.done.wait (%p11467_p4), %s234_s7, 4096  }
  0x6a   : > { %9221 = vsyncadd (%p11467_p4), %s234_s7, 4294963200  ;;  %p11468_p5 = scmp.eq.s32.totalorder %s9307_s22, 0 }
  0x6c   : > { %9223 = dma.done.wait (%p11468_p5), [#allocation7], 9216   ;;  %p11469_p8 = pmov %p11468_p5 }
  0x6d   : > { %v9012_v0 = vld [vmem:[#allocation6 + $0x20] sm:$0xff]   ;;  %v9013_v1 = vld [vmem:[#allocation6 + $0x28] sm:$0xff]   ;;  %vm452_vm0 = vcmask 523264   ;;  %v9014_v2 = vld [vmem:[#allocation6 + $0x30] sm:$0xff]   ;;  %vm508_vm1 = vcmask 516096   ;;  %s11236_s11 = scalar_lea.vmem [#allocation9], %s6974_s17 }
  0x6e   : > { %9225 = vsyncadd (%p11469_p8), [#allocation7], 4294958080  ;;  %7707 = vmatprep.subr.bf16.mxu0 %v9012_v0  ;;  %v9475_v3 = vld [vmem:[%s9464_s6 + $0x10] sm:$0xff]  ;;  %v9478_v4 = vld [vmem:[%s9464_s6 + $0x18] sm:$0xff]  ;;  %s7346_s28 = sshll.u32 %s9307_s22, 12  ;;  %s6873_s30 = sshll.u32 %s11236_s11, 4  ;;  %s11358_s30 = int_to_ptr.vmem [resolvable:$true] %s6873_s30 }
  0x6f   : > { %7708 = vmatpush3.bf16.msra.mxu0 %v9012_v0  ;;  %v9481_v5 = vld [vmem:[%s9464_s6] sm:$0xff]  ;;  %455 = vst.msk [vmem:[#allocation2 + $0x31] sm:$0xff] %vm452_vm0, %v9475_v3  ;;  %456 = vst.msk [vmem:[#allocation2 + $0x39] sm:$0xff] %vm452_vm0, %v9478_v4  ;;  %v9492_v6 = vld [vmem:[%s9464_s6 + $0x8] sm:$0xff]  ;;  %s11356_s16 = scalar_lea.hbm %s11435_s5, %s7346_s28  ;;  %s6860_s9 = scalar_lea.sflag [#allocation5], %s9458_s29 }
  0x70   : > { %7709 = vmatprep.subr.bf16.mxu0 %v9013_v1  ;;  %485 = vst.msk [vmem:[#allocation2 + $0x1] sm:$0xff] %vm452_vm0, %v9475_v3  ;;  %486 = vst.msk [vmem:[#allocation2 + $0x9] sm:$0xff] %vm452_vm0, %v9478_v4  ;;  %v9015_v7 = vld [vmem:[#allocation6 + $0x38] sm:$0xff]   ;;  %v9499_v8 = vld [vmem:[%s9464_s6 + $0x20] sm:$0xff]  ;;  %s9174_s12 = scalar_lea.vmem %s11358_s30, 4096  ;;  %p11512_p0 = scmp.ne.s32.totalorder %s11465_s23, 0 }
  0x71   : > { %453 = vst.msk [vmem:[#allocation2 + $0x19] sm:$0xff] %vm452_vm0, %v9481_v5  ;;  %454 = vst.msk [vmem:[#allocation2 + $0x21] sm:$0xff] %vm452_vm0, %v9492_v6  ;;  %v9502_v9 = vld [vmem:[%s9464_s6 + $0x28] sm:$0xff]  ;;  %v9509_v10 = vld [vmem:[%s9464_s6 + $0x30] sm:$0xff]  ;;  %p9175_p11 = scmp.ne.s32.totalorder %s11358_s30, %s9174_s12  ;;  %s9253_s13 = smov [#allocation9]  }
  0x72   : > { %457 = vst.msk [vmem:[#allocation2 + $0x49] sm:$0xff] %vm452_vm0, %v9499_v8  ;;  %458 = vst.msk [vmem:[#allocation2 + $0x51] sm:$0xff] %vm452_vm0, %v9502_v9  ;;  %v9512_v11 = vld [vmem:[%s9464_s6 + $0x38] sm:$0xff]  ;;  %v9515_v12 = vld [vmem:[%s9464_s6 + $0x40] sm:$0xff]  ;;  %s9178_s17 = sshll.u32 %s9253_s13, 4  ;;  %s9179_s17 = int_to_ptr.vmem [resolvable:$false] %s9178_s17 }
  0x73   : > { %7710 = vmatpush3.bf16.msra.mxu0 %v9013_v1  ;;  %459 = vst.msk [vmem:[#allocation2 + $0x61] sm:$0xff] %vm452_vm0, %v9509_v10  ;;  %460 = vst.msk [vmem:[#allocation2 + $0x69] sm:$0xff] %vm452_vm0, %v9512_v11  ;;  %v9522_v13 = vld [vmem:[%s9464_s6 + $0x48] sm:$0xff]  ;;  %v9529_v14 = vld [vmem:[%s9464_s6 + $0x50] sm:$0xff]  ;;  %p9176_p1 = pnand %p9175_p11, %p11512_p0  ;;  %s9180_s7 = scalar_lea.vmem %s9179_s17, 8192 }
  0x74   : > { %7711 = vmatprep.subr.bf16.mxu0 %v9014_v2  ;;  %461 = vst.msk [vmem:[#allocation2 + $0x79] sm:$0xff] %vm452_vm0, %v9515_v12  ;;  %462 = vst.msk [vmem:[#allocation2 + $0x81] sm:$0xff] %vm452_vm0, %v9522_v13  ;;  %v9532_v15 = vld [vmem:[%s9464_s6 + $0x58] sm:$0xff]  ;;  %v9016_v16 = vld [vmem:[#allocation6] sm:$0xff]   ;;  %p9181_p7 = scmp.lt.s32.totalorder %s11358_s30, %s9179_s17  ;;  %p9182_p9 = scmp.lt.s32.totalorder %s9180_s7, %s9174_s12 }
  0x75   : > { %11470 = vst [vmem:[#allocation13_spill] sm:$0xff] %v9529_v14  ;;  %11471 = vst [vmem:[#allocation14_spill] sm:$0xff] %v9532_v15  ;;  %v9539_v17 = vld [vmem:[%s9464_s6 + $0x60] sm:$0xff]  ;;  %v9542_v18 = vld [vmem:[%s9464_s6 + $0x68] sm:$0xff]  ;;  %p9177_p3 = pneg %p9176_p1 }
  0x76   : > { %463 = vst.msk [vmem:[#allocation2 + $0x91] sm:$0xff] %vm452_vm0, %v9529_v14  ;;  %464 = vst.msk [vmem:[#allocation2 + $0x99] sm:$0xff] %vm452_vm0, %v9532_v15  ;;  %v9545_v19 = vld [vmem:[%s9464_s6 + $0x70] sm:$0xff]  ;;  %v9552_v20 = vld [vmem:[%s9464_s6 + $0x78] sm:$0xff]  ;;  %p9183_p12 = por %p9182_p9, %p9181_p7 }
  0x77   : > { %11472 = vst [vmem:[#allocation15_spill] sm:$0xff] %v9539_v17  ;;  %11473 = vst [vmem:[#allocation16_spill] sm:$0xff] %v9542_v18  ;;  %7712 = vmatpush3.bf16.msra.mxu0 %v9014_v2  ;;  %v9557_v21 = vld [vmem:[%s9464_s6 + $0x80] sm:$0xff]  ;;  %v9560_v22 = vld [vmem:[%s9464_s6 + $0x88] sm:$0xff] }
  0x78   : > { %11474 = vst [vmem:[#allocation17_spill] sm:$0xff] %v9545_v19  ;;  %465 = vst.msk [vmem:[#allocation2 + $0xa9] sm:$0xff] %vm452_vm0, %v9539_v17  ;;  %7713 = vmatprep.subr.bf16.mxu0 %v9015_v7  ;;  %v611_v23 = vld [vmem:[#allocation2 + $0x1] sm:$0xff]  ;;  %v612_v24 = vld [vmem:[#allocation2 + $0x9] sm:$0xff]  ;;  %p9184_p2 = pnand %p9183_p12, %p9177_p3 }
  0x79   : > { %466 = vst.msk [vmem:[#allocation2 + $0xb1] sm:$0xff] %vm452_vm0, %v9542_v18  ;;  %11475 = vst [vmem:[#allocation18_spill] sm:$0xff] %v9552_v20  ;;  %v613_v25 = vld [vmem:[#allocation2 + $0x19] sm:$0xff]  ;;  %v643_v26 = vpack.c.bf16 %v612_v24, %v611_v23  ;;  %v614_v27 = vld [vmem:[#allocation2 + $0x21] sm:$0xff] }
  0x7a   : > { %467 = vst.msk [vmem:[#allocation2 + $0xc1] sm:$0xff] %vm452_vm0, %v9545_v19  ;;  %11476 = vst [vmem:[#allocation19_spill] sm:$0xff] %v9557_v21  ;;  %v615_v28 = vld [vmem:[#allocation2 + $0x31] sm:$0xff]  ;;  %v616_v29 = vld [vmem:[#allocation2 + $0x39] sm:$0xff]  ;;  %v9568_v30 = vpack.c.bf16 %v614_v27, %v613_v25 }
  0x7b   : > { %11477 = vst [vmem:[#allocation20_spill] sm:$0xff] %v9560_v22  ;;  %468 = vst.msk [vmem:[#allocation2 + $0xc9] sm:$0xff] %vm452_vm0, %v9552_v20  ;;  %7714 = vmatpush3.bf16.msra.mxu0 %v9015_v7  ;;  %7715 = vmatprep.mubr.msk.bf16.mxu0 %vm452_vm0, %v643_v26  ;;  %v9571_v31 = vpack.c.bf16 %v616_v29, %v615_v28  ;;  %v9017_v32 = vld [vmem:[#allocation6 + $0x8] sm:$0xff]   ;;  %v9574_v33 = vld [vmem:[%s9464_s6 + $0x90] sm:$0xff] }
  0x7c   : > { %469 = vst.msk [vmem:[#allocation2 + $0xd9] sm:$0xff] %vm452_vm0, %v9557_v21  ;;  %470 = vst.msk [vmem:[#allocation2 + $0xe1] sm:$0xff] %vm452_vm0, %v9560_v22  ;;  %7747 = vmatprep.subr.bf16.mxu0 %v9016_v16  ;;  %v617_v34 = vld [vmem:[#allocation2 + $0x49] sm:$0xff]  ;;  %v618_v35 = vld [vmem:[#allocation2 + $0x51] sm:$0xff] }
  0x7d   : > { %11478 = vst [vmem:[#allocation21_spill] sm:$0xff] %v9574_v33  ;;  %471 = vst.msk [vmem:[#allocation2 + $0xf1] sm:$0xff] %vm452_vm0, %v9574_v33  ;;  %v619_v36 = vld [vmem:[#allocation2 + $0x61] sm:$0xff]  ;;  %v620_v37 = vld [vmem:[#allocation2 + $0x69] sm:$0xff]  ;;  %v9606_v45 = vpack.c.bf16 %v618_v35, %v617_v34 }
  0x7e   : > { %7716 = vmatmul.mubr.msk.bf16.vlgmr.msra.gmra.mrb[0].mxu0 %vm452_vm0, %v9568_v30  ;;  %v9018_v38 = vld [vmem:[#allocation6 + $0x10] sm:$0xff]   ;;  %v9583_v39 = vld [vmem:[%s9464_s6 + $0x98] sm:$0xff]  ;;  %v9586_v40 = vld [vmem:[%s9464_s6 + $0xa0] sm:$0xff]  ;;  %v9617_v47 = vpack.c.bf16 %v620_v37, %v619_v36 }
  0x7f   : > { %7748 = vmatpush3.bf16.msra.mxu0 %v9016_v16  ;;  %7719 = vmatprep.mubr.msk.bf16.mxu0 %vm452_vm0, %v9571_v31  ;;  %11479 = vst [vmem:[#allocation22_spill] sm:$0xff] %v9583_v39  ;;  %11480 = vst [vmem:[#allocation23_spill] sm:$0xff] %v9586_v40  ;;  %v9589_v41 = vld [vmem:[%s9464_s6 + $0xa8] sm:$0xff]  ;;  %v9598_v42 = vld [vmem:[%s9464_s6 + $0xb0] sm:$0xff] }
  0x80   : > { %7749 = vmatprep.subr.bf16.mxu0 %v9017_v32  ;;  %11481 = vst [vmem:[#allocation24_spill] sm:$0xff] %v9589_v41  ;;  %472 = vst.msk [vmem:[#allocation2 + $0xf9] sm:$0xff] %vm452_vm0, %v9583_v39  ;;  %v9601_v43 = vld [vmem:[%s9464_s6 + $0xb8] sm:$0xff]  ;;  %v9604_v44 = vld [vmem:[%s9464_s6 + $0xc0] sm:$0xff] }
  0x81   : > { %473 = vst.msk [vmem:[#allocation2 + $0x109] sm:$0xff] %vm452_vm0, %v9586_v40  ;;  %474 = vst.msk [vmem:[#allocation2 + $0x111] sm:$0xff] %vm452_vm0, %v9589_v41  ;;  %v9613_v46 = vld [vmem:[%s9464_s6 + $0xc8] sm:$0xff]  ;;  %v9019_v48 = vld [vmem:[#allocation6 + $0x18] sm:$0xff]  }
  0x82   : > { %11482 = vst [vmem:[#allocation25_spill] sm:$0xff] %v9598_v42  ;;  %11483 = vst [vmem:[#allocation26_spill] sm:$0xff] %v9601_v43  ;;  %v9622_v49 = vld [vmem:[%s9464_s6 + $0xd0] sm:$0xff]  ;;  %v9625_v50 = vld [vmem:[%s9464_s6 + $0xd8] sm:$0xff] }
  0x83   : > { %11484 = vst [vmem:[#allocation27_spill] sm:$0xff] %v9604_v44  ;;  %475 = vst.msk [vmem:[#allocation2 + $0x121] sm:$0xff] %vm452_vm0, %v9598_v42  ;;  %7750 = vmatpush3.bf16.msra.mxu0 %v9017_v32  ;;  %v9632_v51 = vld [vmem:[%s9464_s6 + $0xe0] sm:$0xff]  ;;  %v9635_v52 = vld [vmem:[%s9464_s6 + $0xe8] sm:$0xff] }
  0x84   : > { %476 = vst.msk [vmem:[#allocation2 + $0x129] sm:$0xff] %vm452_vm0, %v9601_v43  ;;  %11485 = vst [vmem:[#allocation28_spill] sm:$0xff] %v9613_v46  ;;  %7751 = vmatprep.subr.bf16.mxu0 %v9018_v38  ;;  %v490_v53 = vld [vmem:[#allocation2 + $0x2] sm:$0x1]  ;;  %v491_v54 = vld [vmem:[#allocation2 + $0x1a] sm:$0x1] }
  0x85   : > { %477 = vst.msk [vmem:[#allocation2 + $0x139] sm:$0xff] %vm452_vm0, %v9604_v44  ;;  %478 = vst.msk [vmem:[#allocation2 + $0x141] sm:$0xff] %vm452_vm0, %v9613_v46  ;;  %v621_v55 = vld [vmem:[#allocation2 + $0x79] sm:$0xff]  ;;  %v622_v56 = vld [vmem:[#allocation2 + $0x81] sm:$0xff] }
  0x86   : > { %11486 = vst [vmem:[#allocation29_spill] sm:$0xff] %v9622_v49  ;;  %11487 = vst [vmem:[#allocation30_spill] sm:$0xff] %v9625_v50  ;;  %7720 = vmatmul.mubr.msk.bf16.gmra.mrb[4].mxu0 %vm452_vm0, %v9606_v45  ;;  %v492_v57 = vld [vmem:[#allocation2 + $0x32] sm:$0x1]  ;;  %v624_v59 = vld [vmem:[#allocation2 + $0x99] sm:$0xff]  ;;  %v9654_v61 = vpack.c.bf16 %v622_v56, %v621_v55 }
  0x87   : > { %479 = vst.msk [vmem:[#allocation2 + $0x151] sm:$0xff] %vm452_vm0, %v9622_v49  ;;  %480 = vst.msk [vmem:[#allocation2 + $0x159] sm:$0xff] %vm452_vm0, %v9625_v50  ;;  %7723 = vmatprep.mubr.msk.bf16.mxu0 %vm452_vm0, %v9617_v47  ;;  %7752 = vmatpush3.bf16.msra.mxu0 %v9018_v38  ;;  %v623_v58 = vld [vmem:[#allocation2 + $0x91] sm:$0xff]  ;;  %v493_v62 = vld [vmem:[#allocation2 + $0x4a] sm:$0x1] }
  0x88   : > { %11488 = vst [vmem:[#allocation31_spill] sm:$0xff] %v9632_v51  ;;  %481 = vst.msk [vmem:[#allocation2 + $0x169] sm:$0xff] %vm452_vm0, %v9632_v51  ;;  %7753 = vmatprep.subr.bf16.mxu0 %v9019_v48  ;;  %v9651_v60 = vld [vmem:[#allocation6 + $0x40] sm:$0xff]   ;;  %v9656_v63 = vpack.c.bf16 %v624_v59, %v623_v58  ;;  %v494_v0 = vld [vmem:[#allocation2 + $0x62] sm:$0x1] }
  0x89   : > { %482 = vst.msk [vmem:[#allocation2 + $0x171] sm:$0xff] %vm452_vm0, %v9635_v52  ;;  %488 = vst.msk [vmem:[#allocation2 + $0x199] sm:$0xff] %vm452_vm0, %v9632_v51  ;;  %v495_v1 = vld [vmem:[#allocation2 + $0x7a] sm:$0x1]  ;;  %v625_v2 = vld [vmem:[#allocation2 + $0xa9] sm:$0xff] }
  0x8a   : > { %489 = vst.msk [vmem:[#allocation2 + $0x1a1] sm:$0xff] %vm452_vm0, %v9635_v52  ;;  %v626_v7 = vld [vmem:[#allocation2 + $0xb1] sm:$0xff]  ;;  %v627_v23 = vld [vmem:[#allocation2 + $0xc1] sm:$0xff]  ;;  %v628_v24 = vld [vmem:[#allocation2 + $0xc9] sm:$0xff] }
  0x8b   : > { %509 = vst.msk [vmem:[#allocation2] sm:$0x1] %vm508_vm1, %v490_v53  ;;  %510 = vst.msk [vmem:[#allocation2 + $0x18] sm:$0x1] %vm508_vm1, %v491_v54  ;;  %7754 = vmatpush3.bf16.msra.mxu0 %v9019_v48  ;;  %v496_v16 = vld [vmem:[#allocation2 + $0x92] sm:$0x1]  ;;  %v9668_v28 = vpack.c.bf16 %v626_v7, %v625_v2  ;;  %v9672_v29 = vpack.c.bf16 %v628_v24, %v627_v23 }
  0x8c   : > { %511 = vst.msk [vmem:[#allocation2 + $0x30] sm:$0x1] %vm508_vm1, %v492_v57  ;;  %512 = vst.msk [vmem:[#allocation2 + $0x48] sm:$0x1] %vm508_vm1, %v493_v62  ;;  %7787 = vmatprep.subr.bf16.mxu0 %v9651_v60  ;;  %v497_v25 = vld [vmem:[#allocation2 + $0xaa] sm:$0x1] }
  0x8d   : > { %513 = vst.msk [vmem:[#allocation2 + $0x60] sm:$0x1] %vm508_vm1, %v494_v0  ;;  %514 = vst.msk [vmem:[#allocation2 + $0x78] sm:$0x1] %vm508_vm1, %v495_v1  ;;  %v498_v26 = vld [vmem:[#allocation2 + $0xc2] sm:$0x1] }
  0x8e   : > { %7724 = vmatmul.mubr.msk.bf16.gmra.mrb[8].mxu0 %vm452_vm0, %v9654_v61  ;;  %515 = vst.msk [vmem:[#allocation2 + $0x90] sm:$0x1] %vm508_vm1, %v496_v16  ;;  %516 = vst.msk [vmem:[#allocation2 + $0xa8] sm:$0x1] %vm508_vm1, %v497_v25  ;;  %v499_v27 = vld [vmem:[#allocation2 + $0xda] sm:$0x1] }
  0x8f   : > { %7727 = vmatprep.mubr.msk.bf16.mxu0 %vm452_vm0, %v9656_v63  ;;  %517 = vst.msk [vmem:[#allocation2 + $0xc0] sm:$0x1] %vm508_vm1, %v498_v26  ;;  %518 = vst.msk [vmem:[#allocation2 + $0xd8] sm:$0x1] %vm508_vm1, %v499_v27  ;;  %v500_v32 = vld [vmem:[#allocation2 + $0xf2] sm:$0x1] }
  0x90   : > { %v501_v34 = vld [vmem:[#allocation2 + $0x10a] sm:$0x1]  ;;  %519 = vst.msk [vmem:[#allocation2 + $0xf0] sm:$0x1] %vm508_vm1, %v500_v32  ;;  %v502_v35 = vld [vmem:[#allocation2 + $0x122] sm:$0x1] }
  0x91   : > { %520 = vst.msk [vmem:[#allocation2 + $0x108] sm:$0x1] %vm508_vm1, %v501_v34  ;;  %v629_v36 = vld [vmem:[#allocation2 + $0xd9] sm:$0xff]  ;;  %521 = vst.msk [vmem:[#allocation2 + $0x120] sm:$0x1] %vm508_vm1, %v502_v35  ;;  %v630_v38 = vld [vmem:[#allocation2 + $0xe1] sm:$0xff] }
  0x92   : > { %v503_v37 = vld [vmem:[#allocation2 + $0x13a] sm:$0x1]  ;;  %v631_v48 = vld [vmem:[#allocation2 + $0xf1] sm:$0xff]  ;;  %v9683_v55 = vpack.c.bf16 %v630_v38, %v629_v36  ;;  %v505_v56 = vld [vmem:[#allocation2 + $0x16a] sm:$0x1] }
  0x93   : > { %522 = vst.msk [vmem:[#allocation2 + $0x138] sm:$0x1] %vm508_vm1, %v503_v37  ;;  %v632_v53 = vld [vmem:[#allocation2 + $0xf9] sm:$0xff]  ;;  %v504_v54 = vld [vmem:[#allocation2 + $0x152] sm:$0x1]  ;;  %v633_v62 = vld [vmem:[#allocation2 + $0x109] sm:$0xff] }
  0x94   : > { %523 = vst.msk [vmem:[#allocation2 + $0x150] sm:$0x1] %vm508_vm1, %v504_v54  ;;  %v527_v57 = vld [vmem:[#allocation2 + $0xf] sm:$0x1]  ;;  %v9685_v58 = vpack.c.bf16 %v632_v53, %v631_v48  ;;  %524 = vst.msk [vmem:[#allocation2 + $0x168] sm:$0x1] %vm508_vm1, %v505_v56 }
  0x95   : > { %545 = vst.msk [vmem:[#allocation2 + $0x11] sm:$0x1] %vm508_vm1, %v527_v57  ;;  %v528_v59 = vld [vmem:[#allocation2 + $0x27] sm:$0x1]  ;;  %v529_v0 = vld [vmem:[#allocation2 + $0x3f] sm:$0x1] }
  0x96   : > { %7728 = vmatmul.mubr.msk.bf16.gmra.mrb[12].mxu0 %vm452_vm0, %v9668_v28  ;;  %546 = vst.msk [vmem:[#allocation2 + $0x29] sm:$0x1] %vm508_vm1, %v528_v59  ;;  %v634_v1 = vld [vmem:[#allocation2 + $0x111] sm:$0xff]  ;;  %547 = vst.msk [vmem:[#allocation2 + $0x41] sm:$0x1] %vm508_vm1, %v529_v0  ;;  %v635_v16 = vld [vmem:[#allocation2 + $0x121] sm:$0xff] }
  0x97   : > { %7731 = vmatprep.mubr.msk.bf16.mxu0 %vm452_vm0, %v9672_v29  ;;  %v530_v2 = vld [vmem:[#allocation2 + $0x57] sm:$0x1]  ;;  %v531_v7 = vld [vmem:[#allocation2 + $0x6f] sm:$0x1]  ;;  %v532_v24 = vld [vmem:[#allocation2 + $0x87] sm:$0x1]  ;;  %v9698_v25 = vpack.c.bf16 %v634_v1, %v633_v62 }
  0x98   : > { %v636_v23 = vld [vmem:[#allocation2 + $0x129] sm:$0xff]  ;;  %548 = vst.msk [vmem:[#allocation2 + $0x59] sm:$0x1] %vm508_vm1, %v530_v2  ;;  %549 = vst.msk [vmem:[#allocation2 + $0x71] sm:$0x1] %vm508_vm1, %v531_v7  ;;  %v637_v36 = vld [vmem:[#allocation2 + $0x139] sm:$0xff] }
  0x99   : > { %550 = vst.msk [vmem:[#allocation2 + $0x89] sm:$0x1] %vm508_vm1, %v532_v24  ;;  %v9700_v26 = vpack.c.bf16 %v636_v23, %v635_v16  ;;  %v533_v27 = vld [vmem:[#allocation2 + $0x9f] sm:$0x1]  ;;  %v534_v32 = vld [vmem:[#allocation2 + $0xb7] sm:$0x1] }
  0x9a   : > { %551 = vst.msk [vmem:[#allocation2 + $0xa1] sm:$0x1] %vm508_vm1, %v533_v27  ;;  %v535_v34 = vld [vmem:[#allocation2 + $0xcf] sm:$0x1]  ;;  %552 = vst.msk [vmem:[#allocation2 + $0xb9] sm:$0x1] %vm508_vm1, %v534_v32 }
  0x9b   : > { %553 = vst.msk [vmem:[#allocation2 + $0xd1] sm:$0x1] %vm508_vm1, %v535_v34  ;;  %v536_v35 = vld [vmem:[#allocation2 + $0xe7] sm:$0x1]  ;;  %v639_v38 = vld [vmem:[#allocation2 + $0x151] sm:$0xff]  ;;  %v640_v48 = vld [vmem:[#allocation2 + $0x159] sm:$0xff] }
  0x9c   : > { %554 = vst.msk [vmem:[#allocation2 + $0xe9] sm:$0x1] %vm508_vm1, %v536_v35  ;;  %v638_v37 = vld [vmem:[#allocation2 + $0x141] sm:$0xff]  ;;  %v537_v53 = vld [vmem:[#allocation2 + $0xff] sm:$0x1]  ;;  %v9715_v62 = vpack.c.bf16 %v640_v48, %v639_v38  ;;  %v641_v2 = vld [vmem:[#allocation2 + $0x169] sm:$0xff] }
  0x9d   : > { %555 = vst.msk [vmem:[#allocation2 + $0x101] sm:$0x1] %vm508_vm1, %v537_v53  ;;  %v538_v54 = vld [vmem:[#allocation2 + $0x117] sm:$0x1]  ;;  %v539_v56 = vld [vmem:[#allocation2 + $0x12f] sm:$0x1]  ;;  %v9711_v57 = vpack.c.bf16 %v638_v37, %v637_v36 }
  0x9e   : > { %7732 = vmatmul.mubr.msk.bf16.gmra.mrb[16].mxu0 %vm452_vm0, %v9683_v55  ;;  %556 = vst.msk [vmem:[#allocation2 + $0x119] sm:$0x1] %vm508_vm1, %v538_v54  ;;  %557 = vst.msk [vmem:[#allocation2 + $0x131] sm:$0x1] %vm508_vm1, %v539_v56  ;;  %v540_v59 = vld [vmem:[#allocation2 + $0x147] sm:$0x1] }
  0x9f   : > { %7735 = vmatprep.mubr.msk.bf16.mxu0 %vm452_vm0, %v9685_v58  ;;  %558 = vst.msk [vmem:[#allocation2 + $0x149] sm:$0x1] %vm508_vm1, %v540_v59  ;;  %v541_v0 = vld [vmem:[#allocation2 + $0x15f] sm:$0x1]  ;;  %v542_v1 = vld [vmem:[#allocation2 + $0x177] sm:$0x1] }
  0xa0   : > { %559 = vst.msk [vmem:[#allocation2 + $0x161] sm:$0x1] %vm508_vm1, %v541_v0  ;;  %v564_v7 = vld [vmem:[#allocation2 + $0x8] sm:$0xff]  ;;  %560 = vst.msk [vmem:[#allocation2 + $0x179] sm:$0x1] %vm508_vm1, %v542_v1  ;;  %v642_v16 = vld [vmem:[#allocation2 + $0x171] sm:$0xff] }
  0xa1   : > { %v563_v23 = vld [vmem:[#allocation2] sm:$0xff]  ;;  %v9724_v24 = vpack.c.bf16 %v642_v16, %v641_v2  ;;  %v565_v32 = vld [vmem:[#allocation2 + $0x18] sm:$0xff]  ;;  %v567_v35 = vld [vmem:[#allocation2 + $0x30] sm:$0xff] }
  0xa2   : > { %v595_v27 = vpack.c.bf16 %v564_v7, %v563_v23  ;;  %v566_v34 = vld [vmem:[#allocation2 + $0x20] sm:$0xff]  ;;  %v568_v36 = vld [vmem:[#allocation2 + $0x38] sm:$0xff]  ;;  %v569_v53 = vld [vmem:[#allocation2 + $0x48] sm:$0xff] }
  0xa3   : > { %v9729_v37 = vpack.c.bf16 %v566_v34, %v565_v32  ;;  %v9021_v38 = vld [vmem:[#allocation6 + $0x48] sm:$0xff]   ;;  %v9731_v48 = vpack.c.bf16 %v568_v36, %v567_v35  ;;  %v570_v54 = vld [vmem:[#allocation2 + $0x50] sm:$0xff]  ;;  %v571_v56 = vld [vmem:[#allocation2 + $0x60] sm:$0xff] }
  0xa4   : > { %v572_v59 = vld [vmem:[#allocation2 + $0x68] sm:$0xff]  ;;  %v9022_v0 = vld [vmem:[#allocation6 + $0x50] sm:$0xff]   ;;  %v9738_v1 = vpack.c.bf16 %v570_v54, %v569_v53  ;;  %v573_v16 = vld [vmem:[#allocation2 + $0x78] sm:$0xff] }
  0xa5   : > { %v9023_v2 = vld [vmem:[#allocation6 + $0x58] sm:$0xff]   ;;  %v9740_v7 = vpack.c.bf16 %v572_v59, %v571_v56  ;;  %v574_v23 = vld [vmem:[#allocation2 + $0x80] sm:$0xff]  ;;  %v576_v32 = vld [vmem:[#allocation2 + $0x98] sm:$0xff] }
  0xa6   : > { %7736 = vmatmul.mubr.msk.bf16.gmra.mrb[20].mxu0 %vm452_vm0, %v9698_v25  ;;  %v9744_v34 = vld [vmem:[#allocation6 + $0x60] sm:$0xff]   ;;  %v577_v36 = vld [vmem:[#allocation2 + $0xa8] sm:$0xff]  ;;  %v579_v53 = vld [vmem:[#allocation2 + $0xc0] sm:$0xff] }
  0xa7   : > { %7739 = vmatprep.mubr.msk.bf16.mxu0 %vm452_vm0, %v9700_v26  ;;  %v580_v54 = vld [vmem:[#allocation2 + $0xc8] sm:$0xff]  ;;  %v9778_v49 = vld [vmem:[%s9464_s6 + $0xf0] sm:$0xff]  ;;  %v1129_v44 = vld [vmem:[#allocation2 + $0x32] sm:$0xff] }
  0xa8   : > { %v9759_v59 = vpack.c.bf16 %v580_v54, %v579_v53  ;;  %v587_v53 = vld [vmem:[#allocation2 + $0x120] sm:$0xff]  ;;  %v588_v54 = vld [vmem:[#allocation2 + $0x128] sm:$0xff]  ;;  %11489 = vst [vmem:[#allocation32_spill] sm:$0xff] %v9778_v49  ;;  %483 = vst.msk [vmem:[#allocation2 + $0x181] sm:$0xff] %vm452_vm0, %v9778_v49 }
  0xa9   : > { %v9775_v50 = vpack.c.bf16 %v588_v54, %v587_v53  ;;  %v593_v54 = vld [vmem:[#allocation2 + $0x168] sm:$0xff]  ;;  %v594_v49 = vld [vmem:[#allocation2 + $0x170] sm:$0xff]  ;;  %v1130_v43 = vld [vmem:[#allocation2 + $0x3a] sm:$0xff] }
  0xaa   : > { %v9807_v41 = vpack.c.bf16 %v1130_v43, %v1129_v44  ;;  %v9025_v40 = vld [vmem:[#allocation6 + $0x68] sm:$0xff]   ;;  %v9027_v43 = vld [vmem:[#allocation6 + $0x78] sm:$0xff]   ;;  %v9028_v22 = vld [vmem:[#allocation6 + $0x80] sm:$0xff]  }
  0xab   : > { %v1135_v44 = vld [vmem:[#allocation2 + $0x7a] sm:$0xff] }
  0xac   : > { %v1138_v33 = vld [vmem:[#allocation2 + $0x9a] sm:$0xff] }
  0xae   : > { %7740 = vmatmul.mubr.msk.bf16.gmra.mrb[24].mxu0 %vm452_vm0, %v9711_v57 }
  0xaf   : > { %7743 = vmatprep.mubr.msk.bf16.mxu0 %vm452_vm0, %v9715_v62  ;;  %v506_v53 = vld [vmem:[#allocation2 + $0x182] sm:$0x1] }
  0xb0   : > { %525 = vst.msk [vmem:[#allocation2 + $0x180] sm:$0x1] %vm508_vm1, %v506_v53  ;;  %v1128_v53 = vld [vmem:[#allocation2 + $0x22] sm:$0xff] }
  0xb6   : > { %7744 = vmatmul.mubr.msk.bf16.gmra.mrb[28].mxu0 %vm452_vm0, %v9724_v24 }
  0xb7   : > { %7755 = vmatprep.mubr.msk.bf16.mxu0 %vm452_vm0, %v595_v27  ;;  %v575_v27 = vld [vmem:[#allocation2 + $0x90] sm:$0xff] }
  0xb8   : > { %v9750_v35 = vpack.c.bf16 %v576_v32, %v575_v27 }
  0xbe   : > { %7756 = vmatmul.mubr.msk.bf16.vlgmr.msra.gmra.mrb[0].mxu0 %vm452_vm0, %v9729_v37 }
  0xbf   : > { %7788 = vmatpush3.bf16.msra.mxu0 %v9651_v60  ;;  %7759 = vmatprep.mubr.msk.bf16.mxu0 %vm452_vm0, %v9731_v48  ;;  %v9748_v60 = vpack.c.bf16 %v574_v23, %v573_v16  ;;  %v583_v16 = vld [vmem:[#allocation2 + $0xf0] sm:$0xff]  ;;  %v584_v23 = vld [vmem:[#allocation2 + $0xf8] sm:$0xff] }
  0xc0   : > { %7789 = vmatprep.subr.bf16.mxu0 %v9021_v38  ;;  %v9767_v32 = vpack.c.bf16 %v584_v23, %v583_v16  ;;  %v591_v16 = vld [vmem:[#allocation2 + $0x150] sm:$0xff]  ;;  %v592_v23 = vld [vmem:[#allocation2 + $0x158] sm:$0xff] }
  0xc3   : > { %7790 = vmatpush3.bf16.msra.mxu0 %v9021_v38  ;;  %v578_v38 = vld [vmem:[#allocation2 + $0xb0] sm:$0xff] }
  0xc4   : > { %7791 = vmatprep.subr.bf16.mxu0 %v9022_v0  ;;  %v9757_v56 = vpack.c.bf16 %v578_v38, %v577_v36  ;;  %v585_v36 = vld [vmem:[#allocation2 + $0x108] sm:$0xff]  ;;  %v586_v38 = vld [vmem:[#allocation2 + $0x110] sm:$0xff] }
  0xc5   : > { %v9773_v51 = vpack.c.bf16 %v586_v38, %v585_v36  ;;  %v9788_v36 = vpack.c.bf16 %v592_v23, %v591_v16  ;;  %v9791_v38 = vld [vmem:[%s9464_s6 + $0xf8] sm:$0xff]  ;;  %v9800_v16 = vpack.c.bf16 %v594_v49, %v593_v54  ;;  %v1132_v54 = vld [vmem:[#allocation2 + $0x52] sm:$0xff] }
  0xc6   : > { %7760 = vmatmul.mubr.msk.bf16.gmra.mrb[4].mxu0 %vm452_vm0, %v9738_v1  ;;  %11490 = vst [vmem:[#allocation33_spill] sm:$0xff] %v9791_v38  ;;  %484 = vst.msk [vmem:[#allocation2 + $0x189] sm:$0xff] %vm452_vm0, %v9791_v38  ;;  %v1127_v38 = vld [vmem:[#allocation2 + $0x1a] sm:$0xff]  ;;  %v1131_v49 = vld [vmem:[#allocation2 + $0x4a] sm:$0xff] }
  0xc7   : > { %7763 = vmatprep.mubr.msk.bf16.mxu0 %vm452_vm0, %v9740_v7  ;;  %7792 = vmatpush3.bf16.msra.mxu0 %v9022_v0  ;;  %v581_v0 = vld [vmem:[#allocation2 + $0xd8] sm:$0xff]  ;;  %v9805_v42 = vpack.c.bf16 %v1128_v53, %v1127_v38  ;;  %v9814_v39 = vpack.c.bf16 %v1132_v54, %v1131_v49 }
  0xc8   : > { %7793 = vmatprep.subr.bf16.mxu0 %v9023_v2  ;;  %v1137_v53 = vld [vmem:[#allocation2 + $0x92] sm:$0xff] }
  0xc9   : > { %v9824_v54 = vpack.c.bf16 %v1138_v33, %v1137_v53  ;;  %v1143_v33 = vld [vmem:[#allocation2 + $0xda] sm:$0xff] }
  0xcb   : > { %7794 = vmatpush3.bf16.msra.mxu0 %v9023_v2  ;;  %v582_v2 = vld [vmem:[#allocation2 + $0xe0] sm:$0xff] }
  0xcc   : > { %7827 = vmatprep.subr.bf16.mxu0 %v9744_v34  ;;  %v9765_v27 = vpack.c.bf16 %v582_v2, %v581_v0  ;;  %v589_v0 = vld [vmem:[#allocation2 + $0x138] sm:$0xff]  ;;  %v590_v2 = vld [vmem:[#allocation2 + $0x140] sm:$0xff] }
  0xcd   : > { %v9786_v46 = vpack.c.bf16 %v590_v2, %v589_v0  ;;  %v1125_v0 = vld [vmem:[#allocation2 + $0x2] sm:$0xff]  ;;  %v1126_v2 = vld [vmem:[#allocation2 + $0xa] sm:$0xff] }
  0xce   : > { %7764 = vmatmul.mubr.msk.bf16.gmra.mrb[8].mxu0 %vm452_vm0, %v9748_v60  ;;  %v1157_v23 = vpack.c.bf16 %v1126_v2, %v1125_v0  ;;  %v1133_v0 = vld [vmem:[#allocation2 + $0x62] sm:$0xff]  ;;  %v1134_v2 = vld [vmem:[#allocation2 + $0x6a] sm:$0xff] }
  0xcf   : > { %7767 = vmatprep.mubr.msk.bf16.mxu0 %vm452_vm0, %v9750_v35  ;;  %v9816_v38 = vpack.c.bf16 %v1134_v2, %v1133_v0  ;;  %v1140_v0 = vld [vmem:[#allocation2 + $0xb2] sm:$0xff]  ;;  %v1141_v2 = vld [vmem:[#allocation2 + $0xc2] sm:$0xff] }
  0xd6   : > { %7768 = vmatmul.mubr.msk.bf16.gmra.mrb[12].mxu0 %vm452_vm0, %v9757_v56 }
  0xd7   : > { %7771 = vmatprep.mubr.msk.bf16.mxu0 %vm452_vm0, %v9759_v59 }
  0xde   : > { %7772 = vmatmul.mubr.msk.bf16.gmra.mrb[16].mxu0 %vm452_vm0, %v9765_v27 }
  0xdf   : > { %7775 = vmatprep.mubr.msk.bf16.mxu0 %vm452_vm0, %v9767_v32 }
  0xe6   : > { %7776 = vmatmul.mubr.msk.bf16.gmra.mrb[20].mxu0 %vm452_vm0, %v9773_v51 }
  0xe7   : > { %7779 = vmatprep.mubr.msk.bf16.mxu0 %vm452_vm0, %v9775_v50 }
  0xee   : > { %7780 = vmatmul.mubr.msk.bf16.gmra.mrb[24].mxu0 %vm452_vm0, %v9786_v46 }
  0xef   : > { %7783 = vmatprep.mubr.msk.bf16.mxu0 %vm452_vm0, %v9788_v36 }
  0xf6   : > { %7784 = vmatmul.mubr.msk.bf16.gmra.mrb[28].mxu0 %vm452_vm0, %v9800_v16 }
  0xf7   : > { %7795 = vmatprep.mubr.msk.bf16.mxu0 %vm452_vm0, %v1157_v23  ;;  %v9026_v23 = vld [vmem:[#allocation6 + $0x70] sm:$0xff]  }
  0xfe   : > { %7796 = vmatmul.mubr.msk.bf16.vlgmr.msra.gmra.mrb[0].mxu0 %vm452_vm0, %v9805_v42 }
  0xff   : > { %7828 = vmatpush3.bf16.msra.mxu0 %v9744_v34  ;;  %7799 = vmatprep.mubr.msk.bf16.mxu0 %vm452_vm0, %v9807_v41  ;;  %v1136_v34 = vld [vmem:[#allocation2 + $0x82] sm:$0xff] }
 0x100   : > { %7829 = vmatprep.subr.bf16.mxu0 %v9025_v40  ;;  %v9822_v49 = vpack.c.bf16 %v1136_v34, %v1135_v44  ;;  %v1145_v44 = vld [vmem:[#allocation2 + $0xf2] sm:$0xff]  ;;  %v1146_v34 = vld [vmem:[#allocation2 + $0xfa] sm:$0xff] }
 0x101   : > { %v9840_v19 = vpack.c.bf16 %v1146_v34, %v1145_v44  ;;  %v1153_v44 = vld [vmem:[#allocation2 + $0x152] sm:$0xff]  ;;  %v1154_v34 = vld [vmem:[#allocation2 + $0x15a] sm:$0xff] }
 0x102   : > { %v9856_v14 = vpack.c.bf16 %v1154_v34, %v1153_v44  ;;  %v1468_v44 = vld [vmem:[#allocation2 + $0x180] sm:$0xff]  ;;  %v1469_v34 = vld [vmem:[#allocation2 + $0x188] sm:$0xff] }
 0x103   : > { %7830 = vmatpush3.bf16.msra.mxu0 %v9025_v40  ;;  %v1139_v40 = vld [vmem:[#allocation2 + $0xaa] sm:$0xff] }
 0x104   : > { %7831 = vmatprep.subr.bf16.mxu0 %v9026_v23  ;;  %v9830_v21 = vpack.c.bf16 %v1140_v0, %v1139_v40  ;;  %v1147_v40 = vld [vmem:[#allocation2 + $0x10a] sm:$0xff]  ;;  %v1148_v0 = vld [vmem:[#allocation2 + $0x112] sm:$0xff] }
 0x105   : > { %v9846_v18 = vpack.c.bf16 %v1148_v0, %v1147_v40  ;;  %v1155_v40 = vld [vmem:[#allocation2 + $0x16a] sm:$0xff]  ;;  %v1156_v0 = vld [vmem:[#allocation2 + $0x172] sm:$0xff] }
 0x106   : > { %7800 = vmatmul.mubr.msk.bf16.gmra.mrb[4].mxu0 %vm452_vm0, %v9814_v39 }
 0x107   : > { %7803 = vmatprep.mubr.msk.bf16.mxu0 %vm452_vm0, %v9816_v38  ;;  %7832 = vmatpush3.bf16.msra.mxu0 %v9026_v23  ;;  %v1142_v23 = vld [vmem:[#allocation2 + $0xca] sm:$0xff] }
 0x108   : > { %7833 = vmatprep.subr.bf16.mxu0 %v9027_v43  ;;  %v9832_v20 = vpack.c.bf16 %v1142_v23, %v1141_v2  ;;  %v1149_v2 = vld [vmem:[#allocation2 + $0x122] sm:$0xff]  ;;  %v1150_v23 = vld [vmem:[#allocation2 + $0x12a] sm:$0xff] }
 0x109   : > { %v9848_v17 = vpack.c.bf16 %v1150_v23, %v1149_v2  ;;  %v9862_v2 = vpack.c.bf16 %v1156_v0, %v1155_v40  ;;  %v9029_v23 = vld [vmem:[#allocation6 + $0x88] sm:$0xff]   ;;  %v9897_v40 = vpack.c.bf16 %v1469_v34, %v1468_v44  ;;  %v2701_v44 = vld [vmem:[#allocation2 + $0xa9] sm:$0xff] }
 0x10a   : > { %v9033_v0 = vld [vmem:[#allocation6 + $0xa8] sm:$0xff]  }
 0x10b   : > { %7834 = vmatpush3.bf16.msra.mxu0 %v9027_v43  ;;  %v1144_v43 = vld [vmem:[#allocation2 + $0xe2] sm:$0xff]  ;;  %v2702_v34 = vld [vmem:[#allocation2 + $0xb1] sm:$0xff] }
 0x10c   : > { %7867 = vmatprep.subr.bf16.mxu0 %v9028_v22  ;;  %v9838_v53 = vpack.c.bf16 %v1144_v43, %v1143_v33  ;;  %v1151_v33 = vld [vmem:[#allocation2 + $0x13a] sm:$0xff]  ;;  %v1152_v43 = vld [vmem:[#allocation2 + $0x142] sm:$0xff] }
 0x10d   : > { %v9854_v15 = vpack.c.bf16 %v1152_v43, %v1151_v33  ;;  %v9030_v33 = vld [vmem:[#allocation6 + $0x90] sm:$0xff]   ;;  %v9031_v43 = vld [vmem:[#allocation6 + $0x98] sm:$0xff]  }
 0x10e   : > { %7804 = vmatmul.mubr.msk.bf16.gmra.mrb[8].mxu0 %vm452_vm0, %v9822_v49 }
 0x10f   : > { %7807 = vmatprep.mubr.msk.bf16.mxu0 %vm452_vm0, %v9824_v54 }
 0x116   : > { %7808 = vmatmul.mubr.msk.bf16.gmra.mrb[12].mxu0 %vm452_vm0, %v9830_v21 }
 0x117   : > { %7811 = vmatprep.mubr.msk.bf16.mxu0 %vm452_vm0, %v9832_v20 }
 0x11e   : > { %7812 = vmatmul.mubr.msk.bf16.gmra.mrb[16].mxu0 %vm452_vm0, %v9838_v53 }
 0x11f   : > { %7815 = vmatprep.mubr.msk.bf16.mxu0 %vm452_vm0, %v9840_v19 }
 0x126   : > { %7816 = vmatmul.mubr.msk.bf16.gmra.mrb[20].mxu0 %vm452_vm0, %v9846_v18 }
 0x127   : > { %7819 = vmatprep.mubr.msk.bf16.mxu0 %vm452_vm0, %v9848_v17 }
 0x12e   : > { %7820 = vmatmul.mubr.msk.bf16.gmra.mrb[24].mxu0 %vm452_vm0, %v9854_v15 }
 0x12f   : > { %7823 = vmatprep.mubr.msk.bf16.mxu0 %vm452_vm0, %v9856_v14 }
 0x136   : > { %7824 = vmatmul.mubr.msk.bf16.gmra.mrb[28].mxu0 %vm452_vm0, %v9862_v2 }
 0x137   : > { %7835 = vmatprep.mubr.msk.bf16.mxu0 %vm452_vm0, %v9729_v37  ;;  %v9032_v37 = vld [vmem:[#allocation6 + $0xa0] sm:$0xff]  }
 0x13e   : > { %7836 = vmatmul.mubr.msk.bf16.vlgmr.msra.gmra.mrb[0].mxu0 %vm452_vm0, %v9731_v48 }
 0x13f   : > { %7868 = vmatpush3.bf16.msra.mxu0 %v9028_v22  ;;  %7839 = vmatprep.mubr.msk.bf16.mxu0 %vm452_vm0, %v9738_v1  ;;  %v543_v22 = vld [vmem:[#allocation2 + $0x18f] sm:$0x1] }
 0x140   : > { %7869 = vmatprep.subr.bf16.mxu0 %v9029_v23  ;;  %561 = vst.msk [vmem:[#allocation2 + $0x191] sm:$0x1] %vm508_vm1, %v543_v22  ;;  %v9047_v22 = vld [vmem:[#allocation6 + $0x118] sm:$0xff]  }
 0x143   : > { %7870 = vmatpush3.bf16.msra.mxu0 %v9029_v23  ;;  %v9034_v23 = vld [vmem:[#allocation6 + $0xb0] sm:$0xff]  }
 0x144   : > { %7871 = vmatprep.subr.bf16.mxu0 %v9030_v33 }
 0x146   : > { %7840 = vmatmul.mubr.msk.bf16.gmra.mrb[4].mxu0 %vm452_vm0, %v9740_v7 }
 0x147   : > { %7843 = vmatprep.mubr.msk.bf16.mxu0 %vm452_vm0, %v9748_v60  ;;  %7872 = vmatpush3.bf16.msra.mxu0 %v9030_v33  ;;  %v9035_v33 = vld [vmem:[#allocation6 + $0xb8] sm:$0xff]  }
 0x148   : > { %7873 = vmatprep.subr.bf16.mxu0 %v9031_v43 }
 0x14b   : > { %7874 = vmatpush3.bf16.msra.mxu0 %v9031_v43 }
 0x14c   : > { %7907 = vmatprep.subr.bf16.mxu0 %v9032_v37 }
 0x14e   : > { %7844 = vmatmul.mubr.msk.bf16.gmra.mrb[8].mxu0 %vm452_vm0, %v9750_v35 }
 0x14f   : > { %7847 = vmatprep.mubr.msk.bf16.mxu0 %vm452_vm0, %v9757_v56 }
 0x156   : > { %7848 = vmatmul.mubr.msk.bf16.gmra.mrb[12].mxu0 %vm452_vm0, %v9759_v59 }
 0x157   : > { %7851 = vmatprep.mubr.msk.bf16.mxu0 %vm452_vm0, %v9765_v27 }
 0x15e   : > { %7852 = vmatmul.mubr.msk.bf16.gmra.mrb[16].mxu0 %vm452_vm0, %v9767_v32 }
 0x15f   : > { %7855 = vmatprep.mubr.msk.bf16.mxu0 %vm452_vm0, %v9773_v51 }
 0x166   : > { %7856 = vmatmul.mubr.msk.bf16.gmra.mrb[20].mxu0 %vm452_vm0, %v9775_v50 }
 0x167   : > { %7859 = vmatprep.mubr.msk.bf16.mxu0 %vm452_vm0, %v9786_v46 }
 0x16e   : > { %7860 = vmatmul.mubr.msk.bf16.gmra.mrb[24].mxu0 %vm452_vm0, %v9788_v36 }
 0x16f   : > { %7863 = vmatprep.mubr.msk.bf16.mxu0 %vm452_vm0, %v9800_v16 }
 0x176   : > { %7864 = vmatmul.mubr.msk.bf16.gmra.mrb[28].mxu0 %vm452_vm0, %v9897_v40 }
 0x177   : > { %7875 = vmatprep.mubr.msk.bf16.mxu0 %vm452_vm0, %v9568_v30  ;;  %v9036_v30 = vld [vmem:[#allocation6 + $0xc0] sm:$0xff]  }
 0x17e   : > { %7876 = vmatmul.mubr.msk.bf16.vlgmr.msra.gmra.mrb[0].mxu0 %vm452_vm0, %v9571_v31  ;;  %v507_v31 = vld [vmem:[#allocation2 + $0x19a] sm:$0x1] }
 0x17f   : > { %7908 = vmatpush3.bf16.msra.mxu0 %v9032_v37  ;;  %7879 = vmatprep.mubr.msk.bf16.mxu0 %vm452_vm0, %v9606_v45  ;;  %526 = vst.msk [vmem:[#allocation2 + $0x198] sm:$0x1] %vm508_vm1, %v507_v31  ;;  %v1781_v45 = vld [vmem:[#allocation2 + $0x181] sm:$0xff] }
 0x180   : > { %7909 = vmatprep.subr.bf16.mxu0 %v9033_v0  ;;  %v2706_v31 = vld [vmem:[#allocation2 + $0xe1] sm:$0xff] }
 0x183   : > { %7910 = vmatpush3.bf16.msra.mxu0 %v9033_v0  ;;  %v2704_v0 = vld [vmem:[#allocation2 + $0xc9] sm:$0xff] }
 0x184   : > { %7911 = vmatprep.subr.bf16.mxu0 %v9034_v23 }
 0x186   : > { %7880 = vmatmul.mubr.msk.bf16.gmra.mrb[4].mxu0 %vm452_vm0, %v9617_v47  ;;  %v1782_v47 = vld [vmem:[#allocation2 + $0x189] sm:$0xff] }
 0x187   : > { %7883 = vmatprep.mubr.msk.bf16.mxu0 %vm452_vm0, %v9654_v61  ;;  %7912 = vmatpush3.bf16.msra.mxu0 %v9034_v23  ;;  %v9932_v61 = vpack.c.bf16 %v1782_v47, %v1781_v45  ;;  %v2728_v23 = vpack.c.bf16 %v2702_v34, %v2701_v44  ;;  %v2707_v45 = vld [vmem:[#allocation2 + $0xf1] sm:$0xff]  ;;  %v2708_v47 = vld [vmem:[#allocation2 + $0xf9] sm:$0xff] }
 0x188   : > { %7913 = vmatprep.subr.bf16.mxu0 %v9035_v33 }
 0x18b   : > { %7914 = vmatpush3.bf16.msra.mxu0 %v9035_v33 }
 0x18c   : > { %7947 = vmatprep.subr.bf16.mxu0 %v9036_v30 }
 0x18e   : > { %7884 = vmatmul.mubr.msk.bf16.gmra.mrb[8].mxu0 %vm452_vm0, %v9656_v63  ;;  %v9037_v63 = vld [vmem:[#allocation6 + $0xc8] sm:$0xff]  }
 0x18f   : > { %7887 = vmatprep.mubr.msk.bf16.mxu0 %vm452_vm0, %v9668_v28  ;;  %v9038_v28 = vld [vmem:[#allocation6 + $0xd0] sm:$0xff]  }
 0x196   : > { %7888 = vmatmul.mubr.msk.bf16.gmra.mrb[12].mxu0 %vm452_vm0, %v9672_v29  ;;  %v9039_v29 = vld [vmem:[#allocation6 + $0xd8] sm:$0xff]  }
 0x197   : > { %7891 = vmatprep.mubr.msk.bf16.mxu0 %vm452_vm0, %v9683_v55 }
 0x19e   : > { %7892 = vmatmul.mubr.msk.bf16.gmra.mrb[16].mxu0 %vm452_vm0, %v9685_v58  ;;  %v9041_v58 = vld [vmem:[#allocation6 + $0xe8] sm:$0xff]  }
 0x19f   : > { %7895 = vmatprep.mubr.msk.bf16.mxu0 %vm452_vm0, %v9698_v25  ;;  %v9042_v25 = vld [vmem:[#allocation6 + $0xf0] sm:$0xff]  }
 0x1a6   : > { %7896 = vmatmul.mubr.msk.bf16.gmra.mrb[20].mxu0 %vm452_vm0, %v9700_v26  ;;  %v9043_v26 = vld [vmem:[#allocation6 + $0xf8] sm:$0xff]  }
 0x1a7   : > { %7899 = vmatprep.mubr.msk.bf16.mxu0 %vm452_vm0, %v9711_v57  ;;  %v9044_v57 = vld [vmem:[#allocation6 + $0x100] sm:$0xff]  }
 0x1ae   : > { %7900 = vmatmul.mubr.msk.bf16.gmra.mrb[24].mxu0 %vm452_vm0, %v9715_v62  ;;  %v544_v62 = vld [vmem:[#allocation2 + $0x1a7] sm:$0x1] }
 0x1af   : > { %7903 = vmatprep.mubr.msk.bf16.mxu0 %vm452_vm0, %v9724_v24  ;;  %562 = vst.msk [vmem:[#allocation2 + $0x1a9] sm:$0x1] %vm508_vm1, %v544_v62  ;;  %v2408_v24 = vld [vmem:[#allocation2 + $0x198] sm:$0xff] }
 0x1b0   : > { %v2715_v62 = vld [vmem:[#allocation2 + $0x151] sm:$0xff] }
 0x1b6   : > { %7904 = vmatmul.mubr.msk.bf16.gmra.mrb[28].mxu0 %vm452_vm0, %v9932_v61 }
 0x1b7   : > { %7915 = vmatprep.mubr.msk.bf16.mxu0 %vm452_vm0, %v9805_v42  ;;  %v9040_v42 = vld [vmem:[#allocation6 + $0xe0] sm:$0xff]  }
 0x1be   : > { %7916 = vmatmul.mubr.msk.bf16.vlgmr.msra.gmra.mrb[0].mxu0 %vm452_vm0, %v9807_v41  ;;  %v2095_v41 = vld [vmem:[#allocation2 + $0x18a] sm:$0xff] }
 0x1bf   : > { %7948 = vmatpush3.bf16.msra.mxu0 %v9036_v30  ;;  %7919 = vmatprep.mubr.msk.bf16.mxu0 %vm452_vm0, %v9814_v39  ;;  %v2094_v39 = vld [vmem:[#allocation2 + $0x182] sm:$0xff]  ;;  %v2705_v30 = vld [vmem:[#allocation2 + $0xd9] sm:$0xff] }
 0x1c0   : > { %7949 = vmatprep.subr.bf16.mxu0 %v9037_v63  ;;  %v9966_v55 = vpack.c.bf16 %v2095_v41, %v2094_v39  ;;  %v2711_v39 = vld [vmem:[#allocation2 + $0x121] sm:$0xff]  ;;  %v2712_v41 = vld [vmem:[#allocation2 + $0x129] sm:$0xff] }
 0x1c3   : > { %7950 = vmatpush3.bf16.msra.mxu0 %v9037_v63  ;;  %v2730_v63 = vpack.c.bf16 %v2706_v31, %v2705_v30 }
 0x1c4   : > { %7951 = vmatprep.subr.bf16.mxu0 %v9038_v28 }
 0x1c6   : > { %7920 = vmatmul.mubr.msk.bf16.gmra.mrb[4].mxu0 %vm452_vm0, %v9816_v38  ;;  %v2699_v38 = vld [vmem:[#allocation2 + $0x91] sm:$0xff] }
 0x1c7   : > { %7923 = vmatprep.mubr.msk.bf16.mxu0 %vm452_vm0, %v9822_v49  ;;  %7952 = vmatpush3.bf16.msra.mxu0 %v9038_v28  ;;  %v2700_v49 = vld [vmem:[#allocation2 + $0x99] sm:$0xff]  ;;  %v2731_v28 = vpack.c.bf16 %v2708_v47, %v2707_v45 }
 0x1c8   : > { %7953 = vmatprep.subr.bf16.mxu0 %v9039_v29  ;;  %v2727_v37 = vpack.c.bf16 %v2700_v49, %v2699_v38  ;;  %v3009_v38 = vld [vmem:[#allocation2 + $0x6a] sm:$0xff] }
 0x1cb   : > { %7954 = vmatpush3.bf16.msra.mxu0 %v9039_v29  ;;  %v2709_v29 = vld [vmem:[#allocation2 + $0x109] sm:$0xff] }
 0x1cc   : > { %7987 = vmatprep.subr.bf16.mxu0 %v9040_v42 }
 0x1ce   : > { %7924 = vmatmul.mubr.msk.bf16.gmra.mrb[8].mxu0 %vm452_vm0, %v9824_v54  ;;  %v9046_v54 = vld [vmem:[#allocation6 + $0x110] sm:$0xff]  }
 0x1cf   : > { %7927 = vmatprep.mubr.msk.bf16.mxu0 %vm452_vm0, %v9830_v21 }
 0x1d6   : > { %7928 = vmatmul.mubr.msk.bf16.gmra.mrb[12].mxu0 %vm452_vm0, %v9832_v20 }
 0x1d7   : > { %7931 = vmatprep.mubr.msk.bf16.mxu0 %vm452_vm0, %v9838_v53 }
 0x1de   : > { %7932 = vmatmul.mubr.msk.bf16.gmra.mrb[16].mxu0 %vm452_vm0, %v9840_v19 }
 0x1df   : > { %7935 = vmatprep.mubr.msk.bf16.mxu0 %vm452_vm0, %v9846_v18 }
 0x1e6   : > { %7936 = vmatmul.mubr.msk.bf16.gmra.mrb[20].mxu0 %vm452_vm0, %v9848_v17 }
 0x1e7   : > { %7939 = vmatprep.mubr.msk.bf16.mxu0 %vm452_vm0, %v9854_v15 }
 0x1ee   : > { %7940 = vmatmul.mubr.msk.bf16.gmra.mrb[24].mxu0 %vm452_vm0, %v9856_v14 }
 0x1ef   : > { %7943 = vmatprep.mubr.msk.bf16.mxu0 %vm452_vm0, %v9862_v2 }
 0x1f6   : > { %7944 = vmatmul.mubr.msk.bf16.gmra.mrb[28].mxu0 %vm452_vm0, %v9966_v55 }
 0x1f7   : > { %7955 = vmatprep.mubr.msk.bf16.mxu0 %vm452_vm0, %v9731_v48  ;;  %v2691_v48 = vld [vmem:[#allocation2 + $0x31] sm:$0xff] }
 0x1fe   : > { %7956 = vmatmul.mubr.msk.bf16.vlgmr.msra.gmra.mrb[0].mxu0 %vm452_vm0, %v9738_v1  ;;  %v2692_v1 = vld [vmem:[#allocation2 + $0x39] sm:$0xff] }
 0x1ff   : > { %7988 = vmatpush3.bf16.msra.mxu0 %v9040_v42  ;;  %7959 = vmatprep.mubr.msk.bf16.mxu0 %vm452_vm0, %v9740_v7  ;;  %v2723_v7 = vpack.c.bf16 %v2692_v1, %v2691_v48  ;;  %v2710_v42 = vld [vmem:[#allocation2 + $0x111] sm:$0xff]  ;;  %v2717_v1 = vld [vmem:[#allocation2 + $0x169] sm:$0xff] }
 0x200   : > { %7989 = vmatprep.subr.bf16.mxu0 %v9041_v58 }
 0x203   : > { %7990 = vmatpush3.bf16.msra.mxu0 %v9041_v58  ;;  %v2732_v58 = vpack.c.bf16 %v2710_v42, %v2709_v29 }
 0x204   : > { %7991 = vmatprep.subr.bf16.mxu0 %v9042_v25 }
 0x206   : > { %7960 = vmatmul.mubr.msk.bf16.gmra.mrb[4].mxu0 %vm452_vm0, %v9748_v60  ;;  %v2694_v60 = vld [vmem:[#allocation2 + $0x51] sm:$0xff] }
 0x207   : > { %7963 = vmatprep.mubr.msk.bf16.mxu0 %vm452_vm0, %v9750_v35  ;;  %7992 = vmatpush3.bf16.msra.mxu0 %v9042_v25  ;;  %v2695_v35 = vld [vmem:[#allocation2 + $0x61] sm:$0xff]  ;;  %v2733_v25 = vpack.c.bf16 %v2712_v41, %v2711_v39 }
 0x208   : > { %7993 = vmatprep.subr.bf16.mxu0 %v9043_v26 }
 0x20b   : > { %7994 = vmatpush3.bf16.msra.mxu0 %v9043_v26  ;;  %v2713_v26 = vld [vmem:[#allocation2 + $0x139] sm:$0xff] }
 0x20c   : > { %8027 = vmatprep.subr.bf16.mxu0 %v9044_v57 }
 0x20e   : > { %7964 = vmatmul.mubr.msk.bf16.gmra.mrb[8].mxu0 %vm452_vm0, %v9757_v56  ;;  %v2696_v56 = vld [vmem:[#allocation2 + $0x69] sm:$0xff] }
 0x20f   : > { %7967 = vmatprep.mubr.msk.bf16.mxu0 %vm452_vm0, %v9759_v59 }
 0x216   : > { %7968 = vmatmul.mubr.msk.bf16.gmra.mrb[12].mxu0 %vm452_vm0, %v9765_v27  ;;  %v2725_v27 = vpack.c.bf16 %v2696_v56, %v2695_v35  ;;  %v3004_v35 = vld [vmem:[#allocation2 + $0x32] sm:$0xff]  ;;  %v3005_v56 = vld [vmem:[#allocation2 + $0x3a] sm:$0xff] }
 0x217   : > { %7971 = vmatprep.mubr.msk.bf16.mxu0 %vm452_vm0, %v9767_v32  ;;  %v9045_v32 = vld [vmem:[#allocation6 + $0x108] sm:$0xff]  }
 0x21e   : > { %7972 = vmatmul.mubr.msk.bf16.gmra.mrb[16].mxu0 %vm452_vm0, %v9773_v51  ;;  %v2409_v51 = vld [vmem:[#allocation2 + $0x1a0] sm:$0xff] }
 0x21f   : > { %7975 = vmatprep.mubr.msk.bf16.mxu0 %vm452_vm0, %v9775_v50  ;;  %v2425_v50 = vpack.c.bf16 %v2409_v51, %v2408_v24  ;;  %v2716_v24 = vld [vmem:[#allocation2 + $0x159] sm:$0xff] }
 0x220   : > { %v2735_v48 = vpack.c.bf16 %v2716_v24, %v2715_v62 }
 0x226   : > { %7976 = vmatmul.mubr.msk.bf16.gmra.mrb[20].mxu0 %vm452_vm0, %v9786_v46  ;;  %v2693_v46 = vld [vmem:[#allocation2 + $0x49] sm:$0xff] }
 0x227   : > { %7979 = vmatprep.mubr.msk.bf16.mxu0 %vm452_vm0, %v9788_v36  ;;  %v2724_v59 = vpack.c.bf16 %v2694_v60, %v2693_v46  ;;  %v2697_v36 = vld [vmem:[#allocation2 + $0x79] sm:$0xff]  ;;  %v2722_v60 = vld [vmem:[#allocation2 + $0x1a1] sm:$0xff] }
 0x228   : > { %v2721_v46 = vld [vmem:[#allocation2 + $0x199] sm:$0xff] }
 0x22e   : > { %7980 = vmatmul.mubr.msk.bf16.gmra.mrb[24].mxu0 %vm452_vm0, %v9800_v16  ;;  %v2698_v16 = vld [vmem:[#allocation2 + $0x81] sm:$0xff] }
 0x22f   : > { %7983 = vmatprep.mubr.msk.bf16.mxu0 %vm452_vm0, %v9897_v40  ;;  %v2726_v43 = vpack.c.bf16 %v2698_v16, %v2697_v36  ;;  %v2703_v40 = vld [vmem:[#allocation2 + $0xc1] sm:$0xff]  ;;  %v3007_v36 = vld [vmem:[#allocation2 + $0x52] sm:$0xff] }
 0x230   : > { %v2729_v33 = vpack.c.bf16 %v2704_v0, %v2703_v40  ;;  %v3008_v16 = vld [vmem:[#allocation2 + $0x62] sm:$0xff] }
 0x236   : > { %7984 = vmatmul.mubr.msk.bf16.gmra.mrb[28].mxu0 %vm452_vm0, %v2425_v50  ;;  %v2718_v50 = vld [vmem:[#allocation2 + $0x171] sm:$0xff] }
 0x237   : > { %7995 = vmatprep.mubr.msk.bf16.mxu0 %vm452_vm0, %v2723_v7  ;;  %v2736_v7 = vpack.c.bf16 %v2718_v50, %v2717_v1 }
 0x23e   : > { %7996 = vmatmul.mubr.msk.bf16.vlgmr.msra.gmra.mrb[0].mxu0 %vm452_vm0, %v2724_v59  ;;  %v2738_v59 = vpack.c.bf16 %v2722_v60, %v2721_v46 }
 0x23f   : > { %8028 = vmatpush3.bf16.msra.mxu0 %v9044_v57  ;;  %7999 = vmatprep.mubr.msk.bf16.mxu0 %vm452_vm0, %v2725_v27  ;;  %v2714_v57 = vld [vmem:[#allocation2 + $0x141] sm:$0xff]  ;;  %v3036_v27 = vpack.c.bf16 %v3005_v56, %v3004_v35 }
 0x240   : > { %8029 = vmatprep.subr.bf16.mxu0 %v9045_v32  ;;  %v2734_v51 = vpack.c.bf16 %v2714_v57, %v2713_v26 }
 0x243   : > { %8030 = vmatpush3.bf16.msra.mxu0 %v9045_v32  ;;  %v3006_v32 = vld [vmem:[#allocation2 + $0x4a] sm:$0xff] }
 0x244   : > { %8031 = vmatprep.subr.bf16.mxu0 %v9046_v54  ;;  %v3037_v49 = vpack.c.bf16 %v3007_v36, %v3006_v32 }
 0x246   : > { %8000 = vmatmul.mubr.msk.bf16.gmra.mrb[4].mxu0 %vm452_vm0, %v2726_v43  ;;  %v3011_v43 = vld [vmem:[#allocation2 + $0x82] sm:$0xff] }
 0x247   : > { %8003 = vmatprep.mubr.msk.bf16.mxu0 %vm452_vm0, %v2727_v37  ;;  %8032 = vmatpush3.bf16.msra.mxu0 %v9046_v54  ;;  %v3038_v54 = vpack.c.bf16 %v3009_v38, %v3008_v16  ;;  %v3012_v37 = vld [vmem:[#allocation2 + $0x92] sm:$0xff] }
 0x248   : > { %8033 = vmatprep.subr.bf16.mxu0 %v9047_v22 }
 0x24b   : > { %8034 = vmatpush3.bf16.msra.mxu0 %v9047_v22  ;;  %v3013_v22 = vld [vmem:[#allocation2 + $0x9a] sm:$0xff] }
 0x24c   : > { %v3040_v34 = vpack.c.bf16 %v3013_v22, %v3012_v37 }
 0x24e   : > { %8004 = vmatmul.mubr.msk.bf16.gmra.mrb[8].mxu0 %vm452_vm0, %v2728_v23 }
 0x24f   : > { %8007 = vmatprep.mubr.msk.bf16.mxu0 %vm452_vm0, %v2729_v33 }
 0x256   : > { %8008 = vmatmul.mubr.msk.bf16.gmra.mrb[12].mxu0 %vm452_vm0, %v2730_v63 }
 0x257   : > { %8011 = vmatprep.mubr.msk.bf16.mxu0 %vm452_vm0, %v2731_v28 }
 0x25e   : > { %8012 = vmatmul.mubr.msk.bf16.gmra.mrb[16].mxu0 %vm452_vm0, %v2732_v58 }
 0x25f   : > { %8015 = vmatprep.mubr.msk.bf16.mxu0 %vm452_vm0, %v2733_v25 }
 0x266   : > { %8016 = vmatmul.mubr.msk.bf16.gmra.mrb[20].mxu0 %vm452_vm0, %v2734_v51 }
 0x267   : > { %8019 = vmatprep.mubr.msk.bf16.mxu0 %vm452_vm0, %v2735_v48 }
 0x26e   : > { %8020 = vmatmul.mubr.msk.bf16.gmra.mrb[24].mxu0 %vm452_vm0, %v2736_v7 }
 0x26f   : > { %8023 = vmatprep.mubr.msk.bf16.mxu0 %vm452_vm0, %v9932_v61  ;;  %v3010_v61 = vld [vmem:[#allocation2 + $0x7a] sm:$0xff] }
 0x270   : > { %v3039_v44 = vpack.c.bf16 %v3011_v43, %v3010_v61 }
 0x276   : > { %8024 = vmatmul.mubr.msk.bf16.gmra.mrb[28].mxu0 %vm452_vm0, %v2738_v59 }
 0x277   : > { %8035 = vmatprep.mubr.msk.bf16.mxu0 %vm452_vm0, %v3036_v27 }
 0x27e   : > { %8036 = vmatmul.mubr.msk.bf16.vlgmr.msra.gmra.mrb[0].mxu0 %vm452_vm0, %v3037_v49 }
 0x27f   : > { %8039 = vmatprep.mubr.msk.bf16.mxu0 %vm452_vm0, %v3038_v54 }
 0x286   : > { %8040 = vmatmul.mubr.msk.bf16.gmra.mrb[4].mxu0 %vm452_vm0, %v3039_v44 }
 0x287   : > { %8043 = vmatprep.mubr.msk.bf16.mxu0 %vm452_vm0, %v3040_v34 }
 0x28e   : > { %8044 = vmatmul.mubr.msk.bf16.gmra.mrb[8].mxu0 %vm452_vm0, %v9830_v21 }
 0x28f   : > { %8047 = vmatprep.mubr.msk.bf16.mxu0 %vm452_vm0, %v9832_v20  ;;  %v3034_v20 = vld [vmem:[#allocation2 + $0x19a] sm:$0xff] }
 0x296   : > { %8048 = vmatmul.mubr.msk.bf16.gmra.mrb[12].mxu0 %vm452_vm0, %v9838_v53 }
 0x297   : > { %8051 = vmatprep.mubr.msk.bf16.mxu0 %vm452_vm0, %v9840_v19  ;;  %v3035_v19 = vld [vmem:[#allocation2 + $0x1a2] sm:$0xff] }
 0x298   : > { %v3051_v21 = vpack.c.bf16 %v3035_v19, %v3034_v20 }
 0x29e   : > { %8052 = vmatmul.mubr.msk.bf16.gmra.mrb[16].mxu0 %vm452_vm0, %v9846_v18 }
 0x29f   : > { %8055 = vmatprep.mubr.msk.bf16.mxu0 %vm452_vm0, %v9848_v17  ;;  %v10048_v17 = vld [vmem:[%s11432_s2] ss:$0 sm:$0xff] }
 0x2a6   : > { %8056 = vmatmul.mubr.msk.bf16.gmra.mrb[20].mxu0 %vm452_vm0, %v9854_v15 }
 0x2a7   : > { %8059 = vmatprep.mubr.msk.bf16.mxu0 %vm452_vm0, %v9856_v14 }
 0x2ae   : > { %8060 = vmatmul.mubr.msk.bf16.gmra.mrb[24].mxu0 %vm452_vm0, %v9862_v2 }
 0x2af   : > { %8063 = vmatprep.mubr.msk.bf16.mxu0 %vm452_vm0, %v9966_v55 }
 0x2b6   : > { %8064 = vmatmul.mubr.msk.bf16.gmra.mrb[28].mxu0 %vm452_vm0, %v3051_v21 }
 0x351   : > { %v8037_v15 = vpop.f32.mrb[0].mxu0 }
 0x352   : > { %v3158_v18 = vpop.f32.mrb[1].mxu0  ;;  %v10054_v40 = vadd.f32 %v8037_v15, %v10048_v17 }
 0x353   : > { %v10051_v14 = vadd.f32 %v10048_v17, %v3158_v18  ;;  %v8038_v53 = vpop.f32.mrb[2].mxu0 }
 0x354   : > { %v3161_v2 = vpop.f32.mrb[3].mxu0  ;;  %v10062_v23 = vadd.f32 %v8038_v53, %v10048_v17  ;;  %v3358_v31 = vsel %vm452_vm0, %v10054_v40, 0.0 }
 0x355   : > { %v10057_v55 = vadd.f32 %v10048_v17, %v3161_v2  ;;  %v3355_v0 = vsel %vm452_vm0, %v10051_v14, 0.0 }
 0x356   : > { %v3360_v28 = vsel %vm452_vm0, %v10062_v23, 0.0 }
 0x357   : > { %v3356_v33 = vsel %vm452_vm0, %v10057_v55, 0.0 }
 0x358   : > { %v3357_v30 = vadd.f32 %v3356_v33, %v3355_v0 }
 0x359   : > { %v8041_v45 = vpop.f32.mrb[4].mxu0 }
 0x35a   : > { %v3359_v47 = vadd.f32 %v3358_v31, %v3357_v30  ;;  %v3174_v63 = vpop.f32.mrb[5].mxu0  ;;  %v10074_v58 = vadd.f32 %v8041_v45, %v10048_v17 }
 0x35b   : > { %v10071_v29 = vadd.f32 %v10048_v17, %v3174_v63  ;;  %v8042_v42 = vpop.f32.mrb[6].mxu0 }
 0x35c   : > { %v3361_v39 = vadd.f32 %v3360_v28, %v3359_v47  ;;  %v3177_v41 = vpop.f32.mrb[7].mxu0  ;;  %v10082_v62 = vadd.f32 %v8042_v42, %v10048_v17  ;;  %v3366_v48 = vsel %vm452_vm0, %v10074_v58, 0.0 }
 0x35d   : > { %v3362_v25 = vsel %vm452_vm0, %v10071_v29, 0.0  ;;  %v10079_v26 = vadd.f32 %v10048_v17, %v3177_v41 }
 0x35e   : > { %v3363_v57 = vadd.f32 %v3362_v25, %v3361_v39  ;;  %v3368_v46 = vsel %vm452_vm0, %v10082_v62, 0.0 }
 0x35f   : > { %v3364_v24 = vsel %vm452_vm0, %v10079_v26, 0.0 }
 0x360   : > { %v3365_v51 = vadd.f32 %v3364_v24, %v3363_v57 }
 0x361   : > { %v8045_v1 = vpop.f32.mrb[8].mxu0 }
 0x362   : > { %v3367_v50 = vadd.f32 %v3366_v48, %v3365_v51  ;;  %v3190_v7 = vpop.f32.mrb[9].mxu0  ;;  %v10094_v27 = vadd.f32 %v8045_v1, %v10048_v17 }
 0x363   : > { %v10091_v60 = vadd.f32 %v10048_v17, %v3190_v7  ;;  %v8046_v35 = vpop.f32.mrb[10].mxu0 }
 0x364   : > { %v3369_v56 = vadd.f32 %v3368_v46, %v3367_v50  ;;  %v3193_v59 = vpop.f32.mrb[11].mxu0  ;;  %v10102_v38 = vadd.f32 %v8046_v35, %v10048_v17  ;;  %v3374_v61 = vsel %vm452_vm0, %v10094_v27, 0.0 }
 0x365   : > { %v3370_v32 = vsel %vm452_vm0, %v10091_v60, 0.0  ;;  %v10099_v36 = vadd.f32 %v10048_v17, %v3193_v59 }
 0x366   : > { %v3371_v16 = vadd.f32 %v3370_v32, %v3369_v56  ;;  %v3376_v44 = vsel %vm452_vm0, %v10102_v38, 0.0 }
 0x367   : > { %v3372_v49 = vsel %vm452_vm0, %v10099_v36, 0.0 }
 0x368   : > { %v3373_v54 = vadd.f32 %v3372_v49, %v3371_v16 }
 0x369   : > { %v8049_v43 = vpop.f32.mrb[12].mxu0 }
 0x36a   : > { %v3375_v37 = vadd.f32 %v3374_v61, %v3373_v54  ;;  %v3206_v22 = vpop.f32.mrb[13].mxu0  ;;  %v10114_v15 = vadd.f32 %v8049_v43, %v10048_v17 }
 0x36b   : > { %v10111_v34 = vadd.f32 %v10048_v17, %v3206_v22  ;;  %v8050_v20 = vpop.f32.mrb[14].mxu0 }
 0x36c   : > { %v3377_v19 = vadd.f32 %v3376_v44, %v3375_v37  ;;  %v3209_v21 = vpop.f32.mrb[15].mxu0  ;;  %v10122_v0 = vadd.f32 %v8050_v20, %v10048_v17  ;;  %v3382_v31 = vsel %vm452_vm0, %v10114_v15, 0.0 }
 0x36d   : > { %v3378_v18 = vsel %vm452_vm0, %v10111_v34, 0.0  ;;  %v10119_v53 = vadd.f32 %v10048_v17, %v3209_v21 }
 0x36e   : > { %v3379_v2 = vadd.f32 %v3378_v18, %v3377_v19  ;;  %v3384_v28 = vsel %vm452_vm0, %v10122_v0, 0.0 }
 0x36f   : > { %v3380_v33 = vsel %vm452_vm0, %v10119_v53, 0.0 }
 0x370   : > { %v3381_v30 = vadd.f32 %v3380_v33, %v3379_v2 }
 0x371   : > { %v8053_v45 = vpop.f32.mrb[16].mxu0 }
 0x372   : > { %v3383_v47 = vadd.f32 %v3382_v31, %v3381_v30  ;;  %v3222_v63 = vpop.f32.mrb[17].mxu0  ;;  %v10134_v57 = vadd.f32 %v8053_v45, %v10048_v17 }
 0x373   : > { %v10131_v42 = vadd.f32 %v10048_v17, %v3222_v63  ;;  %v8054_v39 = vpop.f32.mrb[18].mxu0 }
 0x374   : > { %v3385_v41 = vadd.f32 %v3384_v28, %v3383_v47  ;;  %v3225_v25 = vpop.f32.mrb[19].mxu0  ;;  %v10142_v1 = vadd.f32 %v8054_v39, %v10048_v17  ;;  %v3390_v46 = vsel %vm452_vm0, %v10134_v57, 0.0 }
 0x375   : > { %v3386_v24 = vsel %vm452_vm0, %v10131_v42, 0.0  ;;  %v10139_v51 = vadd.f32 %v10048_v17, %v3225_v25 }
 0x376   : > { %v3387_v48 = vadd.f32 %v3386_v24, %v3385_v41  ;;  %v3392_v32 = vsel %vm452_vm0, %v10142_v1, 0.0 }
 0x377   : > { %v3388_v50 = vsel %vm452_vm0, %v10139_v51, 0.0 }
 0x378   : > { %v3389_v7 = vadd.f32 %v3388_v50, %v3387_v48 }
 0x379   : > { %v8057_v35 = vpop.f32.mrb[20].mxu0 }
 0x37a   : > { %v3391_v56 = vadd.f32 %v3390_v46, %v3389_v7  ;;  %v3238_v59 = vpop.f32.mrb[21].mxu0  ;;  %v10154_v43 = vadd.f32 %v8057_v35, %v10048_v17 }
 0x37b   : > { %v10151_v16 = vadd.f32 %v10048_v17, %v3238_v59  ;;  %v8058_v49 = vpop.f32.mrb[22].mxu0 }
 0x37c   : > { %v3393_v54 = vadd.f32 %v3392_v32, %v3391_v56  ;;  %v3241_v61 = vpop.f32.mrb[23].mxu0  ;;  %v10162_v20 = vadd.f32 %v8058_v49, %v10048_v17  ;;  %v3398_v18 = vsel %vm452_vm0, %v10154_v43, 0.0 }
 0x37d   : > { %v3394_v37 = vsel %vm452_vm0, %v10151_v16, 0.0  ;;  %v10159_v22 = vadd.f32 %v10048_v17, %v3241_v61 }
 0x37e   : > { %v3395_v44 = vadd.f32 %v3394_v37, %v3393_v54  ;;  %v3400_v31 = vsel %vm452_vm0, %v10162_v20, 0.0 }
 0x37f   : > { %v3396_v19 = vsel %vm452_vm0, %v10159_v22, 0.0 }
 0x380   : > { %v3397_v21 = vadd.f32 %v3396_v19, %v3395_v44 }
 0x381   : > { %v8061_v2 = vpop.f32.mrb[24].mxu0 }
 0x382   : > { %v3399_v33 = vadd.f32 %v3398_v18, %v3397_v21  ;;  %v3254_v30 = vpop.f32.mrb[25].mxu0  ;;  %v10174_v39 = vadd.f32 %v8061_v2, %v10048_v17 }
 0x383   : > { %v10171_v45 = vadd.f32 %v10048_v17, %v3254_v30  ;;  %v8062_v47 = vpop.f32.mrb[26].mxu0 }
 0x384   : > { %v3401_v63 = vadd.f32 %v3400_v31, %v3399_v33  ;;  %v3257_v28 = vpop.f32.mrb[27].mxu0  ;;  %v3350_v48 = vadd.f32 %v8062_v47, %v10048_v17  ;;  %v3406_v46 = vsel %vm452_vm0, %v10174_v39, 0.0 }
 0x385   : > { %v3402_v41 = vsel %vm452_vm0, %v10171_v45, 0.0  ;;  %v3348_v25 = vadd.f32 %v10048_v17, %v3257_v28 }
 0x386   : > { %v3403_v24 = vadd.f32 %v3402_v41, %v3401_v63  ;;  %v3408_v32 = vsel %vm452_vm0, %v3350_v48, 0.0 }
 0x387   : > { %v3404_v50 = vsel %vm452_vm0, %v3348_v25, 0.0 }
 0x388   : > { %v3405_v7 = vadd.f32 %v3404_v50, %v3403_v24  ;;  %v9048_v50 = vld [vmem:[#allocation8 + $0x20] sm:$0xff]  }
 0x389   : > { %v8065_v35 = vpop.f32.mrb[28].mxu0  ;;  %8067 = vmatprep.subr.bf16.mxu1 %v9048_v50 }
 0x38a   : > { %v3407_v56 = vadd.f32 %v3406_v46, %v3405_v7  ;;  %v3270_v59 = vpop.f32.mrb[29].mxu0  ;;  %v3353_v44 = vadd.f32 %v8065_v35, %v10048_v17  ;;  %8068 = vmatpush3.bf16.msra.mxu1 %v9048_v50  ;;  %v9049_v35 = vld [vmem:[#allocation8 + $0x28] sm:$0xff]  }
 0x38b   : > { %v3351_v49 = vadd.f32 %v10048_v17, %v3270_v59  ;;  %v8066_v54 = vpop.f32.mrb[30].mxu0  ;;  %8069 = vmatprep.subr.bf16.mxu1 %v9049_v35 }
 0x38c   : > { %v3409_v61 = vadd.f32 %v3408_v32, %v3407_v56  ;;  %v3273_v37 = vpop.f32.mrb[31].mxu0  ;;  %v3354_v2 = vadd.f32 %v8066_v54, %v10048_v17  ;;  %v3414_v31 = vsel %vm452_vm0, %v3353_v44, 0.0  ;;  %v9051_v32 = vld [vmem:[#allocation8 + $0x38] sm:$0xff]  }
 0x38d   : > { %v3410_v19 = vsel %vm452_vm0, %v3351_v49, 0.0  ;;  %v3352_v21 = vadd.f32 %v10048_v17, %v3273_v37  ;;  %v9050_v17 = vld [vmem:[#allocation8 + $0x30] sm:$0xff]  }
 0x38e   : > { %v3411_v18 = vadd.f32 %v3410_v19, %v3409_v61  ;;  %v3416_v63 = vsel %vm452_vm0, %v3354_v2, 0.0  ;;  %8070 = vmatpush3.bf16.msra.mxu1 %v9049_v35  ;;  %v10192_v61 = vld [vmem:[#allocation8] sm:$0xff]  }
 0x38f   : > { %v3412_v33 = vsel %vm452_vm0, %v3352_v21, 0.0  ;;  %8071 = vmatprep.subr.bf16.mxu1 %v9050_v17 }
 0x390   : > { %v3413_v30 = vadd.f32 %v3412_v33, %v3411_v18 }
 0x392   : > { %v3415_v47 = vadd.f32 %v3414_v31, %v3413_v30  ;;  %8072 = vmatpush3.bf16.msra.mxu1 %v9050_v17 }
 0x393   : > { %8073 = vmatprep.subr.bf16.mxu1 %v9051_v32 }
 0x394   : > { %v3417_v28 = vadd.f32 %v3416_v63, %v3415_v47 }
 0x396   : > { %v3418_v41 = vrot.slane %v3417_v28, 4  ;;  %8074 = vmatpush3.bf16.msra.mxu1 %v9051_v32 }
 0x397   : > { %8107 = vmatprep.subr.bf16.mxu1 %v10192_v61 }
 0x398   : > { %v3419_v24 = vadd.f32 %v3418_v41, %v3417_v28 }
 0x39a   : > { %v3420_v7 = vrot.slane %v3419_v24, 2 }
 0x39c   : > { %v3421_v46 = vadd.f32 %v3420_v7, %v3419_v24 }
 0x39e   : > { %v3422_v56 = vrot.slane %v3421_v46, 1 }
 0x3a0   : > { %v3423_v59 = vadd.f32 %v3422_v56, %v3421_v46 }
 0x3a2   : > { %v3425_v54 = vmul.f32 0.00390625, %v3423_v59 }
 0x3a4   : > { %v10195_v37 = vsub.f32 %v10099_v36, %v3425_v54  ;;  %v10198_v19 = vsub.f32 %v10102_v38, %v3425_v54  ;;  %v10201_v18 = vsub.f32 %v10111_v34, %v3425_v54  ;;  %v10204_v33 = vsub.f32 %v10119_v53, %v3425_v54 }
 0x3a5   : > { %v10207_v30 = vsub.f32 %v10114_v15, %v3425_v54  ;;  %v10210_v31 = vsub.f32 %v10122_v0, %v3425_v54  ;;  %v10213_v47 = vsub.f32 %v10131_v42, %v3425_v54  ;;  %v10216_v36 = vsub.f32 %v10139_v51, %v3425_v54 }
 0x3a6   : > { %v10219_v38 = vsub.f32 %v10134_v57, %v3425_v54  ;;  %v10222_v34 = vsub.f32 %v10142_v1, %v3425_v54  ;;  %v10226_v15 = vsub.f32 %v10151_v16, %v3425_v54  ;;  %v10229_v53 = vsub.f32 %v10159_v22, %v3425_v54 }
 0x3a7   : > { %v10232_v0 = vsub.f32 %v10154_v43, %v3425_v54  ;;  %v10235_v42 = vsub.f32 %v10162_v20, %v3425_v54  ;;  %v10238_v57 = vsub.f32 %v10171_v45, %v3425_v54  ;;  %v10240_v51 = vsub.f32 %v3348_v25, %v3425_v54 }
 0x3a8   : > { %v10243_v1 = vsub.f32 %v10174_v39, %v3425_v54  ;;  %v10245_v63 = vsub.f32 %v3350_v48, %v3425_v54  ;;  %v10247_v16 = vsub.f32 %v3351_v49, %v3425_v54  ;;  %v10249_v22 = vsub.f32 %v3352_v21, %v3425_v54 }
 0x3a9   : > { %v10251_v28 = vsub.f32 %v3353_v44, %v3425_v54  ;;  %v10253_v43 = vsub.f32 %v3354_v2, %v3425_v54  ;;  %v10256_v20 = vsub.f32 %v10051_v14, %v3425_v54  ;;  %v10259_v45 = vsub.f32 %v10057_v55, %v3425_v54 }
 0x3aa   : > { %v10262_v25 = vsub.f32 %v10054_v40, %v3425_v54  ;;  %v10265_v39 = vsub.f32 %v10062_v23, %v3425_v54  ;;  %v10272_v44 = vsub.f32 %v10071_v29, %v3425_v54  ;;  %v10277_v55 = vsub.f32 %v10079_v26, %v3425_v54 }
 0x3ab   : > { %v3458_v48 = vmul.f32 %v10256_v20, %v10256_v20  ;;  %v3459_v49 = vmul.f32 %v10259_v45, %v10259_v45  ;;  %v10284_v41 = vsub.f32 %v10074_v58, %v3425_v54  ;;  %v10290_v26 = vsub.f32 %v10082_v62, %v3425_v54 }
 0x3ac   : > { %v3460_v14 = vmul.f32 %v10262_v25, %v10262_v25  ;;  %v3461_v40 = vmul.f32 %v10265_v39, %v10265_v39  ;;  %v3462_v29 = vmul.f32 %v10272_v44, %v10272_v44  ;;  %v3463_v7 = vmul.f32 %v10277_v55, %v10277_v55 }
 0x3ad   : > { %v3490_v23 = vsel %vm452_vm0, %v3458_v48, 0.0  ;;  %v3491_v21 = vsel %vm452_vm0, %v3459_v49, 0.0  ;;  %v10296_v56 = vsub.f32 %v10091_v60, %v3425_v54  ;;  %v3464_v58 = vmul.f32 %v10284_v41, %v10284_v41 }
 0x3ae   : > { %v3492_v2 = vadd.f32 %v3491_v21, %v3490_v23  ;;  %v3493_v24 = vsel %vm452_vm0, %v3460_v14, 0.0  ;;  %v3495_v46 = vsel %vm452_vm0, %v3461_v40, 0.0  ;;  %v3497_v17 = vsel %vm452_vm0, %v3462_v29, 0.0 }
 0x3af   : > { %v3465_v32 = vmul.f32 %v10290_v26, %v10290_v26  ;;  %v3499_v62 = vsel %vm452_vm0, %v3463_v7, 0.0  ;;  %v10305_v49 = vsub.f32 %v10094_v27, %v3425_v54  ;;  %v3466_v14 = vmul.f32 %v10296_v56, %v10296_v56 }
 0x3b0   : > { %v3494_v50 = vadd.f32 %v3493_v24, %v3492_v2  ;;  %v3501_v60 = vsel %vm452_vm0, %v3464_v58, 0.0  ;;  %v3467_v23 = vmul.f32 %v10195_v37, %v10195_v37  ;;  %v3469_v27 = vmul.f32 %v10198_v19, %v10198_v19 }
 0x3b1   : > { %v3503_v21 = vsel %vm452_vm0, %v3465_v32, 0.0  ;;  %v3468_v29 = vmul.f32 %v10305_v49, %v10305_v49  ;;  %v3505_v24 = vsel %vm452_vm0, %v3466_v14, 0.0 }
 0x3b2   : > { %v3496_v35 = vadd.f32 %v3495_v46, %v3494_v50  ;;  %v3507_v54 = vsel %vm452_vm0, %v3467_v23, 0.0  ;;  %v3470_v46 = vmul.f32 %v10201_v18, %v10201_v18 }
 0x3b4   : > { %v3498_v59 = vadd.f32 %v3497_v17, %v3496_v35  ;;  %v3509_v35 = vsel %vm452_vm0, %v3468_v29, 0.0  ;;  %v3471_v17 = vmul.f32 %v10204_v33, %v10204_v33 }
 0x3b6   : > { %v3500_v48 = vadd.f32 %v3499_v62, %v3498_v59  ;;  %v3511_v59 = vsel %vm452_vm0, %v3469_v27, 0.0  ;;  %v3472_v62 = vmul.f32 %v10207_v30, %v10207_v30 }
 0x3b8   : > { %v3502_v40 = vadd.f32 %v3501_v60, %v3500_v48  ;;  %v3513_v48 = vsel %vm452_vm0, %v3470_v46, 0.0  ;;  %v3473_v60 = vmul.f32 %v10210_v31, %v10210_v31 }
 0x3ba   : > { %v3504_v2 = vadd.f32 %v3503_v21, %v3502_v40  ;;  %v3515_v40 = vsel %vm452_vm0, %v3471_v17, 0.0  ;;  %v3474_v21 = vmul.f32 %v10213_v47, %v10213_v47 }
 0x3bc   : > { %v3506_v50 = vadd.f32 %v3505_v24, %v3504_v2  ;;  %v3517_v2 = vsel %vm452_vm0, %v3472_v62, 0.0  ;;  %v3475_v24 = vmul.f32 %v10216_v36, %v10216_v36 }
 0x3be   : > { %v3508_v7 = vadd.f32 %v3507_v54, %v3506_v50  ;;  %v3519_v50 = vsel %vm452_vm0, %v3473_v60, 0.0  ;;  %v3476_v54 = vmul.f32 %v10219_v38, %v10219_v38 }
 0x3c0   : > { %v3510_v58 = vadd.f32 %v3509_v35, %v3508_v7  ;;  %v3521_v7 = vsel %vm452_vm0, %v3474_v21, 0.0  ;;  %v3477_v35 = vmul.f32 %v10222_v34, %v10222_v34 }
 0x3c2   : > { %v3512_v32 = vadd.f32 %v3511_v59, %v3510_v58  ;;  %v3523_v58 = vsel %vm452_vm0, %v3475_v24, 0.0  ;;  %v3478_v59 = vmul.f32 %v10226_v15, %v10226_v15 }
 0x3c4   : > { %v3514_v14 = vadd.f32 %v3513_v48, %v3512_v32  ;;  %v3525_v32 = vsel %vm452_vm0, %v3476_v54, 0.0  ;;  %v3479_v48 = vmul.f32 %v10229_v53, %v10229_v53 }
 0x3c6   : > { %v3516_v23 = vadd.f32 %v3515_v40, %v3514_v14  ;;  %v3527_v14 = vsel %vm452_vm0, %v3477_v35, 0.0  ;;  %v3480_v40 = vmul.f32 %v10232_v0, %v10232_v0 }
 0x3c8   : > { %v3518_v29 = vadd.f32 %v3517_v2, %v3516_v23  ;;  %v3529_v23 = vsel %vm452_vm0, %v3478_v59, 0.0  ;;  %v3481_v2 = vmul.f32 %v10235_v42, %v10235_v42 }
 0x3ca   : > { %v3520_v27 = vadd.f32 %v3519_v50, %v3518_v29  ;;  %v3531_v29 = vsel %vm452_vm0, %v3479_v48, 0.0  ;;  %v3482_v50 = vmul.f32 %v10238_v57, %v10238_v57 }
 0x3cc   : > { %v3522_v46 = vadd.f32 %v3521_v7, %v3520_v27  ;;  %v3533_v27 = vsel %vm452_vm0, %v3480_v40, 0.0  ;;  %v3483_v7 = vmul.f32 %v10240_v51, %v10240_v51 }
 0x3ce   : > { %v3524_v17 = vadd.f32 %v3523_v58, %v3522_v46  ;;  %v3535_v46 = vsel %vm452_vm0, %v3481_v2, 0.0  ;;  %v3484_v58 = vmul.f32 %v10243_v1, %v10243_v1 }
 0x3d0   : > { %v3526_v62 = vadd.f32 %v3525_v32, %v3524_v17  ;;  %v3537_v17 = vsel %vm452_vm0, %v3482_v50, 0.0  ;;  %v3485_v32 = vmul.f32 %v10245_v63, %v10245_v63 }
 0x3d2   : > { %v3528_v60 = vadd.f32 %v3527_v14, %v3526_v62  ;;  %v3539_v62 = vsel %vm452_vm0, %v3483_v7, 0.0  ;;  %v3486_v14 = vmul.f32 %v10247_v16, %v10247_v16 }
 0x3d4   : > { %v3530_v21 = vadd.f32 %v3529_v23, %v3528_v60  ;;  %v3541_v60 = vsel %vm452_vm0, %v3484_v58, 0.0  ;;  %v3487_v23 = vmul.f32 %v10249_v22, %v10249_v22 }
 0x3d6   : > { %v3532_v24 = vadd.f32 %v3531_v29, %v3530_v21  ;;  %v3543_v21 = vsel %vm452_vm0, %v3485_v32, 0.0  ;;  %v3488_v29 = vmul.f32 %v10251_v28, %v10251_v28 }
 0x3d8   : > { %v3534_v54 = vadd.f32 %v3533_v27, %v3532_v24  ;;  %v3545_v24 = vsel %vm452_vm0, %v3486_v14, 0.0  ;;  %v3489_v27 = vmul.f32 %v10253_v43, %v10253_v43 }
 0x3da   : > { %v3536_v35 = vadd.f32 %v3535_v46, %v3534_v54  ;;  %v3547_v54 = vsel %vm452_vm0, %v3487_v23, 0.0  ;;  %v3549_v46 = vsel %vm452_vm0, %v3488_v29, 0.0  ;;  %v3551_v58 = vsel %vm452_vm0, %v3489_v27, 0.0 }
 0x3dc   : > { %v3538_v59 = vadd.f32 %v3537_v17, %v3536_v35 }
 0x3de   : > { %v3540_v48 = vadd.f32 %v3539_v62, %v3538_v59 }
 0x3e0   : > { %v3542_v40 = vadd.f32 %v3541_v60, %v3540_v48 }
 0x3e2   : > { %v3544_v2 = vadd.f32 %v3543_v21, %v3542_v40 }
 0x3e4   : > { %v3546_v50 = vadd.f32 %v3545_v24, %v3544_v2 }
 0x3e6   : > { %v3548_v7 = vadd.f32 %v3547_v54, %v3546_v50 }
 0x3e8   : > { %v3550_v35 = vadd.f32 %v3549_v46, %v3548_v7 }
 0x3ea   : > { %v3552_v17 = vadd.f32 %v3551_v58, %v3550_v35 }
 0x3ec   : > { %v3553_v59 = vrot.slane %v3552_v17, 4 }
 0x3ee   : > { %v3554_v32 = vadd.f32 %v3553_v59, %v3552_v17 }
 0x3f0   : > { %v3555_v62 = vrot.slane %v3554_v32, 2 }
 0x3f2   : > { %v3556_v48 = vadd.f32 %v3555_v62, %v3554_v32 }
 0x3f4   : > { %v3557_v60 = vrot.slane %v3556_v48, 1 }
 0x3f6   : > { %v3558_v40 = vadd.f32 %v3557_v60, %v3556_v48 }
 0x3f8   : > { %v3559_v14 = vmul.f32 0.00390625, %v3558_v40 }
 0x3fa   : > { %v3560_v21 = vadd.f32 1e-05, %v3559_v14 }
 0x3fc   : > { %9084 = vrsqrt.f32 %v3560_v21 }
 0x406   : > { %v9085_v2 = vpop.eup %9084 }
 0x407   : > { %v3591_v24 = vmul.f32 %v9085_v2, %v10249_v22  ;;  %v3562_v23 = vmul.f32 %v9085_v2, %v10256_v20  ;;  %v3563_v29 = vmul.f32 %v9085_v2, %v10259_v45  ;;  %v3564_v50 = vmul.f32 %v9085_v2, %v10262_v25 }
 0x408   : > { %v3565_v27 = vmul.f32 %v9085_v2, %v10265_v39  ;;  %v3566_v54 = vmul.f32 %v9085_v2, %v10272_v44  ;;  %v3567_v7 = vmul.f32 %v9085_v2, %v10277_v55  ;;  %v3568_v46 = vmul.f32 %v9085_v2, %v10284_v41 }
 0x409   : > { %v3623_v35 = vmax.f32 %v3591_v24, 0.0  ;;  %v3569_v58 = vmul.f32 %v9085_v2, %v10290_v26  ;;  %v3570_v17 = vmul.f32 %v9085_v2, %v10296_v56  ;;  %v3571_v22 = vmul.f32 %v9085_v2, %v10195_v37 }
 0x40a   : > { %v3572_v20 = vmul.f32 %v9085_v2, %v10305_v49  ;;  %v3573_v45 = vmul.f32 %v9085_v2, %v10198_v19  ;;  %v3574_v25 = vmul.f32 %v9085_v2, %v10201_v18  ;;  %v3575_v39 = vmul.f32 %v9085_v2, %v10204_v33 }
 0x40b   : > { %v3576_v44 = vmul.f32 %v9085_v2, %v10207_v30  ;;  %v10398_v55 = vmul.f32 %v9085_v2, %v10210_v31  ;;  %v10401_v41 = vmul.f32 %v9085_v2, %v10213_v47  ;;  %v10404_v26 = vmul.f32 %v9085_v2, %v10216_v36  ;;  %3655 = vst.msk [vmem:[#allocation2 + $0x171] sm:$0xff] %vm452_vm0, %v3623_v35 }
 0x40c   : > { %3661 = vst.msk [vmem:[#allocation2 + $0x1a1] sm:$0xff] %vm452_vm0, %v3623_v35  ;;  %v10409_v37 = vmul.f32 %v9085_v2, %v10219_v38  ;;  %v10412_v19 = vmul.f32 %v9085_v2, %v10222_v34  ;;  %v10415_v18 = vmul.f32 %v9085_v2, %v10226_v15  ;;  %v10418_v33 = vmul.f32 %v9085_v2, %v10229_v53 }
 0x40d   : > { %v10421_v30 = vmul.f32 %v9085_v2, %v10232_v0  ;;  %v10424_v31 = vmul.f32 %v9085_v2, %v10235_v42  ;;  %v10427_v47 = vmul.f32 %v9085_v2, %v10238_v57  ;;  %v10430_v36 = vmul.f32 %v9085_v2, %v10240_v51 }
 0x40e   : > { %v10433_v38 = vmul.f32 %v9085_v2, %v10243_v1  ;;  %v10436_v34 = vmul.f32 %v9085_v2, %v10245_v63  ;;  %v10439_v15 = vmul.f32 %v9085_v2, %v10247_v16  ;;  %v10442_v53 = vmul.f32 %v9085_v2, %v10251_v28 }
 0x40f   : > { %v10445_v0 = vmul.f32 %v9085_v2, %v10253_v43  ;;  %v3594_v42 = vmax.f32 %v3562_v23, 0.0  ;;  %v3595_v57 = vmax.f32 %v3563_v29, 0.0  ;;  %v3596_v56 = vmax.f32 %v3564_v50, 0.0 }
 0x410   : > { %v3597_v51 = vmax.f32 %v3565_v27, 0.0  ;;  %v3598_v49 = vmax.f32 %v3566_v54, 0.0  ;;  %v3599_v59 = vmax.f32 %v3567_v7, 0.0  ;;  %v3600_v1 = vmax.f32 %v3568_v46, 0.0 }
 0x411   : > { %v3601_v32 = vmax.f32 %v3569_v58, 0.0  ;;  %v3602_v62 = vmax.f32 %v3570_v17, 0.0  ;;  %v3603_v63 = vmax.f32 %v3571_v22, 0.0  ;;  %v3604_v48 = vmax.f32 %v3572_v20, 0.0  ;;  %3626 = vst.msk [vmem:[#allocation2 + $0x19] sm:$0xff] %vm452_vm0, %v3594_v42  ;;  %3627 = vst.msk [vmem:[#allocation2 + $0x21] sm:$0xff] %vm452_vm0, %v3595_v57 }
 0x412   : > { %3628 = vst.msk [vmem:[#allocation2 + $0x31] sm:$0xff] %vm452_vm0, %v3596_v56  ;;  %3658 = vst.msk [vmem:[#allocation2 + $0x1] sm:$0xff] %vm452_vm0, %v3596_v56  ;;  %v3605_v16 = vmax.f32 %v3573_v45, 0.0  ;;  %v3606_v28 = vmax.f32 %v3574_v25, 0.0  ;;  %v3607_v43 = vmax.f32 %v3575_v39, 0.0  ;;  %v3608_v60 = vmax.f32 %v3576_v44, 0.0 }
 0x413   : > { %3629 = vst.msk [vmem:[#allocation2 + $0x39] sm:$0xff] %vm452_vm0, %v3597_v51  ;;  %3630 = vst.msk [vmem:[#allocation2 + $0x49] sm:$0xff] %vm452_vm0, %v3598_v49  ;;  %v3609_v40 = vmax.f32 %v10398_v55, 0.0  ;;  %v3610_v14 = vmax.f32 %v10401_v41, 0.0  ;;  %v3611_v21 = vmax.f32 %v10404_v26, 0.0  ;;  %v3612_v2 = vmax.f32 %v10409_v37, 0.0 }
 0x414   : > { %3631 = vst.msk [vmem:[#allocation2 + $0x51] sm:$0xff] %vm452_vm0, %v3599_v59  ;;  %3632 = vst.msk [vmem:[#allocation2 + $0x61] sm:$0xff] %vm452_vm0, %v3600_v1  ;;  %v3713_v24 = vld [vmem:[#allocation2 + $0x177] sm:$0x1]  ;;  %v3613_v23 = vmax.f32 %v10412_v19, 0.0  ;;  %v3614_v29 = vmax.f32 %v10415_v18, 0.0 }
 0x415   : > { %3659 = vst.msk [vmem:[#allocation2 + $0x9] sm:$0xff] %vm452_vm0, %v3597_v51  ;;  %3633 = vst.msk [vmem:[#allocation2 + $0x69] sm:$0xff] %vm452_vm0, %v3601_v32  ;;  %v3615_v50 = vmax.f32 %v10418_v33, 0.0  ;;  %v3616_v27 = vmax.f32 %v10421_v30, 0.0  ;;  %v3617_v54 = vmax.f32 %v10424_v31, 0.0  ;;  %v3618_v7 = vmax.f32 %v10427_v47, 0.0 }
 0x416   : > { %3634 = vst.msk [vmem:[#allocation2 + $0x79] sm:$0xff] %vm452_vm0, %v3602_v62  ;;  %3635 = vst.msk [vmem:[#allocation2 + $0x81] sm:$0xff] %vm452_vm0, %v3603_v63  ;;  %v3619_v46 = vmax.f32 %v10430_v36, 0.0  ;;  %v3620_v35 = vmax.f32 %v10433_v38, 0.0  ;;  %v3715_v58 = vld [vmem:[#allocation2 + $0x1a7] sm:$0x1] }
 0x417   : > { %3636 = vst.msk [vmem:[#allocation2 + $0x91] sm:$0xff] %vm452_vm0, %v3604_v48  ;;  %3637 = vst.msk [vmem:[#allocation2 + $0x99] sm:$0xff] %vm452_vm0, %v3605_v16  ;;  %v3621_v17 = vmax.f32 %v10436_v34, 0.0  ;;  %v3622_v22 = vmax.f32 %v10439_v15, 0.0  ;;  %v3624_v20 = vmax.f32 %v10442_v53, 0.0  ;;  %v3625_v45 = vmax.f32 %v10445_v0, 0.0 }
 0x418   : > { %3638 = vst.msk [vmem:[#allocation2 + $0xa9] sm:$0xff] %vm452_vm0, %v3606_v28  ;;  %3639 = vst.msk [vmem:[#allocation2 + $0xb1] sm:$0xff] %vm452_vm0, %v3607_v43  ;;  %v3784_v39 = vld [vmem:[#allocation2 + $0x19] sm:$0xff]  ;;  %v3785_v44 = vld [vmem:[#allocation2 + $0x21] sm:$0xff] }
 0x419   : > { %3640 = vst.msk [vmem:[#allocation2 + $0xc1] sm:$0xff] %vm452_vm0, %v3608_v60  ;;  %3641 = vst.msk [vmem:[#allocation2 + $0xc9] sm:$0xff] %vm452_vm0, %v3609_v40  ;;  %v3782_v25 = vld [vmem:[#allocation2 + $0x1] sm:$0xff]  ;;  %v10499_v41 = vpack.c.bf16 %v3785_v44, %v3784_v39  ;;  %v3786_v26 = vld [vmem:[#allocation2 + $0x31] sm:$0xff] }
 0x41a   : > { %3731 = vst.msk [vmem:[#allocation2 + $0x179] sm:$0x1] %vm508_vm1, %v3713_v24  ;;  %3733 = vst.msk [vmem:[#allocation2 + $0x1a9] sm:$0x1] %vm508_vm1, %v3715_v58  ;;  %v3787_v37 = vld [vmem:[#allocation2 + $0x39] sm:$0xff]  ;;  %v3788_v31 = vld [vmem:[#allocation2 + $0x49] sm:$0xff] }
 0x41b   : > { %3642 = vst.msk [vmem:[#allocation2 + $0xd9] sm:$0xff] %vm452_vm0, %v3610_v14  ;;  %3643 = vst.msk [vmem:[#allocation2 + $0xe1] sm:$0xff] %vm452_vm0, %v3611_v21  ;;  %v9053_v18 = vld [vmem:[#allocation8 + $0x8] sm:$0xff]   ;;  %v10502_v33 = vpack.c.bf16 %v3787_v37, %v3786_v26  ;;  %v9054_v30 = vld [vmem:[#allocation8 + $0x10] sm:$0xff]  }
 0x41c   : > { %3644 = vst.msk [vmem:[#allocation2 + $0xf1] sm:$0xff] %vm452_vm0, %v3612_v2  ;;  %3645 = vst.msk [vmem:[#allocation2 + $0xf9] sm:$0xff] %vm452_vm0, %v3613_v23  ;;  %v3783_v55 = vld [vmem:[#allocation2 + $0x9] sm:$0xff]  ;;  %v3789_v47 = vld [vmem:[#allocation2 + $0x51] sm:$0xff] }
 0x41d   : > { %3646 = vst.msk [vmem:[#allocation2 + $0x109] sm:$0xff] %vm452_vm0, %v3614_v29  ;;  %3647 = vst.msk [vmem:[#allocation2 + $0x111] sm:$0xff] %vm452_vm0, %v3615_v50  ;;  %v3814_v19 = vpack.c.bf16 %v3783_v55, %v3782_v25  ;;  %v3790_v36 = vld [vmem:[#allocation2 + $0x61] sm:$0xff]  ;;  %v3791_v38 = vld [vmem:[#allocation2 + $0x69] sm:$0xff]  ;;  %v10509_v15 = vpack.c.bf16 %v3789_v47, %v3788_v31 }
 0x41e   : > { %3648 = vst.msk [vmem:[#allocation2 + $0x121] sm:$0xff] %vm452_vm0, %v3616_v27  ;;  %3649 = vst.msk [vmem:[#allocation2 + $0x129] sm:$0xff] %vm452_vm0, %v3617_v54  ;;  %v3662_v34 = vld [vmem:[#allocation2 + $0x2] sm:$0x1]  ;;  %v9055_v53 = vld [vmem:[#allocation8 + $0x18] sm:$0xff]   ;;  %v10512_v57 = vpack.c.bf16 %v3791_v38, %v3790_v36 }
 0x41f   : > { %3650 = vst.msk [vmem:[#allocation2 + $0x139] sm:$0xff] %vm452_vm0, %v3618_v7  ;;  %3651 = vst.msk [vmem:[#allocation2 + $0x141] sm:$0xff] %vm452_vm0, %v3619_v46  ;;  %8075 = vmatprep.mubr.msk.bf16.mxu1 %vm452_vm0, %v3814_v19  ;;  %v3663_v0 = vld [vmem:[#allocation2 + $0x1a] sm:$0x1]  ;;  %v3664_v42 = vld [vmem:[#allocation2 + $0x32] sm:$0x1] }
 0x420   : > { %3652 = vst.msk [vmem:[#allocation2 + $0x151] sm:$0xff] %vm452_vm0, %v3620_v35  ;;  %3653 = vst.msk [vmem:[#allocation2 + $0x159] sm:$0xff] %vm452_vm0, %v3621_v17  ;;  %8076 = vmatmul.mubr.msk.bf16.vlgmr.msra.gmra.mrb[0].mxu1 %vm452_vm0, %v10499_v41  ;;  %v3666_v56 = vld [vmem:[#allocation2 + $0x62] sm:$0x1]  ;;  %v3667_v51 = vld [vmem:[#allocation2 + $0x7a] sm:$0x1] }
 0x421   : > { %3654 = vst.msk [vmem:[#allocation2 + $0x169] sm:$0xff] %vm452_vm0, %v3622_v22  ;;  %3656 = vst.msk [vmem:[#allocation2 + $0x181] sm:$0xff] %vm452_vm0, %v3624_v20  ;;  %8079 = vmatprep.mubr.msk.bf16.mxu1 %vm452_vm0, %v10502_v33  ;;  %8108 = vmatpush3.bf16.msra.mxu1 %v10192_v61  ;;  %v3665_v61 = vld [vmem:[#allocation2 + $0x4a] sm:$0x1]  ;;  %v10521_v49 = vld [vmem:[#allocation8 + $0x40] sm:$0xff]  }
 0x422   : > { %3657 = vst.msk [vmem:[#allocation2 + $0x189] sm:$0xff] %vm452_vm0, %v3625_v45  ;;  %3660 = vst.msk [vmem:[#allocation2 + $0x199] sm:$0xff] %vm452_vm0, %v3622_v22  ;;  %8109 = vmatprep.subr.bf16.mxu1 %v9053_v18  ;;  %v3668_v59 = vld [vmem:[#allocation2 + $0x92] sm:$0x1]  ;;  %v3792_v1 = vld [vmem:[#allocation2 + $0x79] sm:$0xff] }
 0x423   : > { %3680 = vst.msk [vmem:[#allocation2] sm:$0x1] %vm508_vm1, %v3662_v34  ;;  %3681 = vst.msk [vmem:[#allocation2 + $0x18] sm:$0x1] %vm508_vm1, %v3663_v0  ;;  %v3669_v32 = vld [vmem:[#allocation2 + $0xaa] sm:$0x1] }
 0x424   : > { %3682 = vst.msk [vmem:[#allocation2 + $0x30] sm:$0x1] %vm508_vm1, %v3664_v42  ;;  %3683 = vst.msk [vmem:[#allocation2 + $0x48] sm:$0x1] %vm508_vm1, %v3665_v61  ;;  %v3670_v62 = vld [vmem:[#allocation2 + $0xc2] sm:$0x1] }
 0x425   : > { %8110 = vmatpush3.bf16.msra.mxu1 %v9053_v18  ;;  %3684 = vst.msk [vmem:[#allocation2 + $0x60] sm:$0x1] %vm508_vm1, %v3666_v56  ;;  %3685 = vst.msk [vmem:[#allocation2 + $0x78] sm:$0x1] %vm508_vm1, %v3667_v51  ;;  %v3793_v63 = vld [vmem:[#allocation2 + $0x81] sm:$0xff]  ;;  %v3794_v48 = vld [vmem:[#allocation2 + $0x91] sm:$0xff] }
 0x426   : > { %8111 = vmatprep.subr.bf16.mxu1 %v9054_v30  ;;  %3686 = vst.msk [vmem:[#allocation2 + $0x90] sm:$0x1] %vm508_vm1, %v3668_v59  ;;  %3687 = vst.msk [vmem:[#allocation2 + $0xa8] sm:$0x1] %vm508_vm1, %v3669_v32  ;;  %v3671_v16 = vld [vmem:[#allocation2 + $0xda] sm:$0x1]  ;;  %v10531_v14 = vpack.c.bf16 %v3793_v63, %v3792_v1 }
 0x427   : > { %3688 = vst.msk [vmem:[#allocation2 + $0xc0] sm:$0x1] %vm508_vm1, %v3670_v62  ;;  %v3795_v28 = vld [vmem:[#allocation2 + $0x99] sm:$0xff]  ;;  %3689 = vst.msk [vmem:[#allocation2 + $0xd8] sm:$0x1] %vm508_vm1, %v3671_v16  ;;  %v3796_v29 = vld [vmem:[#allocation2 + $0xa9] sm:$0xff] }
 0x428   : > { %8080 = vmatmul.mubr.msk.bf16.gmra.mrb[4].mxu1 %vm452_vm0, %v10509_v15  ;;  %v3672_v43 = vld [vmem:[#allocation2 + $0xf2] sm:$0x1]  ;;  %v3673_v60 = vld [vmem:[#allocation2 + $0x10a] sm:$0x1]  ;;  %v3674_v40 = vld [vmem:[#allocation2 + $0x122] sm:$0x1]  ;;  %v10535_v21 = vpack.c.bf16 %v3795_v28, %v3794_v48 }
 0x429   : > { %8083 = vmatprep.mubr.msk.bf16.mxu1 %vm452_vm0, %v10512_v57  ;;  %8112 = vmatpush3.bf16.msra.mxu1 %v9054_v30  ;;  %3690 = vst.msk [vmem:[#allocation2 + $0xf0] sm:$0x1] %vm508_vm1, %v3672_v43  ;;  %3691 = vst.msk [vmem:[#allocation2 + $0x108] sm:$0x1] %vm508_vm1, %v3673_v60  ;;  %v3675_v2 = vld [vmem:[#allocation2 + $0x13a] sm:$0x1] }
 0x42a   : > { %8113 = vmatprep.subr.bf16.mxu1 %v9055_v53  ;;  %3692 = vst.msk [vmem:[#allocation2 + $0x120] sm:$0x1] %vm508_vm1, %v3674_v40  ;;  %3693 = vst.msk [vmem:[#allocation2 + $0x138] sm:$0x1] %vm508_vm1, %v3675_v2  ;;  %v3676_v24 = vld [vmem:[#allocation2 + $0x152] sm:$0x1] }
 0x42b   : > { %3694 = vst.msk [vmem:[#allocation2 + $0x150] sm:$0x1] %vm508_vm1, %v3676_v24  ;;  %v3677_v23 = vld [vmem:[#allocation2 + $0x16a] sm:$0x1]  ;;  %v3797_v50 = vld [vmem:[#allocation2 + $0xb1] sm:$0xff]  ;;  %v3798_v54 = vld [vmem:[#allocation2 + $0xc1] sm:$0xff] }
 0x42c   : > { %3695 = vst.msk [vmem:[#allocation2 + $0x168] sm:$0x1] %vm508_vm1, %v3677_v23  ;;  %v3698_v27 = vld [vmem:[#allocation2 + $0xf] sm:$0x1]  ;;  %v3699_v46 = vld [vmem:[#allocation2 + $0x27] sm:$0x1]  ;;  %v10546_v35 = vpack.c.bf16 %v3797_v50, %v3796_v29 }
 0x42d   : > { %8114 = vmatpush3.bf16.msra.mxu1 %v9055_v53  ;;  %v3799_v7 = vld [vmem:[#allocation2 + $0xc9] sm:$0xff]  ;;  %3716 = vst.msk [vmem:[#allocation2 + $0x11] sm:$0x1] %vm508_vm1, %v3698_v27  ;;  %3717 = vst.msk [vmem:[#allocation2 + $0x29] sm:$0x1] %vm508_vm1, %v3699_v46  ;;  %v3800_v44 = vld [vmem:[#allocation2 + $0xd9] sm:$0xff] }
 0x42e   : > { %8147 = vmatprep.subr.bf16.mxu1 %v10521_v49  ;;  %v3700_v58 = vld [vmem:[#allocation2 + $0x3f] sm:$0x1]  ;;  %v3701_v17 = vld [vmem:[#allocation2 + $0x57] sm:$0x1]  ;;  %v10548_v22 = vpack.c.bf16 %v3799_v7, %v3798_v54  ;;  %v3702_v20 = vld [vmem:[#allocation2 + $0x6f] sm:$0x1] }
 0x42f   : > { %3718 = vst.msk [vmem:[#allocation2 + $0x41] sm:$0x1] %vm508_vm1, %v3700_v58  ;;  %3719 = vst.msk [vmem:[#allocation2 + $0x59] sm:$0x1] %vm508_vm1, %v3701_v17  ;;  %v3703_v45 = vld [vmem:[#allocation2 + $0x87] sm:$0x1] }
 0x430   : > { %8084 = vmatmul.mubr.msk.bf16.gmra.mrb[8].mxu1 %vm452_vm0, %v10531_v14  ;;  %3720 = vst.msk [vmem:[#allocation2 + $0x71] sm:$0x1] %vm508_vm1, %v3702_v20  ;;  %3721 = vst.msk [vmem:[#allocation2 + $0x89] sm:$0x1] %vm508_vm1, %v3703_v45  ;;  %v3704_v25 = vld [vmem:[#allocation2 + $0x9f] sm:$0x1] }
 0x431   : > { %8087 = vmatprep.mubr.msk.bf16.mxu1 %vm452_vm0, %v10535_v21  ;;  %v3705_v39 = vld [vmem:[#allocation2 + $0xb7] sm:$0x1]  ;;  %v3801_v55 = vld [vmem:[#allocation2 + $0xe1] sm:$0xff]  ;;  %3722 = vst.msk [vmem:[#allocation2 + $0xa1] sm:$0x1] %vm508_vm1, %v3704_v25  ;;  %v3803_v19 = vld [vmem:[#allocation2 + $0xf9] sm:$0xff] }
 0x432   : > { %3723 = vst.msk [vmem:[#allocation2 + $0xb9] sm:$0x1] %vm508_vm1, %v3705_v39  ;;  %v3706_v26 = vld [vmem:[#allocation2 + $0xcf] sm:$0x1]  ;;  %v3802_v37 = vld [vmem:[#allocation2 + $0xf1] sm:$0xff]  ;;  %v10562_v31 = vpack.c.bf16 %v3801_v55, %v3800_v44  ;;  %v3806_v61 = vld [vmem:[#allocation2 + $0x121] sm:$0xff] }
 0x433   : > { %3724 = vst.msk [vmem:[#allocation2 + $0xd1] sm:$0x1] %vm508_vm1, %v3706_v26  ;;  %v3707_v18 = vld [vmem:[#allocation2 + $0xe7] sm:$0x1]  ;;  %v3708_v30 = vld [vmem:[#allocation2 + $0xff] sm:$0x1]  ;;  %v10565_v36 = vpack.c.bf16 %v3803_v19, %v3802_v37 }
 0x434   : > { %3725 = vst.msk [vmem:[#allocation2 + $0xe9] sm:$0x1] %vm508_vm1, %v3707_v18  ;;  %3726 = vst.msk [vmem:[#allocation2 + $0x101] sm:$0x1] %vm508_vm1, %v3708_v30  ;;  %v3709_v47 = vld [vmem:[#allocation2 + $0x117] sm:$0x1] }
 0x435   : > { %3727 = vst.msk [vmem:[#allocation2 + $0x119] sm:$0x1] %vm508_vm1, %v3709_v47  ;;  %v3710_v38 = vld [vmem:[#allocation2 + $0x12f] sm:$0x1]  ;;  %v3711_v34 = vld [vmem:[#allocation2 + $0x147] sm:$0x1] }
 0x436   : > { %3728 = vst.msk [vmem:[#allocation2 + $0x131] sm:$0x1] %vm508_vm1, %v3710_v38  ;;  %v3712_v53 = vld [vmem:[#allocation2 + $0x15f] sm:$0x1]  ;;  %3729 = vst.msk [vmem:[#allocation2 + $0x149] sm:$0x1] %vm508_vm1, %v3711_v34 }
 0x437   : > { %3730 = vst.msk [vmem:[#allocation2 + $0x161] sm:$0x1] %vm508_vm1, %v3712_v53  ;;  %v3804_v0 = vld [vmem:[#allocation2 + $0x109] sm:$0xff]  ;;  %v3805_v42 = vld [vmem:[#allocation2 + $0x111] sm:$0xff]  ;;  %v3678_v51 = vld [vmem:[#allocation2 + $0x182] sm:$0x1] }
 0x438   : > { %8088 = vmatmul.mubr.msk.bf16.gmra.mrb[12].mxu1 %vm452_vm0, %v10546_v35  ;;  %v3807_v56 = vld [vmem:[#allocation2 + $0x129] sm:$0xff]  ;;  %3696 = vst.msk [vmem:[#allocation2 + $0x180] sm:$0x1] %vm508_vm1, %v3678_v51  ;;  %v10576_v59 = vpack.c.bf16 %v3805_v42, %v3804_v0  ;;  %v3679_v62 = vld [vmem:[#allocation2 + $0x19a] sm:$0x1]  ;;  %v3809_v48 = vld [vmem:[#allocation2 + $0x141] sm:$0xff] }
 0x439   : > { %8091 = vmatprep.mubr.msk.bf16.mxu1 %vm452_vm0, %v10548_v22  ;;  %v3714_v1 = vld [vmem:[#allocation2 + $0x18f] sm:$0x1]  ;;  %v10578_v32 = vpack.c.bf16 %v3807_v56, %v3806_v61  ;;  %3697 = vst.msk [vmem:[#allocation2 + $0x198] sm:$0x1] %vm508_vm1, %v3679_v62  ;;  %v3808_v63 = vld [vmem:[#allocation2 + $0x139] sm:$0xff]  ;;  %v3810_v16 = vld [vmem:[#allocation2 + $0x151] sm:$0xff] }
 0x43a   : > { %3732 = vst.msk [vmem:[#allocation2 + $0x191] sm:$0x1] %vm508_vm1, %v3714_v1  ;;  %v3811_v28 = vld [vmem:[#allocation2 + $0x159] sm:$0xff]  ;;  %v10586_v43 = vpack.c.bf16 %v3809_v48, %v3808_v63  ;;  %v3812_v40 = vld [vmem:[#allocation2 + $0x169] sm:$0xff]  ;;  %v3813_v2 = vld [vmem:[#allocation2 + $0x171] sm:$0xff] }
 0x43b   : > { %v10588_v60 = vpack.c.bf16 %v3811_v28, %v3810_v16  ;;  %v3734_v24 = vld [vmem:[#allocation2] sm:$0xff]  ;;  %v10594_v23 = vpack.c.bf16 %v3813_v2, %v3812_v40  ;;  %v3735_v29 = vld [vmem:[#allocation2 + $0x8] sm:$0xff]  ;;  %v3736_v27 = vld [vmem:[#allocation2 + $0x18] sm:$0xff] }
 0x43c   : > { %v3766_v50 = vpack.c.bf16 %v3735_v29, %v3734_v24  ;;  %v3738_v54 = vld [vmem:[#allocation2 + $0x30] sm:$0xff]  ;;  %v3737_v7 = vld [vmem:[#allocation2 + $0x20] sm:$0xff]  ;;  %v3739_v58 = vld [vmem:[#allocation2 + $0x38] sm:$0xff] }
 0x43d   : > { %v10599_v46 = vpack.c.bf16 %v3737_v7, %v3736_v27  ;;  %v9057_v17 = vld [vmem:[#allocation8 + $0x48] sm:$0xff]   ;;  %v10601_v20 = vpack.c.bf16 %v3739_v58, %v3738_v54  ;;  %v9058_v45 = vld [vmem:[#allocation8 + $0x50] sm:$0xff]   ;;  %v3740_v25 = vld [vmem:[#allocation2 + $0x48] sm:$0xff] }
 0x43e   : > { %v3742_v39 = vld [vmem:[#allocation2 + $0x60] sm:$0xff]  ;;  %v3741_v44 = vld [vmem:[#allocation2 + $0x50] sm:$0xff]  ;;  %v3743_v26 = vld [vmem:[#allocation2 + $0x68] sm:$0xff] }
 0x43f   : > { %v10608_v55 = vpack.c.bf16 %v3741_v44, %v3740_v25  ;;  %v9059_v37 = vld [vmem:[#allocation8 + $0x58] sm:$0xff]   ;;  %v10610_v19 = vpack.c.bf16 %v3743_v26, %v3742_v39  ;;  %v3744_v18 = vld [vmem:[#allocation2 + $0x78] sm:$0xff]  ;;  %v3746_v30 = vld [vmem:[#allocation2 + $0x90] sm:$0xff] }
 0x440   : > { %8092 = vmatmul.mubr.msk.bf16.gmra.mrb[16].mxu1 %vm452_vm0, %v10562_v31  ;;  %v3745_v47 = vld [vmem:[#allocation2 + $0x80] sm:$0xff]  ;;  %v3747_v34 = vld [vmem:[#allocation2 + $0x98] sm:$0xff]  ;;  %v3748_v0 = vld [vmem:[#allocation2 + $0xa8] sm:$0xff] }
 0x441   : > { %8095 = vmatprep.mubr.msk.bf16.mxu1 %vm452_vm0, %v10565_v36  ;;  %v10616_v38 = vpack.c.bf16 %v3745_v47, %v3744_v18  ;;  %v10618_v53 = vpack.c.bf16 %v3747_v34, %v3746_v30  ;;  %v3750_v42 = vld [vmem:[#allocation2 + $0xc0] sm:$0xff]  ;;  %v3749_v61 = vld [vmem:[#allocation2 + $0xb0] sm:$0xff]  ;;  %v3751_v51 = vld [vmem:[#allocation2 + $0xc8] sm:$0xff] }
 0x442   : > { %v10624_v56 = vpack.c.bf16 %v3749_v61, %v3748_v0  ;;  %v10626_v1 = vpack.c.bf16 %v3751_v51, %v3750_v42  ;;  %v3752_v62 = vld [vmem:[#allocation2 + $0xd8] sm:$0xff]  ;;  %v3754_v63 = vld [vmem:[#allocation2 + $0xf0] sm:$0xff]  ;;  %v3753_v48 = vld [vmem:[#allocation2 + $0xe0] sm:$0xff] }
 0x443   : > { %v10632_v16 = vpack.c.bf16 %v3753_v48, %v3752_v62  ;;  %v3755_v28 = vld [vmem:[#allocation2 + $0xf8] sm:$0xff]  ;;  %v3756_v2 = vld [vmem:[#allocation2 + $0x108] sm:$0xff]  ;;  %v3758_v24 = vld [vmem:[#allocation2 + $0x120] sm:$0xff] }
 0x444   : > { %v10634_v40 = vpack.c.bf16 %v3755_v28, %v3754_v63  ;;  %v3757_v29 = vld [vmem:[#allocation2 + $0x110] sm:$0xff]  ;;  %v3759_v27 = vld [vmem:[#allocation2 + $0x128] sm:$0xff]  ;;  %v3760_v7 = vld [vmem:[#allocation2 + $0x138] sm:$0xff] }
 0x445   : > { %v10642_v54 = vpack.c.bf16 %v3759_v27, %v3758_v24  ;;  %v3762_v58 = vld [vmem:[#allocation2 + $0x150] sm:$0xff]  ;;  %v3763_v25 = vld [vmem:[#allocation2 + $0x158] sm:$0xff]  ;;  %v3764_v44 = vld [vmem:[#allocation2 + $0x168] sm:$0xff] }
 0x446   : > { %v10650_v39 = vpack.c.bf16 %v3763_v25, %v3762_v58  ;;  %v4297_v26 = vld [vmem:[#allocation2 + $0xa] sm:$0xff]  ;;  %v4296_v30 = vld [vmem:[#allocation2 + $0x2] sm:$0xff]  ;;  %v4301_v0 = vld [vmem:[#allocation2 + $0x3a] sm:$0xff] }
 0x447   : > { %v4328_v47 = vpack.c.bf16 %v4297_v26, %v4296_v30  ;;  %v4299_v34 = vld [vmem:[#allocation2 + $0x22] sm:$0xff]  ;;  %v4298_v42 = vld [vmem:[#allocation2 + $0x1a] sm:$0xff]  ;;  %v4300_v51 = vld [vmem:[#allocation2 + $0x32] sm:$0xff] }
 0x448   : > { %8096 = vmatmul.mubr.msk.bf16.gmra.mrb[20].mxu1 %vm452_vm0, %v10576_v59  ;;  %v10661_v61 = vpack.c.bf16 %v4299_v34, %v4298_v42  ;;  %v9061_v62 = vld [vmem:[#allocation8 + $0x68] sm:$0xff]   ;;  %v10663_v63 = vpack.c.bf16 %v4301_v0, %v4300_v51  ;;  %v9062_v48 = vld [vmem:[#allocation8 + $0x70] sm:$0xff]   ;;  %v4302_v24 = vld [vmem:[#allocation2 + $0x4a] sm:$0xff] }
 0x449   : > { %8099 = vmatprep.mubr.msk.bf16.mxu1 %vm452_vm0, %v10578_v32  ;;  %v4303_v28 = vld [vmem:[#allocation2 + $0x52] sm:$0xff]  ;;  %v4304_v27 = vld [vmem:[#allocation2 + $0x62] sm:$0xff]  ;;  %v4309_v25 = vld [vmem:[#allocation2 + $0x9a] sm:$0xff] }
 0x44a   : > { %v4313_v34 = vld [vmem:[#allocation2 + $0xca] sm:$0xff]  ;;  %v4312_v51 = vld [vmem:[#allocation2 + $0xc2] sm:$0xff] }
 0x44b   : > { %v4310_v0 = vld [vmem:[#allocation2 + $0xaa] sm:$0xff] }
 0x450   : > { %8100 = vmatmul.mubr.msk.bf16.gmra.mrb[24].mxu1 %vm452_vm0, %v10586_v43 }
 0x451   : > { %8103 = vmatprep.mubr.msk.bf16.mxu1 %vm452_vm0, %v10588_v60 }
 0x458   : > { %8104 = vmatmul.mubr.msk.bf16.gmra.mrb[28].mxu1 %vm452_vm0, %v10594_v23 }
 0x459   : > { %8115 = vmatprep.mubr.msk.bf16.mxu1 %vm452_vm0, %v3766_v50  ;;  %v10640_v50 = vpack.c.bf16 %v3757_v29, %v3756_v2  ;;  %v4305_v2 = vld [vmem:[#allocation2 + $0x6a] sm:$0xff]  ;;  %v10669_v29 = vpack.c.bf16 %v4303_v28, %v4302_v24  ;;  %v4317_v28 = vld [vmem:[#allocation2 + $0xfa] sm:$0xff] }
 0x45a   : > { %v10671_v58 = vpack.c.bf16 %v4305_v2, %v4304_v27  ;;  %v4314_v2 = vld [vmem:[#allocation2 + $0xda] sm:$0xff]  ;;  %v4316_v27 = vld [vmem:[#allocation2 + $0xf2] sm:$0xff] }
 0x460   : > { %8116 = vmatmul.mubr.msk.bf16.vlgmr.msra.gmra.mrb[0].mxu1 %vm452_vm0, %v10599_v46 }
 0x461   : > { %8119 = vmatprep.mubr.msk.bf16.mxu1 %vm452_vm0, %v10601_v20  ;;  %8148 = vmatpush3.bf16.msra.mxu1 %v10521_v49  ;;  %v9060_v49 = vld [vmem:[#allocation8 + $0x60] sm:$0xff]  }
 0x462   : > { %8149 = vmatprep.subr.bf16.mxu1 %v9057_v17 }
 0x465   : > { %8150 = vmatpush3.bf16.msra.mxu1 %v9057_v17  ;;  %v3761_v17 = vld [vmem:[#allocation2 + $0x140] sm:$0xff] }
 0x466   : > { %8151 = vmatprep.subr.bf16.mxu1 %v9058_v45 }
 0x468   : > { %8120 = vmatmul.mubr.msk.bf16.gmra.mrb[4].mxu1 %vm452_vm0, %v10608_v55 }
 0x469   : > { %8123 = vmatprep.mubr.msk.bf16.mxu1 %vm452_vm0, %v10610_v19  ;;  %8152 = vmatpush3.bf16.msra.mxu1 %v9058_v45  ;;  %v10648_v45 = vpack.c.bf16 %v3761_v17, %v3760_v7  ;;  %v9063_v7 = vld [vmem:[#allocation8 + $0x78] sm:$0xff]  }
 0x46a   : > { %8153 = vmatprep.subr.bf16.mxu1 %v9059_v37  ;;  %v4307_v17 = vld [vmem:[#allocation2 + $0x82] sm:$0xff] }
 0x46d   : > { %8154 = vmatpush3.bf16.msra.mxu1 %v9059_v37  ;;  %v3765_v37 = vld [vmem:[#allocation2 + $0x170] sm:$0xff] }
 0x46e   : > { %8187 = vmatprep.subr.bf16.mxu1 %v9060_v49  ;;  %v10656_v18 = vpack.c.bf16 %v3765_v37, %v3764_v44  ;;  %v4306_v44 = vld [vmem:[#allocation2 + $0x7a] sm:$0xff]  ;;  %v4308_v37 = vld [vmem:[#allocation2 + $0x92] sm:$0xff] }
 0x46f   : > { %v10677_v26 = vpack.c.bf16 %v4307_v17, %v4306_v44  ;;  %v10679_v30 = vpack.c.bf16 %v4309_v25, %v4308_v37  ;;  %v4319_v17 = vld [vmem:[#allocation2 + $0x112] sm:$0xff]  ;;  %v4321_v25 = vld [vmem:[#allocation2 + $0x12a] sm:$0xff] }
 0x470   : > { %8124 = vmatmul.mubr.msk.bf16.gmra.mrb[8].mxu1 %vm452_vm0, %v10616_v38  ;;  %v4318_v44 = vld [vmem:[#allocation2 + $0x10a] sm:$0xff] }
 0x471   : > { %8127 = vmatprep.mubr.msk.bf16.mxu1 %vm452_vm0, %v10618_v53  ;;  %v10701_v37 = vpack.c.bf16 %v4319_v17, %v4318_v44  ;;  %v4327_v17 = vld [vmem:[#allocation2 + $0x172] sm:$0xff] }
 0x478   : > { %8128 = vmatmul.mubr.msk.bf16.gmra.mrb[12].mxu1 %vm452_vm0, %v10624_v56 }
 0x479   : > { %8131 = vmatprep.mubr.msk.bf16.mxu1 %vm452_vm0, %v10626_v1 }
 0x480   : > { %8132 = vmatmul.mubr.msk.bf16.gmra.mrb[16].mxu1 %vm452_vm0, %v10632_v16 }
 0x481   : > { %8135 = vmatprep.mubr.msk.bf16.mxu1 %vm452_vm0, %v10634_v40 }
 0x488   : > { %8136 = vmatmul.mubr.msk.bf16.gmra.mrb[20].mxu1 %vm452_vm0, %v10640_v50 }
 0x489   : > { %8139 = vmatprep.mubr.msk.bf16.mxu1 %vm452_vm0, %v10642_v54 }
 0x490   : > { %8140 = vmatmul.mubr.msk.bf16.gmra.mrb[24].mxu1 %vm452_vm0, %v10648_v45 }
 0x491   : > { %8143 = vmatprep.mubr.msk.bf16.mxu1 %vm452_vm0, %v10650_v39 }
 0x498   : > { %8144 = vmatmul.mubr.msk.bf16.gmra.mrb[28].mxu1 %vm452_vm0, %v10656_v18 }
 0x499   : > { %8155 = vmatprep.mubr.msk.bf16.mxu1 %vm452_vm0, %v4328_v47  ;;  %v4311_v47 = vld [vmem:[#allocation2 + $0xb2] sm:$0xff] }
 0x49a   : > { %v10685_v42 = vpack.c.bf16 %v4311_v47, %v4310_v0  ;;  %v4320_v47 = vld [vmem:[#allocation2 + $0x122] sm:$0xff] }
 0x49b   : > { %v4323_v0 = vld [vmem:[#allocation2 + $0x142] sm:$0xff] }
 0x4a0   : > { %8156 = vmatmul.mubr.msk.bf16.vlgmr.msra.gmra.mrb[0].mxu1 %vm452_vm0, %v10661_v61 }
 0x4a1   : > { %8159 = vmatprep.mubr.msk.bf16.mxu1 %vm452_vm0, %v10663_v63  ;;  %8188 = vmatpush3.bf16.msra.mxu1 %v9060_v49  ;;  %v9064_v49 = vld [vmem:[#allocation8 + $0x80] sm:$0xff]  }
 0x4a2   : > { %8189 = vmatprep.subr.bf16.mxu1 %v9061_v62 }
 0x4a5   : > { %8190 = vmatpush3.bf16.msra.mxu1 %v9061_v62  ;;  %v10687_v62 = vpack.c.bf16 %v4313_v34, %v4312_v51  ;;  %v10703_v34 = vpack.c.bf16 %v4321_v25, %v4320_v47  ;;  %v4325_v51 = vld [vmem:[#allocation2 + $0x15a] sm:$0xff]  ;;  %v4326_v25 = vld [vmem:[#allocation2 + $0x16a] sm:$0xff] }
 0x4a6   : > { %8191 = vmatprep.subr.bf16.mxu1 %v9062_v48  ;;  %v10717_v44 = vpack.c.bf16 %v4327_v17, %v4326_v25  ;;  %v9065_v47 = vld [vmem:[#allocation8 + $0x88] sm:$0xff]   ;;  %v9070_v25 = vld [vmem:[#allocation8 + $0xb0] sm:$0xff]  }
 0x4a7   : > { %v9069_v17 = vld [vmem:[#allocation8 + $0xa8] sm:$0xff]  }
 0x4a8   : > { %8160 = vmatmul.mubr.msk.bf16.gmra.mrb[4].mxu1 %vm452_vm0, %v10669_v29 }
 0x4a9   : > { %8163 = vmatprep.mubr.msk.bf16.mxu1 %vm452_vm0, %v10671_v58  ;;  %8192 = vmatpush3.bf16.msra.mxu1 %v9062_v48  ;;  %v4315_v48 = vld [vmem:[#allocation2 + $0xe2] sm:$0xff] }
 0x4aa   : > { %8193 = vmatprep.subr.bf16.mxu1 %v9063_v7  ;;  %v10693_v24 = vpack.c.bf16 %v4315_v48, %v4314_v2  ;;  %v4322_v48 = vld [vmem:[#allocation2 + $0x13a] sm:$0xff]  ;;  %v4324_v2 = vld [vmem:[#allocation2 + $0x152] sm:$0xff] }
 0x4ad   : > { %8194 = vmatpush3.bf16.msra.mxu1 %v9063_v7  ;;  %v10695_v7 = vpack.c.bf16 %v4317_v28, %v4316_v27  ;;  %v10709_v28 = vpack.c.bf16 %v4323_v0, %v4322_v48  ;;  %v10711_v27 = vpack.c.bf16 %v4325_v51, %v4324_v2  ;;  %v9066_v0 = vld [vmem:[#allocation8 + $0x90] sm:$0xff]   ;;  %v9067_v51 = vld [vmem:[#allocation8 + $0x98] sm:$0xff]  }
 0x4ae   : > { %8227 = vmatprep.subr.bf16.mxu1 %v9064_v49  ;;  %v4640_v48 = vld [vmem:[#allocation2 + $0x188] sm:$0xff] }
 0x4b0   : > { %8164 = vmatmul.mubr.msk.bf16.gmra.mrb[8].mxu1 %vm452_vm0, %v10677_v26 }
 0x4b1   : > { %8167 = vmatprep.mubr.msk.bf16.mxu1 %vm452_vm0, %v10679_v30 }
 0x4b8   : > { %8168 = vmatmul.mubr.msk.bf16.gmra.mrb[12].mxu1 %vm452_vm0, %v10685_v42 }
 0x4b9   : > { %8171 = vmatprep.mubr.msk.bf16.mxu1 %vm452_vm0, %v10687_v62 }
 0x4c0   : > { %8172 = vmatmul.mubr.msk.bf16.gmra.mrb[16].mxu1 %vm452_vm0, %v10693_v24 }
 0x4c1   : > { %8175 = vmatprep.mubr.msk.bf16.mxu1 %vm452_vm0, %v10695_v7 }
 0x4c8   : > { %8176 = vmatmul.mubr.msk.bf16.gmra.mrb[20].mxu1 %vm452_vm0, %v10701_v37 }
 0x4c9   : > { %8179 = vmatprep.mubr.msk.bf16.mxu1 %vm452_vm0, %v10703_v34 }
 0x4d0   : > { %8180 = vmatmul.mubr.msk.bf16.gmra.mrb[24].mxu1 %vm452_vm0, %v10709_v28 }
 0x4d1   : > { %8183 = vmatprep.mubr.msk.bf16.mxu1 %vm452_vm0, %v10711_v27 }
 0x4d8   : > { %8184 = vmatmul.mubr.msk.bf16.gmra.mrb[28].mxu1 %vm452_vm0, %v10717_v44 }
 0x4d9   : > { %8195 = vmatprep.mubr.msk.bf16.mxu1 %vm452_vm0, %v10599_v46  ;;  %v9068_v46 = vld [vmem:[#allocation8 + $0xa0] sm:$0xff]  }
 0x4e0   : > { %8196 = vmatmul.mubr.msk.bf16.vlgmr.msra.gmra.mrb[0].mxu1 %vm452_vm0, %v10601_v20 }
 0x4e1   : > { %8199 = vmatprep.mubr.msk.bf16.mxu1 %vm452_vm0, %v10608_v55  ;;  %8228 = vmatpush3.bf16.msra.mxu1 %v9064_v49  ;;  %v4639_v49 = vld [vmem:[#allocation2 + $0x180] sm:$0xff] }
 0x4e2   : > { %8229 = vmatprep.subr.bf16.mxu1 %v9065_v47  ;;  %v10751_v2 = vpack.c.bf16 %v4640_v48, %v4639_v49  ;;  %v5872_v49 = vld [vmem:[#allocation2 + $0xb1] sm:$0xff]  ;;  %v5873_v48 = vld [vmem:[#allocation2 + $0xc1] sm:$0xff] }
 0x4e5   : > { %8230 = vmatpush3.bf16.msra.mxu1 %v9065_v47  ;;  %v9071_v47 = vld [vmem:[#allocation8 + $0xb8] sm:$0xff]  }
 0x4e6   : > { %8231 = vmatprep.subr.bf16.mxu1 %v9066_v0 }
 0x4e8   : > { %8200 = vmatmul.mubr.msk.bf16.gmra.mrb[4].mxu1 %vm452_vm0, %v10610_v19 }
 0x4e9   : > { %8203 = vmatprep.mubr.msk.bf16.mxu1 %vm452_vm0, %v10616_v38  ;;  %8232 = vmatpush3.bf16.msra.mxu1 %v9066_v0  ;;  %v9083_v0 = vld [vmem:[#allocation8 + $0x118] sm:$0xff]  }
 0x4ea   : > { %8233 = vmatprep.subr.bf16.mxu1 %v9067_v51 }
 0x4ed   : > { %8234 = vmatpush3.bf16.msra.mxu1 %v9067_v51 }
 0x4ee   : > { %8267 = vmatprep.subr.bf16.mxu1 %v9068_v46 }
 0x4f0   : > { %8204 = vmatmul.mubr.msk.bf16.gmra.mrb[8].mxu1 %vm452_vm0, %v10618_v53 }
 0x4f1   : > { %8207 = vmatprep.mubr.msk.bf16.mxu1 %vm452_vm0, %v10624_v56 }
 0x4f8   : > { %8208 = vmatmul.mubr.msk.bf16.gmra.mrb[12].mxu1 %vm452_vm0, %v10626_v1 }
 0x4f9   : > { %8211 = vmatprep.mubr.msk.bf16.mxu1 %vm452_vm0, %v10632_v16 }
 0x500   : > { %8212 = vmatmul.mubr.msk.bf16.gmra.mrb[16].mxu1 %vm452_vm0, %v10634_v40 }
 0x501   : > { %8215 = vmatprep.mubr.msk.bf16.mxu1 %vm452_vm0, %v10640_v50 }
 0x508   : > { %8216 = vmatmul.mubr.msk.bf16.gmra.mrb[20].mxu1 %vm452_vm0, %v10642_v54 }
 0x509   : > { %8219 = vmatprep.mubr.msk.bf16.mxu1 %vm452_vm0, %v10648_v45 }
 0x510   : > { %8220 = vmatmul.mubr.msk.bf16.gmra.mrb[24].mxu1 %vm452_vm0, %v10650_v39 }
 0x511   : > { %8223 = vmatprep.mubr.msk.bf16.mxu1 %vm452_vm0, %v10656_v18 }
 0x518   : > { %8224 = vmatmul.mubr.msk.bf16.gmra.mrb[28].mxu1 %vm452_vm0, %v10751_v2 }
 0x519   : > { %8235 = vmatprep.mubr.msk.bf16.mxu1 %vm452_vm0, %v10499_v41  ;;  %v9072_v41 = vld [vmem:[#allocation8 + $0xc0] sm:$0xff]  }
 0x520   : > { %8236 = vmatmul.mubr.msk.bf16.vlgmr.msra.gmra.mrb[0].mxu1 %vm452_vm0, %v10502_v33  ;;  %v4952_v33 = vld [vmem:[#allocation2 + $0x181] sm:$0xff] }
 0x521   : > { %8239 = vmatprep.mubr.msk.bf16.mxu1 %vm452_vm0, %v10509_v15  ;;  %8268 = vmatpush3.bf16.msra.mxu1 %v9068_v46  ;;  %v4953_v15 = vld [vmem:[#allocation2 + $0x189] sm:$0xff] }
 0x522   : > { %8269 = vmatprep.subr.bf16.mxu1 %v9069_v17  ;;  %v5871_v46 = vld [vmem:[#allocation2 + $0xa9] sm:$0xff] }
 0x525   : > { %8270 = vmatpush3.bf16.msra.mxu1 %v9069_v17  ;;  %v5898_v17 = vpack.c.bf16 %v5872_v49, %v5871_v46 }
 0x526   : > { %8271 = vmatprep.subr.bf16.mxu1 %v9070_v25 }
 0x528   : > { %8240 = vmatmul.mubr.msk.bf16.gmra.mrb[4].mxu1 %vm452_vm0, %v10512_v57  ;;  %v10785_v57 = vpack.c.bf16 %v4953_v15, %v4952_v33  ;;  %v5877_v33 = vld [vmem:[#allocation2 + $0xf1] sm:$0xff]  ;;  %v5878_v15 = vld [vmem:[#allocation2 + $0xf9] sm:$0xff] }
 0x529   : > { %8243 = vmatprep.mubr.msk.bf16.mxu1 %vm452_vm0, %v10531_v14  ;;  %8272 = vmatpush3.bf16.msra.mxu1 %v9070_v25  ;;  %v9073_v14 = vld [vmem:[#allocation8 + $0xc8] sm:$0xff]  }
 0x52a   : > { %8273 = vmatprep.subr.bf16.mxu1 %v9071_v47 }
 0x52d   : > { %8274 = vmatpush3.bf16.msra.mxu1 %v9071_v47  ;;  %v5875_v47 = vld [vmem:[#allocation2 + $0xd9] sm:$0xff] }
 0x52e   : > { %8307 = vmatprep.subr.bf16.mxu1 %v9072_v41 }
 0x530   : > { %8244 = vmatmul.mubr.msk.bf16.gmra.mrb[8].mxu1 %vm452_vm0, %v10535_v21  ;;  %v9074_v21 = vld [vmem:[#allocation8 + $0xd0] sm:$0xff]  }
 0x531   : > { %8247 = vmatprep.mubr.msk.bf16.mxu1 %vm452_vm0, %v10546_v35  ;;  %v9075_v35 = vld [vmem:[#allocation8 + $0xd8] sm:$0xff]  }
 0x538   : > { %8248 = vmatmul.mubr.msk.bf16.gmra.mrb[12].mxu1 %vm452_vm0, %v10548_v22  ;;  %v9076_v22 = vld [vmem:[#allocation8 + $0xe0] sm:$0xff]  }
 0x539   : > { %8251 = vmatprep.mubr.msk.bf16.mxu1 %vm452_vm0, %v10562_v31  ;;  %v5266_v31 = vld [vmem:[#allocation2 + $0x18a] sm:$0xff] }
 0x540   : > { %8252 = vmatmul.mubr.msk.bf16.gmra.mrb[16].mxu1 %vm452_vm0, %v10565_v36  ;;  %v5265_v36 = vld [vmem:[#allocation2 + $0x182] sm:$0xff] }
 0x541   : > { %8255 = vmatprep.mubr.msk.bf16.mxu1 %vm452_vm0, %v10576_v59  ;;  %v10819_v59 = vpack.c.bf16 %v5266_v31, %v5265_v36  ;;  %v5881_v31 = vld [vmem:[#allocation2 + $0x121] sm:$0xff]  ;;  %v5882_v36 = vld [vmem:[#allocation2 + $0x129] sm:$0xff] }
 0x548   : > { %8256 = vmatmul.mubr.msk.bf16.gmra.mrb[20].mxu1 %vm452_vm0, %v10578_v32  ;;  %v9077_v32 = vld [vmem:[#allocation8 + $0xe8] sm:$0xff]  }
 0x549   : > { %8259 = vmatprep.mubr.msk.bf16.mxu1 %vm452_vm0, %v10586_v43  ;;  %v9078_v43 = vld [vmem:[#allocation8 + $0xf0] sm:$0xff]  }
 0x550   : > { %8260 = vmatmul.mubr.msk.bf16.gmra.mrb[24].mxu1 %vm452_vm0, %v10588_v60  ;;  %v9079_v60 = vld [vmem:[#allocation8 + $0xf8] sm:$0xff]  }
 0x551   : > { %8263 = vmatprep.mubr.msk.bf16.mxu1 %vm452_vm0, %v10594_v23  ;;  %v9080_v23 = vld [vmem:[#allocation8 + $0x100] sm:$0xff]  }
 0x558   : > { %8264 = vmatmul.mubr.msk.bf16.gmra.mrb[28].mxu1 %vm452_vm0, %v10785_v57 }
 0x559   : > { %8275 = vmatprep.mubr.msk.bf16.mxu1 %vm452_vm0, %v10661_v61  ;;  %v5867_v61 = vld [vmem:[#allocation2 + $0x79] sm:$0xff] }
 0x560   : > { %8276 = vmatmul.mubr.msk.bf16.vlgmr.msra.gmra.mrb[0].mxu1 %vm452_vm0, %v10663_v63  ;;  %v5868_v63 = vld [vmem:[#allocation2 + $0x81] sm:$0xff] }
 0x561   : > { %8279 = vmatprep.mubr.msk.bf16.mxu1 %vm452_vm0, %v10669_v29  ;;  %8308 = vmatpush3.bf16.msra.mxu1 %v9072_v41  ;;  %v5869_v29 = vld [vmem:[#allocation2 + $0x91] sm:$0xff]  ;;  %v5876_v41 = vld [vmem:[#allocation2 + $0xe1] sm:$0xff] }
 0x562   : > { %8309 = vmatprep.subr.bf16.mxu1 %v9073_v14 }
 0x565   : > { %8310 = vmatpush3.bf16.msra.mxu1 %v9073_v14  ;;  %v5900_v14 = vpack.c.bf16 %v5876_v41, %v5875_v47 }
 0x566   : > { %8311 = vmatprep.subr.bf16.mxu1 %v9074_v21 }
 0x568   : > { %8280 = vmatmul.mubr.msk.bf16.gmra.mrb[4].mxu1 %vm452_vm0, %v10671_v58  ;;  %v5870_v58 = vld [vmem:[#allocation2 + $0x99] sm:$0xff] }
 0x569   : > { %8283 = vmatprep.mubr.msk.bf16.mxu1 %vm452_vm0, %v10677_v26  ;;  %8312 = vmatpush3.bf16.msra.mxu1 %v9074_v21  ;;  %v5896_v26 = vpack.c.bf16 %v5868_v63, %v5867_v61  ;;  %v5897_v51 = vpack.c.bf16 %v5870_v58, %v5869_v29  ;;  %v5901_v21 = vpack.c.bf16 %v5878_v15, %v5877_v33  ;;  %v6179_v61 = vld [vmem:[#allocation2 + $0x6a] sm:$0xff]  ;;  %v6178_v58 = vld [vmem:[#allocation2 + $0x62] sm:$0xff] }
 0x56a   : > { %8313 = vmatprep.subr.bf16.mxu1 %v9075_v35  ;;  %v6176_v63 = vld [vmem:[#allocation2 + $0x4a] sm:$0xff] }
 0x56d   : > { %8314 = vmatpush3.bf16.msra.mxu1 %v9075_v35  ;;  %v5879_v35 = vld [vmem:[#allocation2 + $0x109] sm:$0xff] }
 0x56e   : > { %8347 = vmatprep.subr.bf16.mxu1 %v9076_v22 }
 0x570   : > { %8284 = vmatmul.mubr.msk.bf16.gmra.mrb[8].mxu1 %vm452_vm0, %v10679_v30 }
 0x571   : > { %8287 = vmatprep.mubr.msk.bf16.mxu1 %vm452_vm0, %v10685_v42 }
 0x578   : > { %8288 = vmatmul.mubr.msk.bf16.gmra.mrb[12].mxu1 %vm452_vm0, %v10687_v62 }
 0x579   : > { %8291 = vmatprep.mubr.msk.bf16.mxu1 %vm452_vm0, %v10693_v24 }
 0x580   : > { %8292 = vmatmul.mubr.msk.bf16.gmra.mrb[16].mxu1 %vm452_vm0, %v10695_v7 }
 0x581   : > { %8295 = vmatprep.mubr.msk.bf16.mxu1 %vm452_vm0, %v10701_v37 }
 0x588   : > { %8296 = vmatmul.mubr.msk.bf16.gmra.mrb[20].mxu1 %vm452_vm0, %v10703_v34 }
 0x589   : > { %8299 = vmatprep.mubr.msk.bf16.mxu1 %vm452_vm0, %v10709_v28 }
 0x590   : > { %8300 = vmatmul.mubr.msk.bf16.gmra.mrb[24].mxu1 %vm452_vm0, %v10711_v27 }
 0x591   : > { %8303 = vmatprep.mubr.msk.bf16.mxu1 %vm452_vm0, %v10717_v44 }
 0x598   : > { %8304 = vmatmul.mubr.msk.bf16.gmra.mrb[28].mxu1 %vm452_vm0, %v10819_v59 }
 0x599   : > { %8315 = vmatprep.mubr.msk.bf16.mxu1 %vm452_vm0, %v10601_v20  ;;  %v5578_v20 = vld [vmem:[#allocation2 + $0x198] sm:$0xff] }
 0x5a0   : > { %8316 = vmatmul.mubr.msk.bf16.vlgmr.msra.gmra.mrb[0].mxu1 %vm452_vm0, %v10608_v55  ;;  %v5861_v55 = vld [vmem:[#allocation2 + $0x31] sm:$0xff] }
 0x5a1   : > { %8319 = vmatprep.mubr.msk.bf16.mxu1 %vm452_vm0, %v10610_v19  ;;  %8348 = vmatpush3.bf16.msra.mxu1 %v9076_v22  ;;  %v5862_v19 = vld [vmem:[#allocation2 + $0x39] sm:$0xff]  ;;  %v5880_v22 = vld [vmem:[#allocation2 + $0x111] sm:$0xff] }
 0x5a2   : > { %8349 = vmatprep.subr.bf16.mxu1 %v9077_v32 }
 0x5a5   : > { %8350 = vmatpush3.bf16.msra.mxu1 %v9077_v32  ;;  %v5902_v32 = vpack.c.bf16 %v5880_v22, %v5879_v35 }
 0x5a6   : > { %8351 = vmatprep.subr.bf16.mxu1 %v9078_v43 }
 0x5a8   : > { %8320 = vmatmul.mubr.msk.bf16.gmra.mrb[4].mxu1 %vm452_vm0, %v10616_v38  ;;  %v5579_v38 = vld [vmem:[#allocation2 + $0x1a0] sm:$0xff] }
 0x5a9   : > { %8323 = vmatprep.mubr.msk.bf16.mxu1 %vm452_vm0, %v10618_v53  ;;  %8352 = vmatpush3.bf16.msra.mxu1 %v9078_v43  ;;  %v5595_v53 = vpack.c.bf16 %v5579_v38, %v5578_v20  ;;  %v5903_v43 = vpack.c.bf16 %v5882_v36, %v5881_v31  ;;  %v5885_v20 = vld [vmem:[#allocation2 + $0x151] sm:$0xff] }
 0x5aa   : > { %8353 = vmatprep.subr.bf16.mxu1 %v9079_v60 }
 0x5ad   : > { %8354 = vmatpush3.bf16.msra.mxu1 %v9079_v60  ;;  %v5883_v60 = vld [vmem:[#allocation2 + $0x139] sm:$0xff] }
 0x5ae   : > { %8387 = vmatprep.subr.bf16.mxu1 %v9080_v23 }
 0x5b0   : > { %8324 = vmatmul.mubr.msk.bf16.gmra.mrb[8].mxu1 %vm452_vm0, %v10624_v56  ;;  %v5893_v56 = vpack.c.bf16 %v5862_v19, %v5861_v55  ;;  %v5886_v55 = vld [vmem:[#allocation2 + $0x159] sm:$0xff] }
 0x5b1   : > { %8327 = vmatprep.mubr.msk.bf16.mxu1 %vm452_vm0, %v10626_v1  ;;  %v5863_v1 = vld [vmem:[#allocation2 + $0x49] sm:$0xff]  ;;  %v5905_v38 = vpack.c.bf16 %v5886_v55, %v5885_v20 }
 0x5b8   : > { %8328 = vmatmul.mubr.msk.bf16.gmra.mrb[12].mxu1 %vm452_vm0, %v10632_v16  ;;  %v5864_v16 = vld [vmem:[#allocation2 + $0x51] sm:$0xff] }
 0x5b9   : > { %8331 = vmatprep.mubr.msk.bf16.mxu1 %vm452_vm0, %v10634_v40  ;;  %v5865_v40 = vld [vmem:[#allocation2 + $0x61] sm:$0xff] }
 0x5c0   : > { %8332 = vmatmul.mubr.msk.bf16.gmra.mrb[16].mxu1 %vm452_vm0, %v10640_v50  ;;  %v5866_v50 = vld [vmem:[#allocation2 + $0x69] sm:$0xff] }
 0x5c1   : > { %8335 = vmatprep.mubr.msk.bf16.mxu1 %vm452_vm0, %v10642_v54  ;;  %v5894_v54 = vpack.c.bf16 %v5864_v16, %v5863_v1  ;;  %v5891_v16 = vld [vmem:[#allocation2 + $0x199] sm:$0xff] }
 0x5c8   : > { %8336 = vmatmul.mubr.msk.bf16.gmra.mrb[20].mxu1 %vm452_vm0, %v10648_v45  ;;  %v9081_v45 = vld [vmem:[#allocation8 + $0x108] sm:$0xff]  }
 0x5c9   : > { %8339 = vmatprep.mubr.msk.bf16.mxu1 %vm452_vm0, %v10650_v39  ;;  %v5895_v39 = vpack.c.bf16 %v5866_v50, %v5865_v40  ;;  %v5892_v40 = vld [vmem:[#allocation2 + $0x1a1] sm:$0xff] }
 0x5ca   : > { %v6175_v50 = vld [vmem:[#allocation2 + $0x3a] sm:$0xff] }
 0x5d0   : > { %8340 = vmatmul.mubr.msk.bf16.gmra.mrb[24].mxu1 %vm452_vm0, %v10656_v18  ;;  %v9082_v18 = vld [vmem:[#allocation8 + $0x110] sm:$0xff]  }
 0x5d1   : > { %8343 = vmatprep.mubr.msk.bf16.mxu1 %vm452_vm0, %v10751_v2  ;;  %v5874_v2 = vld [vmem:[#allocation2 + $0xc9] sm:$0xff] }
 0x5d2   : > { %v5899_v25 = vpack.c.bf16 %v5874_v2, %v5873_v48 }
 0x5d8   : > { %8344 = vmatmul.mubr.msk.bf16.gmra.mrb[28].mxu1 %vm452_vm0, %v5595_v53  ;;  %v5887_v53 = vld [vmem:[#allocation2 + $0x169] sm:$0xff] }
 0x5d9   : > { %8355 = vmatprep.mubr.msk.bf16.mxu1 %vm452_vm0, %v5893_v56  ;;  %v5888_v56 = vld [vmem:[#allocation2 + $0x171] sm:$0xff] }
 0x5da   : > { %v5906_v1 = vpack.c.bf16 %v5888_v56, %v5887_v53 }
 0x5e0   : > { %8356 = vmatmul.mubr.msk.bf16.vlgmr.msra.gmra.mrb[0].mxu1 %vm452_vm0, %v5894_v54  ;;  %v5908_v54 = vpack.c.bf16 %v5892_v40, %v5891_v16 }
 0x5e1   : > { %8359 = vmatprep.mubr.msk.bf16.mxu1 %vm452_vm0, %v5895_v39  ;;  %8388 = vmatpush3.bf16.msra.mxu1 %v9080_v23  ;;  %v5884_v23 = vld [vmem:[#allocation2 + $0x141] sm:$0xff] }
 0x5e2   : > { %8389 = vmatprep.subr.bf16.mxu1 %v9081_v45  ;;  %v5904_v19 = vpack.c.bf16 %v5884_v23, %v5883_v60 }
 0x5e5   : > { %8390 = vmatpush3.bf16.msra.mxu1 %v9081_v45  ;;  %v6174_v45 = vld [vmem:[#allocation2 + $0x32] sm:$0xff] }
 0x5e6   : > { %8391 = vmatprep.subr.bf16.mxu1 %v9082_v18  ;;  %v6206_v39 = vpack.c.bf16 %v6175_v50, %v6174_v45 }
 0x5e8   : > { %8360 = vmatmul.mubr.msk.bf16.gmra.mrb[4].mxu1 %vm452_vm0, %v5896_v26  ;;  %v6208_v26 = vpack.c.bf16 %v6179_v61, %v6178_v58 }
 0x5e9   : > { %8363 = vmatprep.mubr.msk.bf16.mxu1 %vm452_vm0, %v5897_v51  ;;  %8392 = vmatpush3.bf16.msra.mxu1 %v9082_v18  ;;  %v6177_v18 = vld [vmem:[#allocation2 + $0x52] sm:$0xff] }
 0x5ea   : > { %8393 = vmatprep.subr.bf16.mxu1 %v9083_v0  ;;  %v6207_v29 = vpack.c.bf16 %v6177_v18, %v6176_v63 }
 0x5ed   : > { %8394 = vmatpush3.bf16.msra.mxu1 %v9083_v0  ;;  %v6180_v0 = vld [vmem:[#allocation2 + $0x7a] sm:$0xff] }
 0x5f0   : > { %8364 = vmatmul.mubr.msk.bf16.gmra.mrb[8].mxu1 %vm452_vm0, %v5898_v17 }
 0x5f1   : > { %8367 = vmatprep.mubr.msk.bf16.mxu1 %vm452_vm0, %v5899_v25 }
 0x5f8   : > { %8368 = vmatmul.mubr.msk.bf16.gmra.mrb[12].mxu1 %vm452_vm0, %v5900_v14 }
 0x5f9   : > { %8371 = vmatprep.mubr.msk.bf16.mxu1 %vm452_vm0, %v5901_v21 }
 0x600   : > { %8372 = vmatmul.mubr.msk.bf16.gmra.mrb[16].mxu1 %vm452_vm0, %v5902_v32 }
 0x601   : > { %8375 = vmatprep.mubr.msk.bf16.mxu1 %vm452_vm0, %v5903_v43 }
 0x608   : > { %8376 = vmatmul.mubr.msk.bf16.gmra.mrb[20].mxu1 %vm452_vm0, %v5904_v19 }
 0x609   : > { %8379 = vmatprep.mubr.msk.bf16.mxu1 %vm452_vm0, %v5905_v38 }
 0x610   : > { %8380 = vmatmul.mubr.msk.bf16.gmra.mrb[24].mxu1 %vm452_vm0, %v5906_v1 }
 0x611   : > { %8383 = vmatprep.mubr.msk.bf16.mxu1 %vm452_vm0, %v10785_v57  ;;  %v6181_v57 = vld [vmem:[#allocation2 + $0x82] sm:$0xff] }
 0x612   : > { %v6209_v51 = vpack.c.bf16 %v6181_v57, %v6180_v0 }
 0x618   : > { %8384 = vmatmul.mubr.msk.bf16.gmra.mrb[28].mxu1 %vm452_vm0, %v5908_v54 }
 0x619   : > { %8395 = vmatprep.mubr.msk.bf16.mxu1 %vm452_vm0, %v6206_v39 }
 0x620   : > { %8396 = vmatmul.mubr.msk.bf16.vlgmr.msra.gmra.mrb[0].mxu1 %vm452_vm0, %v6207_v29 }
 0x621   : > { %8399 = vmatprep.mubr.msk.bf16.mxu1 %vm452_vm0, %v6208_v26 }
 0x628   : > { %8400 = vmatmul.mubr.msk.bf16.gmra.mrb[4].mxu1 %vm452_vm0, %v6209_v51 }
 0x629   : > { %8403 = vmatprep.mubr.msk.bf16.mxu1 %vm452_vm0, %v10679_v30  ;;  %v6205_v30 = vld [vmem:[#allocation2 + $0x1a2] sm:$0xff] }
 0x630   : > { %8404 = vmatmul.mubr.msk.bf16.gmra.mrb[8].mxu1 %vm452_vm0, %v10685_v42  ;;  %v6204_v42 = vld [vmem:[#allocation2 + $0x19a] sm:$0xff] }
 0x631   : > { %8407 = vmatprep.mubr.msk.bf16.mxu1 %vm452_vm0, %v10687_v62  ;;  %v6221_v62 = vpack.c.bf16 %v6205_v30, %v6204_v42 }
 0x638   : > { %8408 = vmatmul.mubr.msk.bf16.gmra.mrb[12].mxu1 %vm452_vm0, %v10693_v24  ;;  %v10901_v24 = vld [vmem:[%s11434_s4] ss:$0 sm:$0xff] }
 0x639   : > { %8411 = vmatprep.mubr.msk.bf16.mxu1 %vm452_vm0, %v10695_v7 }
 0x640   : > { %8412 = vmatmul.mubr.msk.bf16.gmra.mrb[16].mxu1 %vm452_vm0, %v10701_v37 }
 0x641   : > { %8415 = vmatprep.mubr.msk.bf16.mxu1 %vm452_vm0, %v10703_v34 }
 0x648   : > { %8416 = vmatmul.mubr.msk.bf16.gmra.mrb[20].mxu1 %vm452_vm0, %v10709_v28 }
 0x649   : > { %8419 = vmatprep.mubr.msk.bf16.mxu1 %vm452_vm0, %v10711_v27 }
 0x650   : > { %8420 = vmatmul.mubr.msk.bf16.gmra.mrb[24].mxu1 %vm452_vm0, %v10717_v44 }
 0x651   : > { %8423 = vmatprep.mubr.msk.bf16.mxu1 %vm452_vm0, %v10819_v59 }
 0x658   : > { %8424 = vmatmul.mubr.msk.bf16.gmra.mrb[28].mxu1 %vm452_vm0, %v6221_v62 }
 0x6f3   : > { %v8397_v7 = vpop.f32.mrb[0].mxu1 }
 0x6f4   : > { %v6328_v37 = vpop.f32.mrb[1].mxu1  ;;  %v10907_v44 = vadd.f32 %v8397_v7, %v10901_v24 }
 0x6f5   : > { %v10904_v34 = vadd.f32 %v10901_v24, %v6328_v37  ;;  %v8398_v28 = vpop.f32.mrb[2].mxu1 }
 0x6f6   : > { %v6331_v27 = vpop.f32.mrb[3].mxu1  ;;  %v10915_v49 = vadd.f32 %v8398_v28, %v10901_v24  ;;  %v6528_v17 = vsel %vm452_vm0, %v10907_v44, 0.0 }
 0x6f7   : > { %v10910_v59 = vadd.f32 %v10901_v24, %v6331_v27  ;;  %v6525_v46 = vsel %vm452_vm0, %v10904_v34, 0.0 }
 0x6f8   : > { %v6530_v33 = vsel %vm452_vm0, %v10915_v49, 0.0 }
 0x6f9   : > { %v6526_v48 = vsel %vm452_vm0, %v10910_v59, 0.0 }
 0x6fa   : > { %v6527_v2 = vadd.f32 %v6526_v48, %v6525_v46 }
 0x6fb   : > { %v8401_v25 = vpop.f32.mrb[4].mxu1 }
 0x6fc   : > { %v6529_v47 = vadd.f32 %v6528_v17, %v6527_v2  ;;  %v6344_v41 = vpop.f32.mrb[5].mxu1  ;;  %v10927_v22 = vadd.f32 %v8401_v25, %v10901_v24 }
 0x6fd   : > { %v10924_v15 = vadd.f32 %v10901_v24, %v6344_v41  ;;  %v8402_v14 = vpop.f32.mrb[6].mxu1 }
 0x6fe   : > { %v6531_v21 = vadd.f32 %v6530_v33, %v6529_v47  ;;  %v6347_v35 = vpop.f32.mrb[7].mxu1  ;;  %v10935_v43 = vadd.f32 %v8402_v14, %v10901_v24  ;;  %v6536_v20 = vsel %vm452_vm0, %v10927_v22, 0.0 }
 0x6ff   : > { %v6532_v31 = vsel %vm452_vm0, %v10924_v15, 0.0  ;;  %v10932_v36 = vadd.f32 %v10901_v24, %v6347_v35 }
 0x700   : > { %v6533_v32 = vadd.f32 %v6532_v31, %v6531_v21  ;;  %v6538_v53 = vsel %vm452_vm0, %v10935_v43, 0.0 }
 0x701   : > { %v6534_v60 = vsel %vm452_vm0, %v10932_v36, 0.0 }
 0x702   : > { %v6535_v23 = vadd.f32 %v6534_v60, %v6533_v32 }
 0x703   : > { %v8405_v55 = vpop.f32.mrb[8].mxu1 }
 0x704   : > { %v6537_v19 = vadd.f32 %v6536_v20, %v6535_v23  ;;  %v6360_v38 = vpop.f32.mrb[9].mxu1  ;;  %v10947_v50 = vadd.f32 %v8405_v55, %v10901_v24 }
 0x705   : > { %v10944_v56 = vadd.f32 %v10901_v24, %v6360_v38  ;;  %v8406_v1 = vpop.f32.mrb[10].mxu1 }
 0x706   : > { %v6539_v16 = vadd.f32 %v6538_v53, %v6537_v19  ;;  %v6363_v40 = vpop.f32.mrb[11].mxu1  ;;  %v10955_v18 = vadd.f32 %v8406_v1, %v10901_v24  ;;  %v6544_v29 = vsel %vm452_vm0, %v10947_v50, 0.0 }
 0x707   : > { %v6540_v54 = vsel %vm452_vm0, %v10944_v56, 0.0  ;;  %v10952_v45 = vadd.f32 %v10901_v24, %v6363_v40 }
 0x708   : > { %v6541_v39 = vadd.f32 %v6540_v54, %v6539_v16  ;;  %v6546_v0 = vsel %vm452_vm0, %v10955_v18, 0.0 }
 0x709   : > { %v6542_v61 = vsel %vm452_vm0, %v10952_v45, 0.0 }
 0x70a   : > { %v6543_v63 = vadd.f32 %v6542_v61, %v6541_v39 }
 0x70b   : > { %v8409_v58 = vpop.f32.mrb[12].mxu1 }
 0x70c   : > { %v6545_v26 = vadd.f32 %v6544_v29, %v6543_v63  ;;  %v6376_v57 = vpop.f32.mrb[13].mxu1  ;;  %v10967_v7 = vadd.f32 %v8409_v58, %v10901_v24 }
 0x70d   : > { %v10964_v51 = vadd.f32 %v10901_v24, %v6376_v57  ;;  %v8410_v30 = vpop.f32.mrb[14].mxu1 }
 0x70e   : > { %v6547_v42 = vadd.f32 %v6546_v0, %v6545_v26  ;;  %v6379_v62 = vpop.f32.mrb[15].mxu1  ;;  %v10975_v46 = vadd.f32 %v8410_v30, %v10901_v24  ;;  %v6552_v17 = vsel %vm452_vm0, %v10967_v7, 0.0 }
 0x70f   : > { %v6548_v37 = vsel %vm452_vm0, %v10964_v51, 0.0  ;;  %v10972_v28 = vadd.f32 %v10901_v24, %v6379_v62 }
 0x710   : > { %v6549_v27 = vadd.f32 %v6548_v37, %v6547_v42  ;;  %v6554_v33 = vsel %vm452_vm0, %v10975_v46, 0.0 }
 0x711   : > { %v6550_v48 = vsel %vm452_vm0, %v10972_v28, 0.0 }
 0x712   : > { %v6551_v2 = vadd.f32 %v6550_v48, %v6549_v27 }
 0x713   : > { %v8413_v25 = vpop.f32.mrb[16].mxu1 }
 0x714   : > { %v6553_v47 = vadd.f32 %v6552_v17, %v6551_v2  ;;  %v6392_v41 = vpop.f32.mrb[17].mxu1  ;;  %v10987_v32 = vadd.f32 %v8413_v25, %v10901_v24 }
 0x715   : > { %v10984_v14 = vadd.f32 %v10901_v24, %v6392_v41  ;;  %v8414_v21 = vpop.f32.mrb[18].mxu1 }
 0x716   : > { %v6555_v35 = vadd.f32 %v6554_v33, %v6553_v47  ;;  %v6395_v31 = vpop.f32.mrb[19].mxu1  ;;  %v10995_v55 = vadd.f32 %v8414_v21, %v10901_v24  ;;  %v6560_v53 = vsel %vm452_vm0, %v10987_v32, 0.0 }
 0x717   : > { %v6556_v60 = vsel %vm452_vm0, %v10984_v14, 0.0  ;;  %v10992_v23 = vadd.f32 %v10901_v24, %v6395_v31 }
 0x718   : > { %v6557_v20 = vadd.f32 %v6556_v60, %v6555_v35  ;;  %v6562_v54 = vsel %vm452_vm0, %v10995_v55, 0.0 }
 0x719   : > { %v6558_v19 = vsel %vm452_vm0, %v10992_v23, 0.0 }
 0x71a   : > { %v6559_v38 = vadd.f32 %v6558_v19, %v6557_v20 }
 0x71b   : > { %v8417_v1 = vpop.f32.mrb[20].mxu1 }
 0x71c   : > { %v6561_v16 = vadd.f32 %v6560_v53, %v6559_v38  ;;  %v6408_v40 = vpop.f32.mrb[21].mxu1  ;;  %v6515_v58 = vadd.f32 %v8417_v1, %v10901_v24 }
 0x71d   : > { %v11004_v39 = vadd.f32 %v10901_v24, %v6408_v40  ;;  %v8418_v61 = vpop.f32.mrb[22].mxu1 }
 0x71e   : > { %v6563_v63 = vadd.f32 %v6562_v54, %v6561_v16  ;;  %v6411_v29 = vpop.f32.mrb[23].mxu1  ;;  %v6516_v30 = vadd.f32 %v8418_v61, %v10901_v24  ;;  %v6568_v37 = vsel %vm452_vm0, %v6515_v58, 0.0 }
 0x71f   : > { %v6564_v26 = vsel %vm452_vm0, %v11004_v39, 0.0  ;;  %v6514_v57 = vadd.f32 %v10901_v24, %v6411_v29 }
 0x720   : > { %v6565_v0 = vadd.f32 %v6564_v26, %v6563_v63  ;;  %v6570_v17 = vsel %vm452_vm0, %v6516_v30, 0.0 }
 0x721   : > { %v6566_v42 = vsel %vm452_vm0, %v6514_v57, 0.0 }
 0x722   : > { %v6567_v62 = vadd.f32 %v6566_v42, %v6565_v0 }
 0x723   : > { %v8421_v27 = vpop.f32.mrb[24].mxu1 }
 0x724   : > { %v6569_v48 = vadd.f32 %v6568_v37, %v6567_v62  ;;  %v6424_v2 = vpop.f32.mrb[25].mxu1  ;;  %v6519_v21 = vadd.f32 %v8421_v27, %v10901_v24 }
 0x725   : > { %v6517_v25 = vadd.f32 %v10901_v24, %v6424_v2  ;;  %v8422_v47 = vpop.f32.mrb[26].mxu1 }
 0x726   : > { %v6571_v41 = vadd.f32 %v6570_v17, %v6569_v48  ;;  %v6427_v33 = vpop.f32.mrb[27].mxu1  ;;  %v6520_v20 = vadd.f32 %v8422_v47, %v10901_v24  ;;  %v6576_v53 = vsel %vm452_vm0, %v6519_v21, 0.0 }
 0x727   : > { %v6572_v35 = vsel %vm452_vm0, %v6517_v25, 0.0  ;;  %v6518_v31 = vadd.f32 %v10901_v24, %v6427_v33 }
 0x728   : > { %v6573_v60 = vadd.f32 %v6572_v35, %v6571_v41  ;;  %v6578_v54 = vsel %vm452_vm0, %v6520_v20, 0.0 }
 0x729   : > { %v6574_v19 = vsel %vm452_vm0, %v6518_v31, 0.0 }
 0x72a   : > { %v6575_v38 = vadd.f32 %v6574_v19, %v6573_v60 }
 0x72b   : > { %v8425_v1 = vpop.f32.mrb[28].mxu1 }
 0x72c   : > { %v6577_v16 = vadd.f32 %v6576_v53, %v6575_v38  ;;  %v6440_v40 = vpop.f32.mrb[29].mxu1  ;;  %v6523_v0 = vadd.f32 %v8425_v1, %v10901_v24 }
 0x72d   : > { %v6521_v61 = vadd.f32 %v10901_v24, %v6440_v40  ;;  %v8426_v63 = vpop.f32.mrb[30].mxu1 }
 0x72e   : > { %v6579_v29 = vadd.f32 %v6578_v54, %v6577_v16  ;;  %v6443_v26 = vpop.f32.mrb[31].mxu1  ;;  %v6524_v27 = vadd.f32 %v8426_v63, %v10901_v24  ;;  %v6584_v17 = vsel %vm452_vm0, %v6523_v0, 0.0 }
 0x72f   : > { %v6580_v42 = vsel %vm452_vm0, %v6521_v61, 0.0  ;;  %v6522_v62 = vadd.f32 %v10901_v24, %v6443_v26 }
 0x730   : > { %v6581_v37 = vadd.f32 %v6580_v42, %v6579_v29  ;;  %v6586_v41 = vsel %vm452_vm0, %v6524_v27, 0.0 }
 0x731   : > { %v6582_v48 = vsel %vm452_vm0, %v6522_v62, 0.0 }
 0x732   : > { %v6583_v2 = vadd.f32 %v6582_v48, %v6581_v37 }
 0x734   : > { %v6585_v47 = vadd.f32 %v6584_v17, %v6583_v2 }
 0x736   : > { %v6587_v33 = vadd.f32 %v6586_v41, %v6585_v47 }
 0x738   : > { %v6588_v35 = vrot.slane %v6587_v33, 4 }
 0x73a   : > { %v6589_v60 = vadd.f32 %v6588_v35, %v6587_v33 }
 0x73c   : > { %v6590_v19 = vrot.slane %v6589_v60, 2 }
 0x73e   : > { %v6591_v38 = vadd.f32 %v6590_v19, %v6589_v60 }
 0x740   : > { %v6592_v53 = vrot.slane %v6591_v38, 1 }
 0x742   : > { %v6593_v1 = vadd.f32 %v6592_v53, %v6591_v38 }
 0x744   : > { %v6594_v16 = vmul.f32 0.00390625, %v6593_v1 }
 0x746   : > { %v11031_v40 = vsub.f32 %v10952_v45, %v6594_v16  ;;  %v11034_v24 = vsub.f32 %v10955_v18, %v6594_v16  ;;  %v11037_v54 = vsub.f32 %v10964_v51, %v6594_v16  ;;  %v11040_v63 = vsub.f32 %v10972_v28, %v6594_v16 }
 0x747   : > { %v11043_v29 = vsub.f32 %v10967_v7, %v6594_v16  ;;  %v11046_v26 = vsub.f32 %v10975_v46, %v6594_v16  ;;  %v11049_v42 = vsub.f32 %v10984_v14, %v6594_v16  ;;  %v11052_v45 = vsub.f32 %v10992_v23, %v6594_v16 }
 0x748   : > { %v11055_v18 = vsub.f32 %v10987_v32, %v6594_v16  ;;  %v11058_v51 = vsub.f32 %v10995_v55, %v6594_v16  ;;  %v11061_v28 = vsub.f32 %v11004_v39, %v6594_v16  ;;  %v11063_v7 = vsub.f32 %v6514_v57, %v6594_v16 }
 0x749   : > { %v11065_v37 = vsub.f32 %v6515_v58, %v6594_v16  ;;  %v11067_v46 = vsub.f32 %v6516_v30, %v6594_v16  ;;  %v11069_v14 = vsub.f32 %v6517_v25, %v6594_v16  ;;  %v11071_v48 = vsub.f32 %v6518_v31, %v6594_v16 }
 0x74a   : > { %v11073_v23 = vsub.f32 %v6519_v21, %v6594_v16  ;;  %v11075_v32 = vsub.f32 %v6520_v20, %v6594_v16  ;;  %v11077_v2 = vsub.f32 %v6521_v61, %v6594_v16  ;;  %v11079_v55 = vsub.f32 %v6522_v62, %v6594_v16 }
 0x74b   : > { %v11081_v39 = vsub.f32 %v6523_v0, %v6594_v16  ;;  %v11083_v57 = vsub.f32 %v6524_v27, %v6594_v16  ;;  %v11086_v58 = vsub.f32 %v10904_v34, %v6594_v16  ;;  %v11089_v30 = vsub.f32 %v10910_v59, %v6594_v16 }
 0x74c   : > { %v11092_v25 = vsub.f32 %v10907_v44, %v6594_v16  ;;  %v11095_v21 = vsub.f32 %v10915_v49, %v6594_v16  ;;  %v11102_v61 = vsub.f32 %v10924_v15, %v6594_v16  ;;  %v11107_v59 = vsub.f32 %v10932_v36, %v6594_v16 }
 0x74d   : > { %v6627_v31 = vmul.f32 %v11086_v58, %v11086_v58  ;;  %v6628_v20 = vmul.f32 %v11089_v30, %v11089_v30  ;;  %v11114_v27 = vsub.f32 %v10927_v22, %v6594_v16  ;;  %v11120_v36 = vsub.f32 %v10935_v43, %v6594_v16 }
 0x74e   : > { %v6629_v34 = vmul.f32 %v11092_v25, %v11092_v25  ;;  %v6630_v44 = vmul.f32 %v11095_v21, %v11095_v21  ;;  %v6631_v15 = vmul.f32 %v11102_v61, %v11102_v61  ;;  %v6632_v41 = vmul.f32 %v11107_v59, %v11107_v59 }
 0x74f   : > { %v6659_v49 = vsel %vm452_vm0, %v6627_v31, 0.0  ;;  %v6660_v0 = vsel %vm452_vm0, %v6628_v20, 0.0  ;;  %v11126_v60 = vsub.f32 %v10944_v56, %v6594_v16  ;;  %v6633_v22 = vmul.f32 %v11114_v27, %v11114_v27 }
 0x750   : > { %v6661_v62 = vadd.f32 %v6660_v0, %v6659_v49  ;;  %v6662_v17 = vsel %vm452_vm0, %v6629_v34, 0.0  ;;  %v6664_v33 = vsel %vm452_vm0, %v6630_v44, 0.0  ;;  %v6666_v19 = vsel %vm452_vm0, %v6631_v15, 0.0 }
 0x751   : > { %v6634_v53 = vmul.f32 %v11120_v36, %v11120_v36  ;;  %v6668_v43 = vsel %vm452_vm0, %v6632_v41, 0.0  ;;  %v11135_v31 = vsub.f32 %v10947_v50, %v6594_v16  ;;  %v6635_v20 = vmul.f32 %v11126_v60, %v11126_v60 }
 0x752   : > { %v6663_v47 = vadd.f32 %v6662_v17, %v6661_v62  ;;  %v6670_v56 = vsel %vm452_vm0, %v6633_v22, 0.0  ;;  %v6636_v44 = vmul.f32 %v11031_v40, %v11031_v40  ;;  %v6638_v50 = vmul.f32 %v11034_v24, %v11034_v24 }
 0x753   : > { %v6672_v49 = vsel %vm452_vm0, %v6634_v53, 0.0  ;;  %v6637_v62 = vmul.f32 %v11135_v31, %v11135_v31  ;;  %v6674_v15 = vsel %vm452_vm0, %v6635_v20, 0.0  ;;  %v6639_v41 = vmul.f32 %v11037_v54, %v11037_v54 }
 0x754   : > { %v6665_v35 = vadd.f32 %v6664_v33, %v6663_v47  ;;  %v6676_v16 = vsel %vm452_vm0, %v6636_v44, 0.0  ;;  %v6640_v22 = vmul.f32 %v11040_v63, %v11040_v63  ;;  %v6641_v53 = vmul.f32 %v11043_v29, %v11043_v29 }
 0x755   : > { %v6678_v33 = vsel %vm452_vm0, %v6637_v62, 0.0  ;;  %v6642_v20 = vmul.f32 %v11046_v26, %v11046_v26  ;;  %v6643_v44 = vmul.f32 %v11049_v42, %v11049_v42  ;;  %v6644_v62 = vmul.f32 %v11052_v45, %v11052_v45 }
 0x756   : > { %v6667_v38 = vadd.f32 %v6666_v19, %v6665_v35  ;;  %v6680_v19 = vsel %vm452_vm0, %v6638_v50, 0.0  ;;  %v6645_v50 = vmul.f32 %v11055_v18, %v11055_v18 }
 0x758   : > { %v6669_v1 = vadd.f32 %v6668_v43, %v6667_v38  ;;  %v6682_v43 = vsel %vm452_vm0, %v6639_v41, 0.0  ;;  %v6646_v41 = vmul.f32 %v11058_v51, %v11058_v51 }
 0x75a   : > { %v6671_v34 = vadd.f32 %v6670_v56, %v6669_v1  ;;  %v6684_v56 = vsel %vm452_vm0, %v6640_v22, 0.0  ;;  %v6647_v22 = vmul.f32 %v11061_v28, %v11061_v28 }
 0x75c   : > { %v6673_v0 = vadd.f32 %v6672_v49, %v6671_v34  ;;  %v6686_v49 = vsel %vm452_vm0, %v6641_v53, 0.0  ;;  %v6648_v53 = vmul.f32 %v11063_v7, %v11063_v7 }
 0x75e   : > { %v6675_v17 = vadd.f32 %v6674_v15, %v6673_v0  ;;  %v6688_v15 = vsel %vm452_vm0, %v6642_v20, 0.0  ;;  %v6649_v20 = vmul.f32 %v11065_v37, %v11065_v37 }
 0x760   : > { %v6677_v47 = vadd.f32 %v6676_v16, %v6675_v17  ;;  %v6690_v16 = vsel %vm452_vm0, %v6643_v44, 0.0  ;;  %v6650_v44 = vmul.f32 %v11067_v46, %v11067_v46 }
 0x762   : > { %v6679_v35 = vadd.f32 %v6678_v33, %v6677_v47  ;;  %v6692_v33 = vsel %vm452_vm0, %v6644_v62, 0.0  ;;  %v6651_v62 = vmul.f32 %v11069_v14, %v11069_v14 }
 0x764   : > { %v6681_v38 = vadd.f32 %v6680_v19, %v6679_v35  ;;  %v6694_v19 = vsel %vm452_vm0, %v6645_v50, 0.0  ;;  %v6652_v50 = vmul.f32 %v11071_v48, %v11071_v48 }
 0x766   : > { %v6683_v1 = vadd.f32 %v6682_v43, %v6681_v38  ;;  %v6696_v43 = vsel %vm452_vm0, %v6646_v41, 0.0  ;;  %v6653_v41 = vmul.f32 %v11073_v23, %v11073_v23 }
 0x768   : > { %v6685_v34 = vadd.f32 %v6684_v56, %v6683_v1  ;;  %v6698_v56 = vsel %vm452_vm0, %v6647_v22, 0.0  ;;  %v6654_v22 = vmul.f32 %v11075_v32, %v11075_v32 }
 0x76a   : > { %v6687_v0 = vadd.f32 %v6686_v49, %v6685_v34  ;;  %v6700_v49 = vsel %vm452_vm0, %v6648_v53, 0.0  ;;  %v6655_v53 = vmul.f32 %v11077_v2, %v11077_v2 }
 0x76c   : > { %v6689_v17 = vadd.f32 %v6688_v15, %v6687_v0  ;;  %v6702_v15 = vsel %vm452_vm0, %v6649_v20, 0.0  ;;  %v6656_v20 = vmul.f32 %v11079_v55, %v11079_v55 }
 0x76e   : > { %v6691_v47 = vadd.f32 %v6690_v16, %v6689_v17  ;;  %v6704_v16 = vsel %vm452_vm0, %v6650_v44, 0.0  ;;  %v6657_v44 = vmul.f32 %v11081_v39, %v11081_v39 }
 0x770   : > { %v6693_v35 = vadd.f32 %v6692_v33, %v6691_v47  ;;  %v6706_v33 = vsel %vm452_vm0, %v6651_v62, 0.0  ;;  %v6658_v62 = vmul.f32 %v11083_v57, %v11083_v57 }
 0x772   : > { %v6695_v38 = vadd.f32 %v6694_v19, %v6693_v35  ;;  %v6708_v19 = vsel %vm452_vm0, %v6652_v50, 0.0  ;;  %v6718_v50 = vsel %vm452_vm0, %v6657_v44, 0.0 }
 0x774   : > { %v6697_v1 = vadd.f32 %v6696_v43, %v6695_v38  ;;  %v6710_v43 = vsel %vm452_vm0, %v6653_v41, 0.0 }
 0x776   : > { %v6699_v34 = vadd.f32 %v6698_v56, %v6697_v1  ;;  %v6712_v56 = vsel %vm452_vm0, %v6654_v22, 0.0 }
 0x778   : > { %v6701_v0 = vadd.f32 %v6700_v49, %v6699_v34  ;;  %v6714_v49 = vsel %vm452_vm0, %v6655_v53, 0.0 }
 0x77a   : > { %v6703_v17 = vadd.f32 %v6702_v15, %v6701_v0  ;;  %v6716_v15 = vsel %vm452_vm0, %v6656_v20, 0.0 }
 0x77c   : > { %v6705_v47 = vadd.f32 %v6704_v16, %v6703_v17 }
 0x77e   : > { %v6707_v35 = vadd.f32 %v6706_v33, %v6705_v47  ;;  %v6720_v47 = vsel %vm452_vm0, %v6658_v62, 0.0 }
 0x780   : > { %v6709_v38 = vadd.f32 %v6708_v19, %v6707_v35 }
 0x782   : > { %v6711_v1 = vadd.f32 %v6710_v43, %v6709_v38 }
 0x784   : > { %v6713_v34 = vadd.f32 %v6712_v56, %v6711_v1 }
 0x786   : > { %v6715_v0 = vadd.f32 %v6714_v49, %v6713_v34 }
 0x788   : > { %v6717_v17 = vadd.f32 %v6716_v15, %v6715_v0 }
 0x78a   : > { %v6719_v16 = vadd.f32 %v6718_v50, %v6717_v17 }
 0x78c   : > { %v6721_v41 = vadd.f32 %v6720_v47, %v6719_v16 }
 0x78e   : > { %v6722_v33 = vrot.slane %v6721_v41, 4 }
 0x790   : > { %v6723_v35 = vadd.f32 %v6722_v33, %v6721_v41  ;;  %v11491_v41 = vld [vmem:[#allocation13_spill] sm:$0xff]  ;;  %v11492_v33 = vld [vmem:[#allocation14_spill] sm:$0xff] }
 0x792   : > { %v6724_v22 = vrot.slane %v6723_v35, 2 }
 0x794   : > { %v6725_v19 = vadd.f32 %v6724_v22, %v6723_v35  ;;  %v11493_v35 = vld [vmem:[#allocation15_spill] sm:$0xff]  ;;  %v11494_v22 = vld [vmem:[#allocation16_spill] sm:$0xff] }
 0x796   : > { %v6726_v38 = vrot.slane %v6725_v19, 1 }
 0x798   : > { %v6727_v43 = vadd.f32 %v6726_v38, %v6725_v19  ;;  %v11495_v19 = vld [vmem:[#allocation17_spill] sm:$0xff]  ;;  %v11496_v38 = vld [vmem:[#allocation18_spill] sm:$0xff] }
 0x79a   : > { %v6728_v53 = vmul.f32 0.00390625, %v6727_v43  ;;  %v11497_v43 = vld [vmem:[#allocation19_spill] sm:$0xff] }
 0x79c   : > { %v6729_v1 = vadd.f32 1e-05, %v6728_v53  ;;  %v11498_v53 = vld [vmem:[#allocation20_spill] sm:$0xff] }
 0x79e   : > { %9086 = vrsqrt.f32 %v6729_v1  ;;  %v11499_v1 = vld [vmem:[#allocation21_spill] sm:$0xff] }
 0x7a8   : > { %v9087_v56 = vpop.eup %9086 }
 0x7a9   : > { %v6760_v34 = vmul.f32 %v9087_v56, %v11079_v55  ;;  %v6731_v20 = vmul.f32 %v9087_v56, %v11086_v58  ;;  %v6732_v44 = vmul.f32 %v9087_v56, %v11089_v30  ;;  %v6733_v49 = vmul.f32 %v9087_v56, %v11092_v25 }
 0x7aa   : > { %v6734_v0 = vmul.f32 %v9087_v56, %v11095_v21  ;;  %v6735_v62 = vmul.f32 %v9087_v56, %v11102_v61  ;;  %v6736_v15 = vmul.f32 %v9087_v56, %v11107_v59  ;;  %v6737_v17 = vmul.f32 %v9087_v56, %v11114_v27 }
 0x7ab   : > { %v6792_v50 = vadd.f32 %v6760_v34, %v9635_v52  ;;  %v6738_v16 = vmul.f32 %v9087_v56, %v11120_v36  ;;  %v6739_v55 = vmul.f32 %v9087_v56, %v11126_v60  ;;  %v6740_v58 = vmul.f32 %v9087_v56, %v11031_v40  ;;  %v11501_v34 = vld [vmem:[#allocation23_spill] sm:$0xff] }
 0x7ac   : > { %v6741_v30 = vmul.f32 %v9087_v56, %v11135_v31  ;;  %v6742_v25 = vmul.f32 %v9087_v56, %v11034_v24  ;;  %v6743_v21 = vmul.f32 %v9087_v56, %v11037_v54  ;;  %v6744_v61 = vmul.f32 %v9087_v56, %v11040_v63 }
 0x7ad   : > { %v6824_v59 = vmax.f32 %v6792_v50, 0.0  ;;  %v6745_v27 = vmul.f32 %v9087_v56, %v11043_v29  ;;  %v6746_v52 = vmul.f32 %v9087_v56, %v11046_v26  ;;  %v6747_v47 = vmul.f32 %v9087_v56, %v11049_v42  ;;  %v11505_v50 = vld [vmem:[#allocation27_spill] sm:$0xff] }
 0x7ae   : > { %v6748_v36 = vmul.f32 %v9087_v56, %v11052_v45  ;;  %v6749_v60 = vmul.f32 %v9087_v56, %v11055_v18  ;;  %v6750_v40 = vmul.f32 %v9087_v56, %v11058_v51  ;;  %v6751_v31 = vmul.f32 %v9087_v56, %v11061_v28 }
 0x7af   : > { %6856 = vst.msk [vmem:[%s11236_s11 + $0xe8] sm:$0xff] %vm452_vm0, %v6824_v59  ;;  %v6752_v24 = vmul.f32 %v9087_v56, %v11063_v7  ;;  %v6753_v54 = vmul.f32 %v9087_v56, %v11065_v37  ;;  %v6754_v63 = vmul.f32 %v9087_v56, %v11067_v46  ;;  %v6755_v29 = vmul.f32 %v9087_v56, %v11069_v14  ;;  %v11509_v59 = vld [vmem:[#allocation31_spill] sm:$0xff] }
 0x7b0   : > { %v6756_v26 = vmul.f32 %v9087_v56, %v11071_v48  ;;  %v6757_v42 = vmul.f32 %v9087_v56, %v11073_v23  ;;  %v6758_v45 = vmul.f32 %v9087_v56, %v11075_v32  ;;  %v6759_v18 = vmul.f32 %v9087_v56, %v11077_v2 }
 0x7b1   : > { %v6761_v51 = vmul.f32 %v9087_v56, %v11081_v39  ;;  %v6762_v28 = vmul.f32 %v9087_v56, %v11083_v57  ;;  %v6763_v7 = vadd.f32 %v6731_v20, %v9481_v5  ;;  %v6764_v37 = vadd.f32 %v6732_v44, %v9492_v6  ;;  %v11500_v56 = vld [vmem:[#allocation22_spill] sm:$0xff]  ;;  %v11502_v44 = vld [vmem:[#allocation24_spill] sm:$0xff] }
 0x7b2   : > { %v6765_v46 = vadd.f32 %v6733_v49, %v9475_v3  ;;  %v6766_v14 = vadd.f32 %v6734_v0, %v9478_v4  ;;  %v6767_v48 = vadd.f32 %v6735_v62, %v9499_v8  ;;  %v6768_v23 = vadd.f32 %v6736_v15, %v9502_v9  ;;  %v11503_v0 = vld [vmem:[#allocation25_spill] sm:$0xff]  ;;  %v11504_v15 = vld [vmem:[#allocation26_spill] sm:$0xff] }
 0x7b3   : > { %v6769_v32 = vadd.f32 %v6737_v17, %v9509_v10  ;;  %v6770_v2 = vadd.f32 %v6738_v16, %v9512_v11  ;;  %v6771_v39 = vadd.f32 %v6739_v55, %v9515_v12  ;;  %v6772_v57 = vadd.f32 %v6740_v58, %v9522_v13  ;;  %v11506_v55 = vld [vmem:[#allocation28_spill] sm:$0xff] }
 0x7b4   : > { %v6773_v5 = vadd.f32 %v6741_v30, %v11491_v41  ;;  %v6774_v6 = vadd.f32 %v6742_v25, %v11492_v33  ;;  %v6775_v3 = vadd.f32 %v6743_v21, %v11493_v35  ;;  %v6776_v4 = vadd.f32 %v6744_v61, %v11494_v22  ;;  %v11507_v30 = vld [vmem:[#allocation29_spill] sm:$0xff]  ;;  %v11508_v21 = vld [vmem:[#allocation30_spill] sm:$0xff] }
 0x7b5   : > { %v6777_v8 = vadd.f32 %v6745_v27, %v11495_v19  ;;  %v6778_v9 = vadd.f32 %v6746_v52, %v11496_v38  ;;  %v6779_v10 = vadd.f32 %v6747_v47, %v11497_v43  ;;  %v6780_v11 = vadd.f32 %v6748_v36, %v11498_v53  ;;  %v11510_v52 = vld [vmem:[#allocation32_spill] sm:$0xff]  ;;  %v11511_v36 = vld [vmem:[#allocation33_spill] sm:$0xff] }
 0x7b6   : > { %v6781_v12 = vadd.f32 %v6749_v60, %v11499_v1  ;;  %v11270_v13 = vadd.f32 %v6750_v40, %v11500_v56  ;;  %v11273_v20 = vadd.f32 %v6751_v31, %v11501_v34  ;;  %v11276_v49 = vadd.f32 %v6752_v24, %v11502_v44 }
 0x7b7   : > { %v11279_v62 = vadd.f32 %v6753_v54, %v11503_v0  ;;  %v11282_v17 = vadd.f32 %v6754_v63, %v11504_v15  ;;  %v11285_v16 = vadd.f32 %v6755_v29, %v11505_v50  ;;  %v11288_v58 = vadd.f32 %v6756_v26, %v11506_v55 }
 0x7b8   : > { %v11291_v25 = vadd.f32 %v6757_v42, %v11507_v30  ;;  %v11294_v61 = vadd.f32 %v6758_v45, %v11508_v21  ;;  %v11297_v27 = vadd.f32 %v6759_v18, %v11509_v59  ;;  %v11300_v47 = vadd.f32 %v6761_v51, %v11510_v52 }
 0x7b9   : > { %v11303_v60 = vadd.f32 %v6762_v28, %v11511_v36  ;;  %v6795_v40 = vmax.f32 %v6763_v7, 0.0  ;;  %v6796_v31 = vmax.f32 %v6764_v37, 0.0  ;;  %v6797_v24 = vmax.f32 %v6765_v46, 0.0 }
 0x7ba   : > { %v6798_v54 = vmax.f32 %v6766_v14, 0.0  ;;  %v6799_v63 = vmax.f32 %v6767_v48, 0.0  ;;  %v6800_v29 = vmax.f32 %v6768_v23, 0.0  ;;  %v6801_v26 = vmax.f32 %v6769_v32, 0.0 }
 0x7bb   : > { %v6802_v42 = vmax.f32 %v6770_v2, 0.0  ;;  %v6803_v45 = vmax.f32 %v6771_v39, 0.0  ;;  %v6804_v18 = vmax.f32 %v6772_v57, 0.0  ;;  %v6805_v51 = vmax.f32 %v6773_v5, 0.0  ;;  %6827 = vst.msk [vmem:[%s11236_s11] sm:$0xff] %vm452_vm0, %v6795_v40  ;;  %6828 = vst.msk [vmem:[%s11236_s11 + $0x8] sm:$0xff] %vm452_vm0, %v6796_v31 }
 0x7bc   : > { %6829 = vst.msk [vmem:[%s11236_s11 + $0x10] sm:$0xff] %vm452_vm0, %v6797_v24  ;;  %v6806_v28 = vmax.f32 %v6774_v6, 0.0  ;;  %v6807_v7 = vmax.f32 %v6775_v3, 0.0  ;;  %v6808_v37 = vmax.f32 %v6776_v4, 0.0  ;;  %v6809_v46 = vmax.f32 %v6777_v8, 0.0  ;;  %6830 = vst.msk [vmem:[%s11236_s11 + $0x18] sm:$0xff] %vm452_vm0, %v6798_v54 }
 0x7bd   : > { %6831 = vst.msk [vmem:[%s11236_s11 + $0x20] sm:$0xff] %vm452_vm0, %v6799_v63  ;;  %6832 = vst.msk [vmem:[%s11236_s11 + $0x28] sm:$0xff] %vm452_vm0, %v6800_v29  ;;  %v6810_v14 = vmax.f32 %v6778_v9, 0.0  ;;  %v6811_v48 = vmax.f32 %v6779_v10, 0.0  ;;  %v6812_v23 = vmax.f32 %v6780_v11, 0.0  ;;  %v6813_v32 = vmax.f32 %v6781_v12, 0.0 }
 0x7be   : > { %6833 = vst.msk [vmem:[%s11236_s11 + $0x30] sm:$0xff] %vm452_vm0, %v6801_v26  ;;  %6834 = vst.msk [vmem:[%s11236_s11 + $0x38] sm:$0xff] %vm452_vm0, %v6802_v42  ;;  %v6814_v2 = vmax.f32 %v11270_v13, 0.0  ;;  %v6815_v39 = vmax.f32 %v11273_v20, 0.0  ;;  %v6816_v57 = vmax.f32 %v11276_v49, 0.0  ;;  %v6817_v41 = vmax.f32 %v11279_v62, 0.0 }
 0x7bf   : > { %6835 = vst.msk [vmem:[%s11236_s11 + $0x40] sm:$0xff] %vm452_vm0, %v6803_v45  ;;  %6836 = vst.msk [vmem:[%s11236_s11 + $0x48] sm:$0xff] %vm452_vm0, %v6804_v18  ;;  %v6818_v5 = vmax.f32 %v11282_v17, 0.0  ;;  %v6819_v33 = vmax.f32 %v11285_v16, 0.0  ;;  %v6820_v6 = vmax.f32 %v11288_v58, 0.0  ;;  %v6821_v35 = vmax.f32 %v11291_v25, 0.0 }
 0x7c0   : > { %6837 = vst.msk [vmem:[%s11236_s11 + $0x50] sm:$0xff] %vm452_vm0, %v6805_v51  ;;  %6838 = vst.msk [vmem:[%s11236_s11 + $0x58] sm:$0xff] %vm452_vm0, %v6806_v28  ;;  %v6822_v3 = vmax.f32 %v11294_v61, 0.0  ;;  %v6823_v22 = vmax.f32 %v11297_v27, 0.0  ;;  %v6825_v4 = vmax.f32 %v11300_v47, 0.0  ;;  %v6826_v19 = vmax.f32 %v11303_v60, 0.0 }
 0x7c1   : > { %6839 = vst.msk [vmem:[%s11236_s11 + $0x60] sm:$0xff] %vm452_vm0, %v6807_v7  ;;  %6840 = vst.msk [vmem:[%s11236_s11 + $0x68] sm:$0xff] %vm452_vm0, %v6808_v37 }
 0x7c2   : > { %6841 = vst.msk [vmem:[%s11236_s11 + $0x70] sm:$0xff] %vm452_vm0, %v6809_v46  ;;  %6842 = vst.msk [vmem:[%s11236_s11 + $0x78] sm:$0xff] %vm452_vm0, %v6810_v14 }
 0x7c3   : > { %6843 = vst.msk [vmem:[%s11236_s11 + $0x80] sm:$0xff] %vm452_vm0, %v6811_v48  ;;  %6844 = vst.msk [vmem:[%s11236_s11 + $0x88] sm:$0xff] %vm452_vm0, %v6812_v23 }
 0x7c4   : > { %6845 = vst.msk [vmem:[%s11236_s11 + $0x90] sm:$0xff] %vm452_vm0, %v6813_v32  ;;  %6846 = vst.msk [vmem:[%s11236_s11 + $0x98] sm:$0xff] %vm452_vm0, %v6814_v2 }
 0x7c5   : > { %6847 = vst.msk [vmem:[%s11236_s11 + $0xa0] sm:$0xff] %vm452_vm0, %v6815_v39  ;;  %6848 = vst.msk [vmem:[%s11236_s11 + $0xa8] sm:$0xff] %vm452_vm0, %v6816_v57 }
 0x7c6   : > { %6849 = vst.msk [vmem:[%s11236_s11 + $0xb0] sm:$0xff] %vm452_vm0, %v6817_v41  ;;  %6850 = vst.msk [vmem:[%s11236_s11 + $0xb8] sm:$0xff] %vm452_vm0, %v6818_v5 }
 0x7c7   : > { %6851 = vst.msk [vmem:[%s11236_s11 + $0xc0] sm:$0xff] %vm452_vm0, %v6819_v33  ;;  %6852 = vst.msk [vmem:[%s11236_s11 + $0xc8] sm:$0xff] %vm452_vm0, %v6820_v6 }
 0x7c8   : > { %6853 = vst.msk [vmem:[%s11236_s11 + $0xd0] sm:$0xff] %vm452_vm0, %v6821_v35  ;;  %6854 = vst.msk [vmem:[%s11236_s11 + $0xd8] sm:$0xff] %vm452_vm0, %v6822_v3 }
 0x7c9   : > { %6855 = vst.msk [vmem:[%s11236_s11 + $0xe0] sm:$0xff] %vm452_vm0, %v6823_v22  ;;  %6857 = vst.msk [vmem:[%s11236_s11 + $0xf0] sm:$0xff] %vm452_vm0, %v6825_v4 }
 0x7ca   : > { %6858 = vst.msk [vmem:[%s11236_s11 + $0xf8] sm:$0xff] %vm452_vm0, %v6826_v19 }
 0x7cb   : > { %9187 = shalt.err (!%p9184_p2)
}
 0x7cc   : > { %s9188_s6 = scalar_lea.hbm %s11356_s16, 4096  ;;  %s9192_s8 = scalar_lea.hbm %s11435_s5, 8192 }
 0x7cd   : > { %p9189_p13 = scmp.ne.s32.totalorder %s11356_s16, %s9188_s6  ;;  %p9193_p4 = scmp.lt.u32.totalorder %s11356_s16, %s11435_s5 }
 0x7ce   : > { %p9194_p5 = scmp.lt.u32.totalorder %s9192_s8, %s9188_s6  ;;  %p9196_p11 = scmp.lt.u32.totalorder %s9188_s6, %s11356_s16 }
 0x7cf   : > { %p9190_p6 = pnand %p9189_p13, %p11512_p0 }
 0x7d0   : > { %p9195_p8 = por %p9194_p5, %p9193_p4 }
 0x7d1   : > { %p9191_p10 = pneg %p9190_p6 }
 0x7d2   : > { %p9197_p1 = por %p9196_p11, %p9195_p8 }
 0x7d4   : > { %p9198_p3 = pnand %p9197_p1, %p9191_p10 }
 0x7d6   : > { %9201 = shalt.err (!%p9198_p3)
}
 0x7d7   : > { %s9254_s28 = smov 128   ;;  %s9255_s22 = smov 8  }
 0x7d8   : > { %8949 = dma.vmem_to_hbm [thread:$0]  (%p11512_p0), %s11358_s30, 4096, %s11356_s16, %s6860_s9, %s9254_s28, %s9254_s28, %s9255_s22  }
 0x7d9 PF: > { %s6888_s15 = sand.u32 1, %s9232_s18   ;;  %p11513_p7 = scmp.ne.s32.totalorder %s11461_s25, 0 }
 0x7da   : > { %p11514_p9 = scmp.ge.s32.totalorder %s9244_s21, 2  ;;  %s6889_s12 = scalar_lea.sflag [#allocation5], %s6888_s15 }
 0x7dc   : > { %p8963_p12 = pnand %p11514_p9, %p11513_p7 }
 0x7de   : > { %9227 = dma.done.wait (!%p8963_p12), %s6889_s12, 4096  }
 0x7df   : > { %9229 = vsyncadd (!%p8963_p12), %s6889_s12, 4294963200  ;;  %p19_p2 = scmp.ge.s32.totalorder %s9396_s14, 4   ;;  %s11515_s18 = smov %s9236_s19 }
 0x7e0   : > { %s11516_s19 = smov %s9240_s20  ;;  %s11517_s20 = smov %s9412_s27 }
 0x7e1   : > { %s11518_s21 = smov %s9396_s14  ;;  %21 = sbr.rel (!%p19_p2) target bundleno = 6 (0x6), region = 96 }
 0x7e8   :  { %6894 = vsyncpa [#allocation4], 1 }
 0x7e9   :  { %6896 = vsyncpa [#allocation4 + $0x1], 1 }
 0x7ea   :  { %6897 = vsyncpa [#allocation7], 1 }
 0x7eb   :  { %6898 = vsyncpa [#allocation5], 1 }
 0x7ec   :  { %6900 = vsyncpa [#allocation5 + $0x1], 1 }

</bundles_post_ra>
